<compile_context>
chip_gen: v6e
topology: v6e:2x2x1
jax: 0.10.0
libtpu: 0.0.40
codegen_flags: <defaults>
</compile_context>

<pallas_src>
import functools

import jax
import jax.numpy as jnp
from jax import lax
from jax.experimental import pallas as pl
from jax.experimental.pallas import tpu as pltpu


# ----------------------------------------------------------------------------
# Fused Pallas kernel
# ----------------------------------------------------------------------------
def _inverted_residual_kernel(*refs, expand, use_res, stride, dilate,
                              H, W, Ho, Wo, hidden):
    if expand:
        (x_ref, w1_ref, b1_ref, w2_ref, b2_ref, w3_ref, b3_ref,
         o_ref, pad_ref) = refs
    else:
        (x_ref, w2_ref, b2_ref, w3_ref, b3_ref, o_ref, pad_ref) = refs

    d = dilate
    x_cm = x_ref[0]                                  # (Cin, H*W), channel-first

    # ---- 1x1 expand conv (BN scale folded into weights) + ReLU6 ------------
    if expand:
        # (H*W, hidden) = x^T @ w1f  (contract the channel dim of both).
        h = lax.dot_general(x_cm, w1_ref[...],
                            dimension_numbers=(((0,), (0,)), ((), ())),
                            preferred_element_type=jnp.float32)
        h = jnp.clip(h + b1_ref[...], 0.0, 6.0)      # (H*W, hidden)
    else:
        h = x_cm.T                                   # (H*W, hidden == Cin)

    # ---- zero-pad into VMEM scratch (no HBM pad round-trip) ----------------
    h_hwc = h.reshape(H, W, hidden)                  # channels-last, C in lanes
    pad_ref[...] = jnp.zeros_like(pad_ref)
    pad_ref[d:d + H, d:d + W, :] = h_hwc.astype(jnp.float32)
    hp = pad_ref[...]                                # (H+2d, W+2d, hidden)

    # ---- depthwise 3x3 conv (BN folded) + ReLU6 ----------------------------
    wd = w2_ref[...]                                 # (9, hidden), hoisted once
    acc = jnp.zeros((Ho, Wo, hidden), jnp.float32)
    if stride == 1:
        for kh in range(3):
            for kw in range(3):
                k = 3 * kh + kw
                patch = hp[kh * d:kh * d + Ho, kw * d:kw * d + Wo, :]
                acc = acc + patch * wd[k:k + 1, :]
    else:
        # stride == 2: split even/odd phases once, then every tap is a cheap
        # contiguous slice of its phase (no per-tap strided slicing).
        # TODO(synk): this branch is not exercised by the demo config below.
        phases = {}
        for kh in range(3):
            for kw in range(3):
                k = 3 * kh + kw
                h0, w0 = kh * d, kw * d
                key = (h0 % 2, w0 % 2)
                if key not in phases:
                    phases[key] = hp[key[0]::2, key[1]::2, :]
                ph = phases[key]
                patch = ph[h0 // 2:h0 // 2 + Ho, w0 // 2:w0 // 2 + Wo, :]
                acc = acc + patch * wd[k:k + 1, :]
    y = jnp.clip(acc + b2_ref[...], 0.0, 6.0)        # (Ho, Wo, hidden)
    y2 = y.reshape(Ho * Wo, hidden)

    # ---- 1x1 project conv (BN folded) + residual, channel-first output -----
    # (Cout, Ho*Wo) so the store is lane-dense (minor dim = Ho*Wo >= 128) and
    # the result is already in NCHW order (no trailing transpose pass).
    out_cm = lax.dot_general(w3_ref[...], y2,
                             dimension_numbers=(((1,), (1,)), ((), ())),
                             preferred_element_type=jnp.float32)
    out_cm = out_cm + b3_ref[...]                    # (Cout, 1) bias
    if use_res:
        out_cm = out_cm + x_cm                       # residual add (NCHW layout)
    o_ref[0] = out_cm.astype(o_ref.dtype)


def inverted_residual_pallas(x_nchw, params, *, inp, oup, stride, dilate,
                             expand_ratio):
    assert stride in (1, 2)
    assert dilate >= 1
    N, Cin, H, W = x_nchw.shape
    assert Cin == inp
    hidden = params["hidden"]
    expand = expand_ratio != 1
    use_res = (stride == 1) and (inp == oup)
    d = dilate
    Ho = (H - 1) // stride + 1
    Wo = (W - 1) // stride + 1
    M, Mo = H * W, Ho * Wo
    Hp, Wp = H + 2 * d, W + 2 * d

    # Free reshape: NCHW -> (N, C, H*W); no transpose, no copy.
    x_flat = x_nchw.reshape(N, Cin, M)

    # Fold BN scales into conv weights once, outside the kernel (tiny arrays).
    s2, b2 = params["bn2"]
    s3, b3 = params["bn3"]
    w2f = (params["w2"] * s2[None, None, :]).reshape(9, hidden).astype(jnp.float32)
    w3tf = (params["w3"] * s3[None, :]).T.astype(jnp.float32)      # (oup, hidden)
    b2r = b2.reshape(1, hidden).astype(jnp.float32)
    b3r = b3.reshape(oup, 1).astype(jnp.float32)

    args = [x_flat]
    in_specs = [pl.BlockSpec((1, Cin, M), lambda n: (n, 0, 0))]
    if expand:
        s1, b1 = params["bn1"]
        w1f = (params["w1"] * s1[None, :]).astype(jnp.float32)     # (Cin, hidden)
        b1r = b1.reshape(1, hidden).astype(jnp.float32)
        args += [w1f, b1r]
        in_specs += [pl.BlockSpec((Cin, hidden), lambda n: (0, 0)),
                     pl.BlockSpec((1, hidden), lambda n: (0, 0))]
    args += [w2f, b2r, w3tf, b3r]
    in_specs += [pl.BlockSpec((9, hidden), lambda n: (0, 0)),
                 pl.BlockSpec((1, hidden), lambda n: (0, 0)),
                 pl.BlockSpec((oup, hidden), lambda n: (0, 0)),
                 pl.BlockSpec((oup, 1), lambda n: (0, 0))]

    kernel = functools.partial(
        _inverted_residual_kernel,
        expand=expand, use_res=use_res, stride=stride, dilate=d,
        H=H, W=W, Ho=Ho, Wo=Wo, hidden=hidden)

    out_flat = pl.pallas_call(
        kernel,
        out_shape=jax.ShapeDtypeStruct((N, oup, Mo), x_nchw.dtype),
        grid=(N,),
        in_specs=in_specs,
        out_specs=pl.BlockSpec((1, oup, Mo), lambda n: (n, 0, 0)),
        scratch_shapes=[pltpu.VMEM((Hp, Wp, hidden), jnp.float32)],
        compiler_params=pltpu.CompilerParams(dimension_semantics=("parallel",)),
    )(*args)
    return out_flat.reshape(N, oup, Ho, Wo)          # free reshape back to NCHW


# ----------------------------------------------------------------------------
# Parameter construction (deterministic, mirrors nn.Module __init__ shapes)
# ----------------------------------------------------------------------------
def fold_bn(gamma, beta, mean, var, eps=1e-5):
    scale = gamma / jnp.sqrt(var + eps)
    bias = beta - mean * scale
    return scale, bias


def make_params(key, inp, oup, expand_ratio):
    hidden = int(round(inp * expand_ratio))
    keys = jax.random.split(key, 16)
    p = {}
    if expand_ratio != 1:
        # 1x1 expand conv: PyTorch weight [hidden, inp, 1, 1] -> [inp, hidden]
        p["w1"] = 0.1 * jax.random.normal(keys[0], (inp, hidden), jnp.float32)
        p["bn1"] = fold_bn(
            1.0 + 0.1 * jax.random.normal(keys[1], (hidden,), jnp.float32),
            0.1 * jax.random.normal(keys[2], (hidden,), jnp.float32),
            0.1 * jax.random.normal(keys[3], (hidden,), jnp.float32),
            0.5 + jax.random.uniform(keys[4], (hidden,), jnp.float32),
        )
    # depthwise 3x3 conv: PyTorch weight [hidden, 1, 3, 3] -> [3, 3, hidden]
    p["w2"] = 0.1 * jax.random.normal(keys[5], (3, 3, hidden), jnp.float32)
    p["bn2"] = fold_bn(
        1.0 + 0.1 * jax.random.normal(keys[6], (hidden,), jnp.float32),
        0.1 * jax.random.normal(keys[7], (hidden,), jnp.float32),
        0.1 * jax.random.normal(keys[8], (hidden,), jnp.float32),
        0.5 + jax.random.uniform(keys[9], (hidden,), jnp.float32),
    )
    # 1x1 project conv: PyTorch weight [oup, hidden, 1, 1] -> [hidden, oup]
    p["w3"] = 0.1 * jax.random.normal(keys[10], (hidden, oup), jnp.float32)
    p["bn3"] = fold_bn(
        1.0 + 0.1 * jax.random.normal(keys[11], (oup,), jnp.float32),
        0.1 * jax.random.normal(keys[12], (oup,), jnp.float32),
        0.1 * jax.random.normal(keys[13], (oup,), jnp.float32),
        0.5 + jax.random.uniform(keys[14], (oup,), jnp.float32),
    )
    p["hidden"] = hidden
    return p


# ----------------------------------------------------------------------------
# Pure-JAX/XLA reference with identical (eval-mode BN) semantics
# ----------------------------------------------------------------------------
def inverted_residual_ref(x_nchw, params, *, inp, oup, stride, dilate,
                          expand_ratio):
    use_res = (stride == 1) and (inp == oup)
    dn = ("NCHW", "OIHW", "NCHW")
    h = x_nchw
    hidden = params["hidden"]
    if expand_ratio != 1:
        w1 = jnp.transpose(params["w1"], (1, 0))[:, :, None, None]  # [hid,inp,1,1]
        h = lax.conv_general_dilated(h, w1, (1, 1), "VALID",
                                     dimension_numbers=dn)
        s1, b1 = params["bn1"]
        h = h * s1[None, :, None, None] + b1[None, :, None, None]
        h = jnp.clip(h, 0.0, 6.0)
    w2 = jnp.transpose(params["w2"], (2, 0, 1))[:, None, :, :]      # [hid,1,3,3]
    h = lax.conv_general_dilated(
        h, w2, (stride, stride),
        padding=[(dilate, dilate), (dilate, dilate)],
        rhs_dilation=(dilate, dilate),
        dimension_numbers=dn, feature_group_count=hidden)
    s2, b2 = params["bn2"]
    h = h * s2[None, :, None, None] + b2[None, :, None, None]
    h = jnp.clip(h, 0.0, 6.0)
    w3 = jnp.transpose(params["w3"], (1, 0))[:, :, None, None]      # [oup,hid,1,1]
    h = lax.conv_general_dilated(h, w3, (1, 1), "VALID", dimension_numbers=dn)
    s3, b3 = params["bn3"]
    h = h * s3[None, :, None, None] + b3[None, :, None, None]
    if use_res:
        h = h + x_nchw
    return h


# ----------------------------------------------------------------------------
if __name__ == "__main__":
    # Small config: inp=oup=4, stride=1, dilate=1, expand_ratio=6 -> hidden=24
    # (stride==1 and inp==oup -> the residual connection is exercised).
    inp, oup, stride, dilate, expand_ratio = 4, 4, 1, 1, 6
    N, H, W = 2, 16, 16

    key = jax.random.PRNGKey(0)
    kx, kp = jax.random.split(key)
    x = jax.random.normal(kx, (N, inp, H, W), jnp.float32)
    params = make_params(kp, inp, oup, expand_ratio)

    out = inverted_residual_pallas(
        x, params, inp=inp, oup=oup, stride=stride, dilate=dilate,
        expand_ratio=expand_ratio)
    out = jax.block_until_ready(out)

    ref = inverted_residual_ref(
        x, params, inp=inp, oup=oup, stride=stride, dilate=dilate,
        expand_ratio=expand_ratio)
    ref = jax.block_until_ready(ref)

    assert out.shape == (N, oup, H, W), out.shape
    assert jnp.allclose(out, ref, rtol=1e-3, atol=1e-3), (
        float(jnp.max(jnp.abs(out - ref))))
    print("KERNEL_OK")
</pallas_src>

<mosaic_0001>
module attributes {stable_mosaic.version = 11 : i64} {
  func.func @_inverted_residual_kernel(%arg0: i32, %arg1: memref<1x4x256xf32, #tpu.memory_space<vmem>>, %arg2: memref<4x24xf32, #tpu.memory_space<vmem>>, %arg3: memref<1x24xf32, #tpu.memory_space<vmem>>, %arg4: memref<9x24xf32, #tpu.memory_space<vmem>>, %arg5: memref<1x24xf32, #tpu.memory_space<vmem>>, %arg6: memref<4x24xf32, #tpu.memory_space<vmem>>, %arg7: memref<4x1xf32, #tpu.memory_space<vmem>>, %arg8: memref<1x4x256xf32, #tpu.memory_space<vmem>>, %arg9: memref<18x18x24xf32, #tpu.memory_space<vmem>>) attributes {dimension_semantics = [#tpu.dimension_semantics<parallel>], iteration_bounds = array<i64: 2>, scalar_prefetch = 0 : i64, scratch_operands = 1 : i64, tpu.core_type = #tpu.core_type<tc>, window_params = [{transform_indices = @transform_0, window_bounds = array<i64: 1, 4, 256>}, {pipeline_mode = #tpu.pipeline_mode<synchronous>, transform_indices = @transform_1, window_bounds = array<i64: 4, 24>}, {pipeline_mode = #tpu.pipeline_mode<synchronous>, transform_indices = @transform_2, window_bounds = array<i64: 1, 24>}, {pipeline_mode = #tpu.pipeline_mode<synchronous>, transform_indices = @transform_3, window_bounds = array<i64: 9, 24>}, {pipeline_mode = #tpu.pipeline_mode<synchronous>, transform_indices = @transform_4, window_bounds = array<i64: 1, 24>}, {pipeline_mode = #tpu.pipeline_mode<synchronous>, transform_indices = @transform_5, window_bounds = array<i64: 4, 24>}, {pipeline_mode = #tpu.pipeline_mode<synchronous>, transform_indices = @transform_6, window_bounds = array<i64: 4, 1>}, {transform_indices = @transform_7, window_bounds = array<i64: 1, 4, 256>}]} {
    %c0 = arith.constant 0 : index
    %c0_0 = arith.constant 0 : index
    %c0_1 = arith.constant 0 : index
    %0 = vector.load %arg1[%c0, %c0_0, %c0_1] : memref<1x4x256xf32, #tpu.memory_space<vmem>>, vector<1x4x256xf32>
    %1 = vector.shape_cast %0 : vector<1x4x256xf32> to vector<4x256xf32>
    %c0_2 = arith.constant 0 : index
    %c0_3 = arith.constant 0 : index
    %2 = vector.load %arg2[%c0_2, %c0_3] : memref<4x24xf32, #tpu.memory_space<vmem>>, vector<4x24xf32>
    %cst = arith.constant dense<0.000000e+00> : vector<256x24xf32>
    %3 = tpu.matmul %1, %2, %cst {dimension_numbers = #tpu.dot_dimension_numbers<[0], [0], [1], [1], [0, 1, 1, 1], [], []>} : vector<4x256xf32>, vector<4x24xf32>, vector<256x24xf32> -> vector<256x24xf32>
    %c0_4 = arith.constant 0 : index
    %c0_5 = arith.constant 0 : index
    %4 = vector.load %arg3[%c0_4, %c0_5] : memref<1x24xf32, #tpu.memory_space<vmem>>, vector<1x24xf32>
    %5 = vector.broadcast %4 : vector<1x24xf32> to vector<256x24xf32>
    %6 = arith.addf %3, %5 : vector<256x24xf32>
    %cst_6 = arith.constant 0.000000e+00 : f32
    %cst_7 = arith.constant 6.000000e+00 : f32
    %7 = vector.broadcast %cst_6 : f32 to vector<256x24xf32>
    %8 = arith.maximumf %7, %6 : vector<256x24xf32>
    %9 = vector.broadcast %cst_7 : f32 to vector<256x24xf32>
    %10 = arith.minimumf %9, %8 : vector<256x24xf32>
    %11 = vector.shape_cast %10 : vector<256x24xf32> to vector<16x16x24xf32>
    %cst_8 = arith.constant 0.000000e+00 : f32
    %12 = vector.broadcast %cst_8 : f32 to vector<18x18x24xf32>
    %c0_9 = arith.constant 0 : index
    %c0_10 = arith.constant 0 : index
    %c0_11 = arith.constant 0 : index
    %13 = vector.load %arg9[%c0_9, %c0_10, %c0_11] : memref<18x18x24xf32, #tpu.memory_space<vmem>>, vector<18x18x24xf32>
    tpu.vector_store %arg9[%c0_9, %c0_10, %c0_11], %12 {strides = array<i32>} : memref<18x18x24xf32, #tpu.memory_space<vmem>>, vector<18x18x24xf32>,
    %c1 = arith.constant 1 : index
    %c1_12 = arith.constant 1 : index
    %c0_13 = arith.constant 0 : index
    %14 = vector.load %arg9[%c1, %c1_12, %c0_13] : memref<18x18x24xf32, #tpu.memory_space<vmem>>, vector<16x16x24xf32>
    tpu.vector_store %arg9[%c1, %c1_12, %c0_13], %11 {strides = array<i32>} : memref<18x18x24xf32, #tpu.memory_space<vmem>>, vector<16x16x24xf32>,
    %c0_14 = arith.constant 0 : index
    %c0_15 = arith.constant 0 : index
    %c0_16 = arith.constant 0 : index
    %15 = vector.load %arg9[%c0_14, %c0_15, %c0_16] : memref<18x18x24xf32, #tpu.memory_space<vmem>>, vector<18x18x24xf32>
    %c0_17 = arith.constant 0 : index
    %c0_18 = arith.constant 0 : index
    %16 = vector.load %arg4[%c0_17, %c0_18] : memref<9x24xf32, #tpu.memory_space<vmem>>, vector<9x24xf32>
    %cst_19 = arith.constant 0.000000e+00 : f32
    %17 = vector.broadcast %cst_19 : f32 to vector<16x16x24xf32>
    %18 = vector.extract_strided_slice %15 {offsets = [0, 0, 0], sizes = [16, 16, 24], strides = [1, 1, 1]} : vector<18x18x24xf32> to vector<16x16x24xf32>
    %19 = vector.extract_strided_slice %16 {offsets = [0, 0], sizes = [1, 24], strides = [1, 1]} : vector<9x24xf32> to vector<1x24xf32>
    %20 = vector.shape_cast %19 : vector<1x24xf32> to vector<1x1x24xf32>
    %21 = vector.broadcast %20 : vector<1x1x24xf32> to vector<16x16x24xf32>
    %22 = arith.mulf %18, %21 : vector<16x16x24xf32>
    %23 = arith.addf %17, %22 : vector<16x16x24xf32>
    %24 = vector.extract_strided_slice %15 {offsets = [0, 1, 0], sizes = [16, 16, 24], strides = [1, 1, 1]} : vector<18x18x24xf32> to vector<16x16x24xf32>
    %25 = vector.extract_strided_slice %16 {offsets = [1, 0], sizes = [1, 24], strides = [1, 1]} : vector<9x24xf32> to vector<1x24xf32>
    %26 = vector.shape_cast %25 : vector<1x24xf32> to vector<1x1x24xf32>
    %27 = vector.broadcast %26 : vector<1x1x24xf32> to vector<16x16x24xf32>
    %28 = arith.mulf %24, %27 : vector<16x16x24xf32>
    %29 = arith.addf %23, %28 : vector<16x16x24xf32>
    %30 = vector.extract_strided_slice %15 {offsets = [0, 2, 0], sizes = [16, 16, 24], strides = [1, 1, 1]} : vector<18x18x24xf32> to vector<16x16x24xf32>
    %31 = vector.extract_strided_slice %16 {offsets = [2, 0], sizes = [1, 24], strides = [1, 1]} : vector<9x24xf32> to vector<1x24xf32>
    %32 = vector.shape_cast %31 : vector<1x24xf32> to vector<1x1x24xf32>
    %33 = vector.broadcast %32 : vector<1x1x24xf32> to vector<16x16x24xf32>
    %34 = arith.mulf %30, %33 : vector<16x16x24xf32>
    %35 = arith.addf %29, %34 : vector<16x16x24xf32>
    %36 = vector.extract_strided_slice %15 {offsets = [1, 0, 0], sizes = [16, 16, 24], strides = [1, 1, 1]} : vector<18x18x24xf32> to vector<16x16x24xf32>
    %37 = vector.extract_strided_slice %16 {offsets = [3, 0], sizes = [1, 24], strides = [1, 1]} : vector<9x24xf32> to vector<1x24xf32>
    %38 = vector.shape_cast %37 : vector<1x24xf32> to vector<1x1x24xf32>
    %39 = vector.broadcast %38 : vector<1x1x24xf32> to vector<16x16x24xf32>
    %40 = arith.mulf %36, %39 : vector<16x16x24xf32>
    %41 = arith.addf %35, %40 : vector<16x16x24xf32>
    %42 = vector.extract_strided_slice %15 {offsets = [1, 1, 0], sizes = [16, 16, 24], strides = [1, 1, 1]} : vector<18x18x24xf32> to vector<16x16x24xf32>
    %43 = vector.extract_strided_slice %16 {offsets = [4, 0], sizes = [1, 24], strides = [1, 1]} : vector<9x24xf32> to vector<1x24xf32>
    %44 = vector.shape_cast %43 : vector<1x24xf32> to vector<1x1x24xf32>
    %45 = vector.broadcast %44 : vector<1x1x24xf32> to vector<16x16x24xf32>
    %46 = arith.mulf %42, %45 : vector<16x16x24xf32>
    %47 = arith.addf %41, %46 : vector<16x16x24xf32>
    %48 = vector.extract_strided_slice %15 {offsets = [1, 2, 0], sizes = [16, 16, 24], strides = [1, 1, 1]} : vector<18x18x24xf32> to vector<16x16x24xf32>
    %49 = vector.extract_strided_slice %16 {offsets = [5, 0], sizes = [1, 24], strides = [1, 1]} : vector<9x24xf32> to vector<1x24xf32>
    %50 = vector.shape_cast %49 : vector<1x24xf32> to vector<1x1x24xf32>
    %51 = vector.broadcast %50 : vector<1x1x24xf32> to vector<16x16x24xf32>
    %52 = arith.mulf %48, %51 : vector<16x16x24xf32>
    %53 = arith.addf %47, %52 : vector<16x16x24xf32>
    %54 = vector.extract_strided_slice %15 {offsets = [2, 0, 0], sizes = [16, 16, 24], strides = [1, 1, 1]} : vector<18x18x24xf32> to vector<16x16x24xf32>
    %55 = vector.extract_strided_slice %16 {offsets = [6, 0], sizes = [1, 24], strides = [1, 1]} : vector<9x24xf32> to vector<1x24xf32>
    %56 = vector.shape_cast %55 : vector<1x24xf32> to vector<1x1x24xf32>
    %57 = vector.broadcast %56 : vector<1x1x24xf32> to vector<16x16x24xf32>
    %58 = arith.mulf %54, %57 : vector<16x16x24xf32>
    %59 = arith.addf %53, %58 : vector<16x16x24xf32>
    %60 = vector.extract_strided_slice %15 {offsets = [2, 1, 0], sizes = [16, 16, 24], strides = [1, 1, 1]} : vector<18x18x24xf32> to vector<16x16x24xf32>
    %61 = vector.extract_strided_slice %16 {offsets = [7, 0], sizes = [1, 24], strides = [1, 1]} : vector<9x24xf32> to vector<1x24xf32>
    %62 = vector.shape_cast %61 : vector<1x24xf32> to vector<1x1x24xf32>
    %63 = vector.broadcast %62 : vector<1x1x24xf32> to vector<16x16x24xf32>
    %64 = arith.mulf %60, %63 : vector<16x16x24xf32>
    %65 = arith.addf %59, %64 : vector<16x16x24xf32>
    %66 = vector.extract_strided_slice %15 {offsets = [2, 2, 0], sizes = [16, 16, 24], strides = [1, 1, 1]} : vector<18x18x24xf32> to vector<16x16x24xf32>
    %67 = vector.extract_strided_slice %16 {offsets = [8, 0], sizes = [1, 24], strides = [1, 1]} : vector<9x24xf32> to vector<1x24xf32>
    %68 = vector.shape_cast %67 : vector<1x24xf32> to vector<1x1x24xf32>
    %69 = vector.broadcast %68 : vector<1x1x24xf32> to vector<16x16x24xf32>
    %70 = arith.mulf %66, %69 : vector<16x16x24xf32>
    %71 = arith.addf %65, %70 : vector<16x16x24xf32>
    %c0_20 = arith.constant 0 : index
    %c0_21 = arith.constant 0 : index
    %72 = vector.load %arg5[%c0_20, %c0_21] : memref<1x24xf32, #tpu.memory_space<vmem>>, vector<1x24xf32>
    %73 = vector.shape_cast %72 : vector<1x24xf32> to vector<1x1x24xf32>
    %74 = vector.broadcast %73 : vector<1x1x24xf32> to vector<16x16x24xf32>
    %75 = arith.addf %71, %74 : vector<16x16x24xf32>
    %cst_22 = arith.constant 0.000000e+00 : f32
    %cst_23 = arith.constant 6.000000e+00 : f32
    %76 = vector.broadcast %cst_22 : f32 to vector<16x16x24xf32>
    %77 = arith.maximumf %76, %75 : vector<16x16x24xf32>
    %78 = vector.broadcast %cst_23 : f32 to vector<16x16x24xf32>
    %79 = arith.minimumf %78, %77 : vector<16x16x24xf32>
    %80 = vector.shape_cast %79 : vector<16x16x24xf32> to vector<256x24xf32>
    %c0_24 = arith.constant 0 : index
    %c0_25 = arith.constant 0 : index
    %81 = vector.load %arg6[%c0_24, %c0_25] : memref<4x24xf32, #tpu.memory_space<vmem>>, vector<4x24xf32>
    %cst_26 = arith.constant dense<0.000000e+00> : vector<4x256xf32>
    %82 = tpu.matmul %81, %80, %cst_26 {dimension_numbers = #tpu.dot_dimension_numbers<[1], [1], [0], [0], [0, 0, 1, 0], [], []>} : vector<4x24xf32>, vector<256x24xf32>, vector<4x256xf32> -> vector<4x256xf32>
    %c0_27 = arith.constant 0 : index
    %c0_28 = arith.constant 0 : index
    %83 = vector.load %arg7[%c0_27, %c0_28] : memref<4x1xf32, #tpu.memory_space<vmem>>, vector<4x1xf32>
    %84 = vector.broadcast %83 : vector<4x1xf32> to vector<4x256xf32>
    %85 = arith.addf %82, %84 : vector<4x256xf32>
    %86 = arith.addf %85, %1 : vector<4x256xf32>
    %c0_29 = arith.constant 0 : index
    %c0_30 = arith.constant 0 : index
    %c0_31 = arith.constant 0 : index
    %87 = vector.load %arg8[%c0_29, %c0_30, %c0_31] : memref<1x4x256xf32, #tpu.memory_space<vmem>>, vector<1x4x256xf32>
    %88 = vector.shape_cast %87 : vector<1x4x256xf32> to vector<4x256xf32>
    %89 = vector.shape_cast %86 : vector<4x256xf32> to vector<1x4x256xf32>
    tpu.vector_store %arg8[%c0_29, %c0_30, %c0_31], %89 {strides = array<i32>} : memref<1x4x256xf32, #tpu.memory_space<vmem>>, vector<1x4x256xf32>,
    return
  }
  func.func @transform_0(%arg0: i32) -> (i32, i32, i32) {
    %c0_i32 = arith.constant 0 : i32
    %c0_i32_0 = arith.constant 0 : i32
    %c0_i32_1 = arith.constant 0 : i32
    return %arg0, %c0_i32, %c0_i32_0 : i32, i32, i32
  }
  func.func @transform_1(%arg0: i32) -> (i32, i32) {
    %c0_i32 = arith.constant 0 : i32
    %c0_i32_0 = arith.constant 0 : i32
    %c0_i32_1 = arith.constant 0 : i32
    return %c0_i32, %c0_i32_0 : i32, i32
  }
  func.func @transform_2(%arg0: i32) -> (i32, i32) {
    %c0_i32 = arith.constant 0 : i32
    %c0_i32_0 = arith.constant 0 : i32
    %c0_i32_1 = arith.constant 0 : i32
    return %c0_i32, %c0_i32_0 : i32, i32
  }
  func.func @transform_3(%arg0: i32) -> (i32, i32) {
    %c0_i32 = arith.constant 0 : i32
    %c0_i32_0 = arith.constant 0 : i32
    %c0_i32_1 = arith.constant 0 : i32
    return %c0_i32, %c0_i32_0 : i32, i32
  }
  func.func @transform_4(%arg0: i32) -> (i32, i32) {
    %c0_i32 = arith.constant 0 : i32
    %c0_i32_0 = arith.constant 0 : i32
    %c0_i32_1 = arith.constant 0 : i32
    return %c0_i32, %c0_i32_0 : i32, i32
  }
  func.func @transform_5(%arg0: i32) -> (i32, i32) {
    %c0_i32 = arith.constant 0 : i32
    %c0_i32_0 = arith.constant 0 : i32
    %c0_i32_1 = arith.constant 0 : i32
    return %c0_i32, %c0_i32_0 : i32, i32
  }
  func.func @transform_6(%arg0: i32) -> (i32, i32) {
    %c0_i32 = arith.constant 0 : i32
    %c0_i32_0 = arith.constant 0 : i32
    %c0_i32_1 = arith.constant 0 : i32
    return %c0_i32, %c0_i32_0 : i32, i32
  }
  func.func @transform_7(%arg0: i32) -> (i32, i32, i32) {
    %c0_i32 = arith.constant 0 : i32
    %c0_i32_0 = arith.constant 0 : i32
    %c0_i32_1 = arith.constant 0 : i32
    return %arg0, %c0_i32, %c0_i32_0 : i32, i32, i32
  }
}

</mosaic_0001>

<bundles_post_ra>
// kernel: tpu_custom_call.1
= control target key start
LH: loop header
LB: loop body
LE: loop exit
PB: predicated region body
PF: predicated region fallthrough
CT: control target
= control target key end

     0   :  { %s5498_s0 = inlined_call_operand.hbm [shape: f32[2,4,256], index: 0, kind: input, shape index: {}]   ;;  %s5499_s1 = inlined_call_operand.vmem [shape: f32[4,24], index: 1, kind: input, shape index: {}]   ;;  %s5500_s2 = inlined_call_operand.hbm [shape: f32[1,24], index: 2, kind: input, shape index: {}]   ;;  %s5501_s3 = inlined_call_operand.hbm [shape: f32[9,24], index: 3, kind: input, shape index: {}]   ;;  %s5502_s4 = inlined_call_operand.vmem [shape: f32[1,24], index: 4, kind: input, shape index: {}]   ;;  %s5503_s5 = inlined_call_operand.vmem [shape: f32[4,24], index: 5, kind: input, shape index: {}]   ;;  %s5504_s6 = inlined_call_operand.vmem [shape: f32[4,1], index: 6, kind: input, shape index: {}]   ;;  %s5505_s7 = inlined_call_operand.hbm [shape: f32[2,4,256], index: 7, kind: output, shape index: {}]  }
   0x1   :  { %5551 = sst [smem:[#allocation35_spill]] %s5500_s2 }
   0x2   :  { %5552 = sst [smem:[#allocation36_spill]] %s5501_s3 }
   0x3   :  { %12 = vsyncpa [#allocation4], 0 }
   0x4   :  { %14 = vsyncpa [#allocation4 + $0x1], 0 }
   0x5   :  { %15 = vsyncpa [#allocation7], 0 }
   0x6   :  { %16 = vsyncpa [#allocation5], 0 }
   0x7   :  { %18 = vsyncpa [#allocation5 + $0x1], 0  ;;  %s3492_s24 = smov 0   ;;  %s3494_s25 = smov 0  }
   0x8   :  { %s3496_s26 = smov 0   ;;  %s3498_s27 = smov 0  }
   0x9 LB: > { %s3513_s28 = sadd.s32 4294967295, %s3442_s27   ;;  %s2994_s29 = sadd.s32 4294967294, %s3442_s27   ;;  %s3442_s27 = sphi %s3498_s27, %s5639_s27   ;;  %s3438_s26 = sphi %s3496_s26, %s5638_s26   ;;  %s3434_s25 = sphi %s3494_s25, %s5637_s25   ;;  %s3430_s24 = sphi %s3492_s24, %s5636_s24  }
   0xa   : > { %p44_p0 = scmp.ne.s32.totalorder %s3434_s25, %s3430_s24  ;;  %p5506_p1 = scmp.eq.s32.totalorder %s3513_s28, 0 }
   0xb   : > { %p200_p3 = scmp.eq.s32.totalorder %s2994_s29, 1  ;;  %p2995_p5 = scmp.ge.s32.totalorder %s3442_s27, 1 }
   0xc   : > { %p3522_p4 = por %p5506_p1, %p44_p0  ;;  %p207_p7 = scmp.lt.s32.totalorder %s3442_s27, 3 }
   0xd   : > { %p3527_p6 = por %p200_p3, %p44_p0  ;;  %s3444_s10 = smov [#allocation6]  }
   0xe   : > { %s5553_s30 = scalar_select %p3522_p4, 1, 0 }
   0xf   : > { %s5554_s8 = scalar_select %p3527_p6, 1, 0 }
  0x10   : > { %p3532_p8 = pnand %p2995_p5, %p207_p7  ;;  %s223_s11 = sshll.u32 %s3444_s10, 4  ;;  %s224_s11 = int_to_ptr.vmem [resolvable:$true] %s223_s11 }
  0x11   : > { %s3445_s12 = smov [#allocation8]   ;;  %s3305_s15 = scalar_lea.vmem %s224_s11, 16 }
  0x12   : > { %s5555_s9 = scalar_select %p3532_p8, 1, 0 }
  0x13   : > { %p3212_p10 = pneg %p3532_p8  ;;  %s233_s13 = sshll.u32 %s3445_s12, 4  ;;  %s234_s13 = int_to_ptr.vmem [resolvable:$true] %s233_s13 }
  0x14   : > { %p3306_p13 = scmp.ne.s32.totalorder %s224_s11, %s3305_s15  ;;  %s3312_s16 = scalar_lea.vmem %s224_s11, 32 }
  0x15   : > { %p3541_p11 = pnand %p3212_p10, %p5506_p1  ;;  %p3313_p5 = scmp.lt.s32.totalorder %s224_s11, %s224_s11 }
  0x16   : > { %p3314_p7 = scmp.lt.s32.totalorder %s3312_s16, %s3305_s15 }
  0x17   : > { %p3296_p12 = pneg %p3541_p11 }
  0x18   : > { %p3315_p9 = por %p3314_p7, %p3313_p5 }
  0x19   : > { %p3308_p0 = pnand %p3306_p13, %p3296_p12 }
  0x1b   : > { %p3309_p3 = pneg %p3308_p0 }
  0x1d   : > { %p3316_p2 = pnand %p3315_p9, %p3309_p3 }
  0x1f   : > { %3319 = shalt.err (!%p3316_p2)
}
  0x20   : > { %s5557_s2 = sld [smem:[#allocation35_spill]]  ;;  %s3331_s19 = scalar_lea.vmem %s234_s13, 256 }
  0x21   : > { %p3332_p10 = scmp.ne.s32.totalorder %s234_s13, %s3331_s19  ;;  %p3339_p0 = scmp.lt.s32.totalorder %s234_s13, %s234_s13 }
  0x22   : > { %p3340_p6 = scmp.lt.s32.totalorder %s3331_s19, %s3331_s19 }
  0x23   : > { %p3334_p1 = pnand %p3332_p10, %p3296_p12 }
  0x24   : > { %p3341_p4 = por %p3340_p6, %p3339_p0 }
  0x25   : > { %p3335_p13 = pneg %p3334_p1 }
  0x26   : > { %3215 = dma.hbm_to_vmem [thread:$0]  (!%p3541_p11), %s5557_s2, 16, %s224_s11, [#allocation7]  }
  0x27   : > { %p3342_p8 = pnand %p3341_p4, %p3335_p13 }
  0x29   : > { %3345 = shalt.err (!%p3342_p8)
}
  0x2a   : > { %s3446_s20 = smov 128   ;;  %s3447_s21 = smov 8  }
  0x2b   : > { %s5558_s3 = sld [smem:[#allocation36_spill]]  ;;  %s3564_s29 = sadd.s32 1, %s3442_s27  }
  0x2c   : > { %s31_s10 = sadd.s32 1, %s3438_s26  ;;  %s28_s11 = ssub.s32 %s3442_s27, %s3564_s29 }
  0x2d   : > { %p38_p1 = scmp.ne.s32.totalorder %s3438_s26, %s3434_s25  ;;  %p29_p2 = scmp.eq.s32.totalorder %s28_s11, 0 }
  0x2e   : > { %p39_p4 = scmp.eq.s32.totalorder %s3442_s27, 0  ;;  %p5559_p6 = scmp.eq.s32.totalorder %s3513_s28, 1 }
  0x2f   : > { %p3229_p9 = scmp.lt.s32.totalorder %s3442_s27, 2  ;;  %s256_s14 = sand.u32 1, %s3438_s26  }
  0x30   : > { %p3574_p8 = por %p5559_p6, %p38_p1  ;;  %p40_p12 = por %p39_p4, %p38_p1 }
  0x31   : > { %3218 = dma.hbm_to_vmem [thread:$0]  (!%p3541_p11), %s5558_s3, 256, %s234_s13, [#allocation7], %s3446_s20, %s3446_s20, %s3447_s21  }
  0x32   : > { %s5560_s12 = scalar_select %p3574_p8, 1, 0 }
  0x33   : > { %s3580_s15 = scalar_select %p29_p2, %s3438_s26, %s31_s10  }
  0x34   : > { %s2999_s16 = sshll.u32 %s256_s14, 3  ;;  %s3081_s13 = sshll.u32 %s3442_s27, 7 }
  0x35   : > { %s3587_s19 = scalar_lea.hbm %s5498_s0, %s3081_s13  ;;  %s260_s20 = scalar_lea.vmem [#allocation3], %s2999_s16 }
  0x36   : > { %s268_s21 = sshll.u32 %s260_s20, 4  ;;  %p3589_p11 = pnand %p3229_p9, %p40_p12  ;;  %s269_s21 = int_to_ptr.vmem [resolvable:$true] %s268_s21 }
  0x37   : > { %s257_s23 = scalar_lea.sflag [#allocation4], %s256_s14  ;;  %s3346_s10 = scalar_lea.hbm %s3587_s19, 128 }
  0x38   : > { %p3347_p3 = scmp.ne.s32.totalorder %s3587_s19, %s3346_s10  ;;  %p3348_p5 = pneg %p3589_p11 }
  0x39   : > { %s3351_s17 = scalar_lea.hbm %s5498_s0, 256  ;;  %p3352_p13 = scmp.lt.s32.totalorder %s3587_s19, %s5498_s0 }
  0x3a   : > { %p3349_p7 = pnand %p3348_p5, %p3347_p3  ;;  %p3353_p0 = scmp.lt.s32.totalorder %s3351_s17, %s3346_s10 }
  0x3c   : > { %p3350_p10 = pneg %p3349_p7  ;;  %p3354_p1 = por %p3353_p0, %p3352_p13 }
  0x3e   : > { %p3355_p2 = pnand %p3354_p1, %p3350_p10 }
  0x40   : > { %3358 = shalt.err (!%p3355_p2)
}
  0x41   : > { %s3359_s20 = scalar_lea.vmem %s269_s21, 128  ;;  %s3448_s14 = smov [#allocation3]  }
  0x42   : > { %p3360_p4 = scmp.ne.s32.totalorder %s269_s21, %s3359_s20  ;;  %s3364_s2 = sshll.u32 %s3448_s14, 4  ;;  %s3365_s2 = int_to_ptr.vmem [resolvable:$false] %s3364_s2 }
  0x43   : > { %s3366_s3 = scalar_lea.vmem %s3365_s2, 256  ;;  %p3367_p12 = scmp.lt.s32.totalorder %s269_s21, %s3365_s2 }
  0x44   : > { %p3362_p6 = pnand %p3360_p4, %p3348_p5  ;;  %p3368_p3 = scmp.lt.s32.totalorder %s3366_s3, %s3359_s20 }
  0x46   : > { %p3363_p9 = pneg %p3362_p6  ;;  %p3369_p7 = por %p3368_p3, %p3367_p12 }
  0x48   : > { %p3370_p8 = pnand %p3369_p7, %p3363_p9 }
  0x4a   : > { %3373 = shalt.err (!%p3370_p8)
}
  0x4b   : > { %3222 = dma.hbm_to_vmem [thread:$0]  (!%p3589_p11), %s3587_s19, 128, %s269_s21, %s257_s23  }
  0x4c   : > { %p5562_p10 = scmp.ne.s32.totalorder %s5555_s9, 0 }
  0x4e   : > { %277 = sbr.rel (%p5562_p10) target bundleno = 1008 (0x3f0), region = 48 }
  0x53   : > { %s3610_s10 = sand.u32 1, %s3434_s25   ;;  %p5563_p8 = scmp.ne.s32.totalorder %s5553_s30, 0 }
  0x54   : > { %s3003_s11 = sshll.u32 %s3610_s10, 3  ;;  %s280_s2 = scalar_lea.sflag [#allocation4], %s3610_s10 }
  0x55   : > { %s3616_s3 = scalar_lea.vmem [#allocation3], %s3003_s11 }
  0x56   : > { %3417 = dma.done.wait (%p5563_p8), %s280_s2, 128  }
  0x57   : > { %3419 = vsyncadd (%p5563_p8), %s280_s2, 4294967168  ;;  %p5564_p11 = scmp.eq.s32.totalorder %s3513_s28, 0 }
  0x59   : > { %3421 = dma.done.wait (%p5564_p11), [#allocation7], 272   ;;  %p5565_p5 = pmov %p5564_p11 }
  0x5a   : > { %vm495_vm0 = vcmask 1043456   ;;  %v322_v0 = vld [vmem:[%s3616_s3] sm:$0xff]  ;;  %v323_v1 = vld [vmem:[%s5499_s1] sm:$0xf]  ;;  %vm398_vm1 = vcmask 31744   ;;  %vm788_vm2 = vcmask 195584   ;;  %v933_v60 = vlaneseq }
  0x5b   : > { %3423 = vsyncadd (%p5565_p5), [#allocation7], 4294967024  ;;  %334 = vxpose.xlu0.b32.start.end [1/1] (short) %v322_v0, 128  ;;  %3150 = vmatprep.subr.msk.mxu0 %vm495_vm0, %v323_v1  ;;  %v3630_v2 = vcombine.high %v322_v0, %v322_v0  ;;  %vm791_vm3 = vcmask 189440   ;;  %v3449_v21 = vmov 0.0   ;;  %v3719_v36 = vld [vmem:[#allocation6] ss:$0 sm:$0xff] }
  0x5c   : > { %3151 = vmatpush3.msk.msra.mxu0 %vm495_vm0, %v323_v1  ;;  %794 = vst.msk [vmem:[#allocation2 + $0x20] sm:$0xff] %vm788_vm2, %v3449_v21  ;;  %789 = vst.msk [vmem:[#allocation2] sm:$0xff] %vm788_vm2, %v3449_v21  ;;  %v934_v1 = vshrl.u32 %v933_v60, 7  ;;  %vm1101_vm4 = vcmask 1046528   ;;  %vm1346_vm5 = vcmask 1045504   ;;  %s3082_s2 = sshll.u32 %s3513_s28, 7 }
  0x5d   : > { %5566 = vst [vmem:[#allocation13_spill] sm:$0xff] %v3630_v2  ;;  %795 = vst.msk [vmem:[#allocation2 + $0x28] sm:$0x3] %vm791_vm3, %v3449_v21  ;;  %s321_s9 = scalar_lea.vmem [#allocation9], %s3003_s11  ;;  %s2903_s22 = scalar_lea.hbm %s5505_s7, %s3082_s2 }
  0x5e   : > { %790 = vst.msk [vmem:[#allocation2 + $0x8] sm:$0xff] %vm788_vm2, %v3449_v21  ;;  %793 = vst.msk [vmem:[#allocation2 + $0x18] sm:$0xff] %vm788_vm2, %v3449_v21  ;;  %s2905_s19 = sshll.u32 %s321_s9, 4  ;;  %s2891_s23 = scalar_lea.sflag [#allocation5], %s3610_s10  ;;  %s2906_s19 = int_to_ptr.vmem [resolvable:$true] %s2905_s19 }
  0x5f   : > { %792 = vst.msk [vmem:[#allocation2 + $0x10] sm:$0x3] %vm791_vm3, %v3449_v21  ;;  %798 = vst.msk [vmem:[#allocation2 + $0x40] sm:$0x3] %vm791_vm3, %v3449_v21  ;;  %s3374_s13 = scalar_lea.vmem %s2906_s19, 128  ;;  %p5633_p0 = scmp.ne.s32.totalorder %s5560_s12, 0 }
  0x60   : > { %796 = vst.msk [vmem:[#allocation2 + $0x30] sm:$0xff] %vm788_vm2, %v3449_v21  ;;  %797 = vst.msk [vmem:[#allocation2 + $0x38] sm:$0xff] %vm788_vm2, %v3449_v21  ;;  %p3375_p13 = scmp.ne.s32.totalorder %s2906_s19, %s3374_s13  ;;  %s3451_s28 = smov [#allocation9]  }
  0x61   : > { %799 = vst.msk [vmem:[#allocation2 + $0x48] sm:$0xff] %vm788_vm2, %v3449_v21  ;;  %800 = vst.msk [vmem:[#allocation2 + $0x50] sm:$0xff] %vm788_vm2, %v3449_v21  ;;  %s3378_s11 = sshll.u32 %s3451_s28, 4  ;;  %s3379_s11 = int_to_ptr.vmem [resolvable:$false] %s3378_s11 }
  0x62   : > { %801 = vst.msk [vmem:[#allocation2 + $0x58] sm:$0x3] %vm791_vm3, %v3449_v21  ;;  %804 = vst.msk [vmem:[#allocation2 + $0x70] sm:$0x3] %vm791_vm3, %v3449_v21  ;;  %p3376_p1 = pnand %p3375_p13, %p5633_p0  ;;  %p3381_p4 = scmp.lt.s32.totalorder %s2906_s19, %s3379_s11 }
  0x63   : > { %802 = vst.msk [vmem:[#allocation2 + $0x60] sm:$0xff] %vm788_vm2, %v3449_v21  ;;  %803 = vst.msk [vmem:[#allocation2 + $0x68] sm:$0xff] %vm788_vm2, %v3449_v21 }
  0x64   : > { %805 = vst.msk [vmem:[#allocation2 + $0x78] sm:$0xff] %vm788_vm2, %v3449_v21  ;;  %806 = vst.msk [vmem:[#allocation2 + $0x80] sm:$0xff] %vm788_vm2, %v3449_v21  ;;  %p3377_p2 = pneg %p3376_p1 }
  0x65   : > { %807 = vst.msk [vmem:[#allocation2 + $0x88] sm:$0x3] %vm791_vm3, %v3449_v21  ;;  %810 = vst.msk [vmem:[#allocation2 + $0xa0] sm:$0x3] %vm791_vm3, %v3449_v21 }
  0x66   : > { %808 = vst.msk [vmem:[#allocation2 + $0x90] sm:$0xff] %vm788_vm2, %v3449_v21  ;;  %809 = vst.msk [vmem:[#allocation2 + $0x98] sm:$0xff] %vm788_vm2, %v3449_v21 }
  0x67   : > { %811 = vst.msk [vmem:[#allocation2 + $0xa8] sm:$0xff] %vm788_vm2, %v3449_v21  ;;  %812 = vst.msk [vmem:[#allocation2 + $0xb0] sm:$0xff] %vm788_vm2, %v3449_v21 }
  0x68   : > { %813 = vst.msk [vmem:[#allocation2 + $0xb8] sm:$0x3] %vm791_vm3, %v3449_v21  ;;  %816 = vst.msk [vmem:[#allocation2 + $0xd0] sm:$0x3] %vm791_vm3, %v3449_v21 }
  0x69   : > { %814 = vst.msk [vmem:[#allocation2 + $0xc0] sm:$0xff] %vm788_vm2, %v3449_v21  ;;  %815 = vst.msk [vmem:[#allocation2 + $0xc8] sm:$0xff] %vm788_vm2, %v3449_v21 }
  0x6a   : > { %817 = vst.msk [vmem:[#allocation2 + $0xd8] sm:$0xff] %vm788_vm2, %v3449_v21  ;;  %818 = vst.msk [vmem:[#allocation2 + $0xe0] sm:$0xff] %vm788_vm2, %v3449_v21 }
  0x6b   : > { %819 = vst.msk [vmem:[#allocation2 + $0xe8] sm:$0x3] %vm791_vm3, %v3449_v21  ;;  %822 = vst.msk [vmem:[#allocation2 + $0x100] sm:$0x3] %vm791_vm3, %v3449_v21 }
  0x6c   : > { %820 = vst.msk [vmem:[#allocation2 + $0xf0] sm:$0xff] %vm788_vm2, %v3449_v21  ;;  %821 = vst.msk [vmem:[#allocation2 + $0xf8] sm:$0xff] %vm788_vm2, %v3449_v21 }
  0x6d   : > { %823 = vst.msk [vmem:[#allocation2 + $0x108] sm:$0xff] %vm788_vm2, %v3449_v21  ;;  %824 = vst.msk [vmem:[#allocation2 + $0x110] sm:$0xff] %vm788_vm2, %v3449_v21 }
  0x6e   : > { %825 = vst.msk [vmem:[#allocation2 + $0x118] sm:$0x3] %vm791_vm3, %v3449_v21  ;;  %828 = vst.msk [vmem:[#allocation2 + $0x130] sm:$0x3] %vm791_vm3, %v3449_v21 }
  0x6f   : > { %826 = vst.msk [vmem:[#allocation2 + $0x120] sm:$0xff] %vm788_vm2, %v3449_v21  ;;  %827 = vst.msk [vmem:[#allocation2 + $0x128] sm:$0xff] %vm788_vm2, %v3449_v21 }
  0x70   : > { %829 = vst.msk [vmem:[#allocation2 + $0x138] sm:$0xff] %vm788_vm2, %v3449_v21  ;;  %830 = vst.msk [vmem:[#allocation2 + $0x140] sm:$0xff] %vm788_vm2, %v3449_v21 }
  0x71   : > { %831 = vst.msk [vmem:[#allocation2 + $0x148] sm:$0x3] %vm791_vm3, %v3449_v21  ;;  %834 = vst.msk [vmem:[#allocation2 + $0x160] sm:$0x3] %vm791_vm3, %v3449_v21 }
  0x72   : > { %832 = vst.msk [vmem:[#allocation2 + $0x150] sm:$0xff] %vm788_vm2, %v3449_v21  ;;  %833 = vst.msk [vmem:[#allocation2 + $0x158] sm:$0xff] %vm788_vm2, %v3449_v21 }
  0x73   : > { %835 = vst.msk [vmem:[#allocation2 + $0x168] sm:$0xff] %vm788_vm2, %v3449_v21  ;;  %836 = vst.msk [vmem:[#allocation2 + $0x170] sm:$0xff] %vm788_vm2, %v3449_v21 }
  0x74   : > { %837 = vst.msk [vmem:[#allocation2 + $0x178] sm:$0x3] %vm791_vm3, %v3449_v21  ;;  %840 = vst.msk [vmem:[#allocation2 + $0x190] sm:$0x3] %vm791_vm3, %v3449_v21 }
  0x75   : > { %838 = vst.msk [vmem:[#allocation2 + $0x180] sm:$0xff] %vm788_vm2, %v3449_v21  ;;  %839 = vst.msk [vmem:[#allocation2 + $0x188] sm:$0xff] %vm788_vm2, %v3449_v21 }
  0x76   : > { %841 = vst.msk [vmem:[#allocation2 + $0x198] sm:$0xff] %vm788_vm2, %v3449_v21  ;;  %842 = vst.msk [vmem:[#allocation2 + $0x1a0] sm:$0xff] %vm788_vm2, %v3449_v21 }
  0x77   : > { %843 = vst.msk [vmem:[#allocation2 + $0x1a8] sm:$0x3] %vm791_vm3, %v3449_v21 }
  0x98   : > { %366 = vxpose.xlu0.b32.start.end [1/1] (short) %v3630_v2, 128 }
  0xd7   : > { %v350_v3 = vpop.trf.xlu0 }
  0xd8   : > { %3152 = vmatprep.mubr.msk.f32.mxu0 %vm398_vm1, %v350_v3 }
  0xdb   : > { %v351_v4 = vpop.trf.xlu0 }
  0xdc   : > { %3153 = vmatmul.mubr.msk.f32.vlgmr.msra.gmra.mxu0 %vm398_vm1, %v351_v4 }
  0xdf   : > { %v352_v5 = vpop.trf.xlu0 }
  0xe0   : > { %3155 = vmatprep.mubr.msk.f32.mxu0 %vm398_vm1, %v352_v5 }
  0xe3   : > { %v353_v6 = vpop.trf.xlu0 }
  0xe4   : > { %3156 = vmatmul.mubr.msk.f32.gmra.mxu0 %vm398_vm1, %v353_v6 }
  0xe7   : > { %v354_v7 = vpop.trf.xlu0 }
  0xe8   : > { %3158 = vmatprep.mubr.msk.f32.mxu0 %vm398_vm1, %v354_v7  ;;  %v1003_v7 = vsub.s32 1, %v934_v1 }
  0xeb   : > { %v355_v8 = vpop.trf.xlu0 }
  0xec   : > { %3159 = vmatmul.mubr.msk.f32.gmra.mxu0 %vm398_vm1, %v355_v8 }
  0xef   : > { %v356_v9 = vpop.trf.xlu0 }
  0xf0   : > { %3161 = vmatprep.mubr.msk.f32.mxu0 %vm398_vm1, %v356_v9  ;;  %v931_v9 = vld [vmem:[#allocation8] sm:$0xff] }
  0xf3   : > { %v357_v10 = vpop.trf.xlu0 }
  0xf4   : > { %3162 = vmatmul.mubr.msk.f32.gmra.mxu0 %vm398_vm1, %v357_v10  ;;  %v2117_v10 = vsub.s32 7, %v934_v1 }
  0xf7   : > { %v358_v11 = vpop.trf.xlu0 }
  0xf8   : > { %3164 = vmatprep.mubr.msk.f32.mxu0 %vm398_vm1, %v358_v11 }
  0xfb   : > { %v359_v12 = vpop.trf.xlu0 }
  0xfc   : > { %3165 = vmatmul.mubr.msk.f32.gmra.mxu0 %vm398_vm1, %v359_v12  ;;  %v935_v12 = vsub.s32 0, %v934_v1 }
  0xff   : > { %v360_v13 = vpop.trf.xlu0 }
 0x100   : > { %3167 = vmatprep.mubr.msk.f32.mxu0 %vm398_vm1, %v360_v13  ;;  %v1248_v13 = vsub.s32 2, %v934_v1 }
 0x103   : > { %v361_v14 = vpop.trf.xlu0 }
 0x104   : > { %3168 = vmatmul.mubr.msk.f32.gmra.mxu0 %vm398_vm1, %v361_v14 }
 0x107   : > { %v362_v15 = vpop.trf.xlu0 }
 0x108   : > { %3170 = vmatprep.mubr.msk.f32.mxu0 %vm398_vm1, %v362_v15 }
 0x10b   : > { %v363_v16 = vpop.trf.xlu0 }
 0x10c   : > { %3171 = vmatmul.mubr.msk.f32.gmra.mxu0 %vm398_vm1, %v363_v16  ;;  %v929_v16 = vld [vmem:[#allocation2 + $0x1a0] sm:$0xff] }
 0x10f   : > { %v364_v17 = vpop.trf.xlu0 }
 0x110   : > { %3173 = vmatprep.mubr.msk.f32.mxu0 %vm398_vm1, %v364_v17  ;;  %v930_v17 = vld [vmem:[#allocation2 + $0x1a8] sm:$0x3] }
 0x113   : > { %v365_v18 = vpop.trf.xlu0 }
 0x114   : > { %3174 = vmatmul.mubr.msk.f32.gmra.mxu0 %vm398_vm1, %v365_v18  ;;  %v3738_v18 = vrot.slane %v931_v9, %v1003_v7 }
 0x116   : > { %5567 = vst [vmem:[#allocation14_spill] sm:$0xff] %v3738_v18 }
 0x117   : > { %v382_v19 = vpop.trf.xlu0 }
 0x118   : > { %3176 = vmatprep.mubr.msk.f32.mxu0 %vm398_vm1, %v382_v19  ;;  %v1561_v19 = vsub.s32 4, %v934_v1 }
 0x11b   : > { %v383_v20 = vpop.trf.xlu0 }
 0x11c   : > { %3177 = vmatmul.mubr.msk.f32.gmra.mxu0 %vm398_vm1, %v383_v20 }
 0x11f   : > { %v384_v22 = vpop.trf.xlu0 }
 0x120   : > { %3179 = vmatprep.mubr.msk.f32.mxu0 %vm398_vm1, %v384_v22  ;;  %v1805_v22 = vsub.s32 5, %v934_v1 }
 0x123   : > { %v385_v23 = vpop.trf.xlu0 }
 0x124   : > { %3180 = vmatmul.mubr.msk.f32.gmra.mxu0 %vm398_vm1, %v385_v23  ;;  %v3741_v23 = vrot.slane %v931_v9, %v2117_v10 }
 0x127   : > { %v386_v24 = vpop.trf.xlu0 }
 0x128   : > { %3182 = vmatprep.mubr.msk.f32.mxu0 %vm398_vm1, %v386_v24  ;;  %v928_v24 = vld [vmem:[#allocation2 + $0x198] sm:$0xff] }
 0x12b   : > { %v387_v25 = vpop.trf.xlu0 }
 0x12c   : > { %3183 = vmatmul.mubr.msk.f32.gmra.mxu0 %vm398_vm1, %v387_v25  ;;  %v3743_v25 = vrot.slane %v931_v9, %v935_v12 }
 0x12e   : > { %5568 = vst [vmem:[#allocation15_spill] sm:$0xff] %v3743_v25 }
 0x12f   : > { %v388_v26 = vpop.trf.xlu0 }
 0x130   : > { %3185 = vmatprep.mubr.msk.f32.mxu0 %vm398_vm1, %v388_v26  ;;  %v3745_v26 = vrot.slane %v931_v9, %v1248_v13 }
 0x132   : > { %5569 = vst [vmem:[#allocation16_spill] sm:$0xff] %v3745_v26 }
 0x133   : > { %v389_v27 = vpop.trf.xlu0 }
 0x134   : > { %3186 = vmatmul.mubr.msk.f32.gmra.mxu0 %vm398_vm1, %v389_v27  ;;  %v1493_v27 = vsub.s32 3, %v934_v1 }
 0x137   : > { %v390_v28 = vpop.trf.xlu0 }
 0x138   : > { %3188 = vmatprep.mubr.msk.f32.mxu0 %vm398_vm1, %v390_v28  ;;  %v2049_v28 = vsub.s32 6, %v934_v1 }
 0x13b   : > { %v391_v29 = vpop.trf.xlu0 }
 0x13c   : > { %3189 = vmatmul.mubr.msk.f32.gmra.mxu0 %vm398_vm1, %v391_v29 }
 0x13f   : > { %v392_v30 = vpop.trf.xlu0 }
 0x140   : > { %3191 = vmatprep.mubr.msk.f32.mxu0 %vm398_vm1, %v392_v30 }
 0x143   : > { %v393_v31 = vpop.trf.xlu0 }
 0x144   : > { %3192 = vmatmul.mubr.msk.f32.gmra.mxu0 %vm398_vm1, %v393_v31  ;;  %v3747_v31 = vld [vmem:[#allocation8 + $0x8] ss:$0 sm:$0xff] }
 0x147   : > { %v394_v32 = vpop.trf.xlu0 }
 0x148   : > { %3194 = vmatprep.mubr.msk.f32.mxu0 %vm398_vm1, %v394_v32  ;;  %v2165_v32 = vmul.f32 %v3741_v23, %v929_v16 }
 0x14b   : > { %v395_v33 = vpop.trf.xlu0 }
 0x14c   : > { %3195 = vmatmul.mubr.msk.f32.gmra.mxu0 %vm398_vm1, %v395_v33  ;;  %v2166_v33 = vmul.f32 %v3741_v23, %v930_v17 }
 0x14f   : > { %v396_v34 = vpop.trf.xlu0 }
 0x150   : > { %3197 = vmatprep.mubr.msk.f32.mxu0 %vm398_vm1, %v396_v34  ;;  %v3751_v34 = vrot.slane %v931_v9, %v1561_v19 }
 0x153   : > { %v397_v35 = vpop.trf.xlu0 }
 0x154   : > { %3198 = vmatmul.mubr.msk.f32.gmra.mxu0 %vm398_vm1, %v397_v35  ;;  %v2409_v35 = vmul.f32 %v3747_v31, %v929_v16 }
 0x19c   : > { %v3154_v37 = vpop.f32.mrf.mxu0 }
 0x19d   : > { %v571_v38 = vadd.f32 %v3154_v37, %v3719_v36  ;;  %v2164_v37 = vmul.f32 %v3741_v23, %v928_v24 }
 0x19e   : > { %v565_v39 = vpop.f32.mrf.mxu0 }
 0x19f   : > { %v725_v40 = vmax.f32 %v571_v38, 0.0  ;;  %v566_v41 = vadd.f32 %v3719_v36, %v565_v39 }
 0x1a1   : > { %v757_v42 = vmin.f32 %v725_v40, 6.0  ;;  %v724_v43 = vmax.f32 %v566_v41, 0.0  ;;  %v3756_v40 = vrot.slane %v931_v9, %v1805_v22 }
 0x1a3   : > { %846 = vst.msk [vmem:[#allocation2 + $0x21] sm:$0xff] %vm788_vm2, %v757_v42  ;;  %v756_v44 = vmin.f32 %v724_v43, 6.0 }
 0x1a4   : > { %v3157_v45 = vpop.f32.mrf.mxu0 }
 0x1a5   : > { %845 = vst.msk [vmem:[#allocation2 + $0x19] sm:$0xff] %vm788_vm2, %v756_v44  ;;  %v581_v46 = vadd.f32 %v3157_v45, %v3719_v36  ;;  %v3759_v44 = vrot.slane %v931_v9, %v1493_v27  ;;  %v3761_v45 = vrot.slane %v931_v9, %v2049_v28 }
 0x1a6   : > { %v575_v47 = vpop.f32.mrf.mxu0 }
 0x1a7   : > { %v727_v48 = vmax.f32 %v581_v46, 0.0  ;;  %v576_v49 = vadd.f32 %v3719_v36, %v575_v47  ;;  %v2410_v46 = vmul.f32 %v3747_v31, %v930_v17  ;;  %v2408_v47 = vmul.f32 %v3747_v31, %v928_v24 }
 0x1a8   : > { %v3788_v7 = vmul.f32 %v3761_v45, %v928_v24 }
 0x1a9   : > { %v759_v50 = vmin.f32 %v727_v48, 6.0  ;;  %v726_v51 = vmax.f32 %v576_v49, 0.0  ;;  %v2291_v49 = vrot.slane %v2165_v32, 1 }
 0x1ab   : > { %848 = vst.msk [vmem:[#allocation2 + $0x39] sm:$0xff] %vm788_vm2, %v759_v50  ;;  %v758_v52 = vmin.f32 %v726_v51, 6.0  ;;  %v2293_v50 = vrot.slane %v2166_v33, 1 }
 0x1ac   : > { %v3160_v53 = vpop.f32.mrf.mxu0 }
 0x1ad   : > { %847 = vst.msk [vmem:[#allocation2 + $0x31] sm:$0xff] %vm788_vm2, %v758_v52  ;;  %v591_v54 = vadd.f32 %v3160_v53, %v3719_v36  ;;  %v2535_v53 = vrot.slane %v2409_v35, 2 }
 0x1ae   : > { %v585_v55 = vpop.f32.mrf.mxu0 }
 0x1af   : > { %v729_v56 = vmax.f32 %v591_v54, 0.0  ;;  %v586_v57 = vadd.f32 %v3719_v36, %v585_v55  ;;  %v2290_v54 = vrot.slane %v2164_v37, 1 }
 0x1b1   : > { %v761_v58 = vmin.f32 %v729_v56, 6.0  ;;  %v728_v59 = vmax.f32 %v586_v57, 0.0  ;;  %v3792_v12 = vsel %vm1101_vm4, %v2290_v54, %v2291_v49 }
 0x1b3   : > { %850 = vst.msk [vmem:[#allocation2 + $0x51] sm:$0xff] %vm788_vm2, %v761_v58  ;;  %v760_v61 = vmin.f32 %v728_v59, 6.0 }
 0x1b4   : > { %v3163_v62 = vpop.f32.mrf.mxu0 }
 0x1b5   : > { %849 = vst.msk [vmem:[#allocation2 + $0x49] sm:$0xff] %vm788_vm2, %v760_v61  ;;  %v601_v63 = vadd.f32 %v3163_v62, %v3719_v36  ;;  %v2537_v61 = vrot.slane %v2410_v46, 2  ;;  %v2534_v62 = vrot.slane %v2408_v47, 2 }
 0x1b6   : > { %v595_v0 = vpop.f32.mrf.mxu0 }
 0x1b7   : > { %v731_v3 = vmax.f32 %v601_v63, 0.0  ;;  %v596_v4 = vadd.f32 %v3719_v36, %v595_v0  ;;  %v3797_v19 = vsel %vm1346_vm5, %v2535_v53, %v2537_v61 }
 0x1b9   : > { %v763_v5 = vmin.f32 %v731_v3, 6.0  ;;  %v730_v6 = vmax.f32 %v596_v4, 0.0  ;;  %v3779_v4 = vmul.f32 %v3761_v45, %v929_v16 }
 0x1bb   : > { %852 = vst.msk [vmem:[#allocation2 + $0x69] sm:$0xff] %vm788_vm2, %v763_v5  ;;  %v762_v8 = vmin.f32 %v730_v6, 6.0  ;;  %v3785_v6 = vsel %vm1101_vm4, %v2291_v49, %v2293_v50 }
 0x1bc   : > { %v3166_v11 = vpop.f32.mrf.mxu0 }
 0x1bd   : > { %851 = vst.msk [vmem:[#allocation2 + $0x61] sm:$0xff] %vm788_vm2, %v762_v8  ;;  %v611_v14 = vadd.f32 %v3166_v11, %v3719_v36 }
 0x1be   : > { %v605_v15 = vpop.f32.mrf.mxu0 }
 0x1bf   : > { %v733_v20 = vmax.f32 %v611_v14, 0.0  ;;  %v606_v21 = vadd.f32 %v3719_v36, %v605_v15 }
 0x1c1   : > { %v765_v29 = vmin.f32 %v733_v20, 6.0  ;;  %v732_v30 = vmax.f32 %v606_v21, 0.0  ;;  %v3800_v20 = vsel %vm1346_vm5, %v2534_v62, %v2535_v53 }
 0x1c2   : > { %v891_v38 = vld [vmem:[#allocation2 + $0x70] sm:$0x3] }
 0x1c3   : > { %854 = vst.msk [vmem:[#allocation2 + $0x81] sm:$0xff] %vm788_vm2, %v765_v29  ;;  %v764_v39 = vmin.f32 %v732_v30, 6.0  ;;  %v1019_v41 = vmul.f32 %v3738_v18, %v891_v38  ;;  %v1264_v56 = vmul.f32 %v3745_v26, %v891_v38 }
 0x1c4   : > { %v890_v42 = vld [vmem:[#allocation2 + $0x68] sm:$0xff]  ;;  %v3169_v43 = vpop.f32.mrf.mxu0 }
 0x1c5   : > { %853 = vst.msk [vmem:[#allocation2 + $0x79] sm:$0xff] %vm788_vm2, %v764_v39  ;;  %v621_v48 = vadd.f32 %v3169_v43, %v3719_v36  ;;  %v3768_v51 = vmul.f32 %v3738_v18, %v890_v42  ;;  %v3771_v55 = vmul.f32 %v3745_v26, %v890_v42  ;;  %v1125_v60 = vrot.slane %v1019_v41, 1 }
 0x1c6   : > { %v615_v52 = vpop.f32.mrf.mxu0  ;;  %v946_v63 = vmul.f32 %v3743_v25, %v890_v42  ;;  %v1370_v10 = vrot.slane %v1264_v56, 2 }
 0x1c7   : > { %5570 = vst [vmem:[#allocation17_spill] sm:$0xff] %v3768_v51  ;;  %5571 = vst [vmem:[#allocation18_spill] sm:$0xff] %v3771_v55  ;;  %v735_v57 = vmax.f32 %v621_v48, 0.0  ;;  %v616_v58 = vadd.f32 %v3719_v36, %v615_v52  ;;  %v5511_v59 = vrot.slane %v3768_v51, 1  ;;  %v5510_v0 = vrot.slane %v3771_v55, 2 }
 0x1c9   : > { %v767_v1 = vmin.f32 %v735_v57, 6.0  ;;  %v734_v3 = vmax.f32 %v616_v58, 0.0  ;;  %v1126_v5 = vsel %vm1101_vm4, %v5511_v59, %v1125_v60  ;;  %v1371_v21 = vsel %vm1346_vm5, %v5510_v0, %v1370_v10 }
 0x1ca   : > { %v894_v8 = vld [vmem:[#allocation2 + $0x88] sm:$0x3]  ;;  %v1223_v9 = vadd.f32 %v1126_v5, %v946_v63 }
 0x1cb   : > { %856 = vst.msk [vmem:[#allocation2 + $0x99] sm:$0xff] %vm788_vm2, %v767_v1  ;;  %v766_v11 = vmin.f32 %v734_v3, 6.0  ;;  %v1022_v13 = vmul.f32 %v3738_v18, %v894_v8  ;;  %v1267_v14 = vmul.f32 %v3745_v26, %v894_v8  ;;  %v3806_v22 = vmul.f32 %v3751_v34, %v894_v8 }
 0x1cc   : > { %v892_v15 = vld [vmem:[#allocation2 + $0x78] sm:$0xff]  ;;  %v893_v16 = vld [vmem:[#allocation2 + $0x80] sm:$0xff]  ;;  %v3172_v17 = vpop.f32.mrf.mxu0  ;;  %v3812_v29 = vadd.f32 %v1371_v21, %v1223_v9 }
 0x1cd   : > { %5572 = vst [vmem:[#allocation19_spill] sm:$0xff] %v3806_v22  ;;  %855 = vst.msk [vmem:[#allocation2 + $0x91] sm:$0xff] %vm788_vm2, %v766_v11  ;;  %v631_v24 = vadd.f32 %v3172_v17, %v3719_v36  ;;  %v948_v27 = vmul.f32 %v3743_v25, %v893_v16  ;;  %v1021_v28 = vmul.f32 %v3738_v18, %v893_v16  ;;  %v1130_v32 = vrot.slane %v1022_v13, 1 }
 0x1ce   : > { %5573 = vst [vmem:[#allocation20_spill] sm:$0xff] %v3812_v29  ;;  %v625_v30 = vpop.f32.mrf.mxu0  ;;  %v1266_v33 = vmul.f32 %v3745_v26, %v893_v16  ;;  %v1375_v35 = vrot.slane %v1267_v14, 2  ;;  %v1020_v37 = vmul.f32 %v3738_v18, %v892_v15  ;;  %v1265_v42 = vmul.f32 %v3745_v26, %v892_v15 }
 0x1cf   : > { %v737_v38 = vmax.f32 %v631_v24, 0.0  ;;  %v626_v39 = vadd.f32 %v3719_v36, %v625_v30  ;;  %v1128_v41 = vrot.slane %v1021_v28, 1  ;;  %v947_v46 = vmul.f32 %v3743_v25, %v892_v15 }
 0x1d0   : > { %v1373_v43 = vrot.slane %v1266_v33, 2  ;;  %v1127_v47 = vrot.slane %v1020_v37, 1  ;;  %v3820_v48 = vmul.f32 %v3759_v44, %v893_v16  ;;  %v1372_v53 = vrot.slane %v1265_v42, 2 }
 0x1d1   : > { %v769_v49 = vmin.f32 %v737_v38, 6.0  ;;  %v736_v50 = vmax.f32 %v626_v39, 0.0  ;;  %v1131_v52 = vsel %vm1101_vm4, %v1128_v41, %v1130_v32  ;;  %v3826_v60 = vmul.f32 %v3751_v34, %v893_v16 }
 0x1d2   : > { %5574 = vst [vmem:[#allocation21_spill] sm:$0xff] %v3820_v48  ;;  %v897_v54 = vld [vmem:[#allocation2 + $0xa0] sm:$0x3]  ;;  %v1225_v56 = vadd.f32 %v1131_v52, %v948_v27  ;;  %v1376_v57 = vsel %vm1346_vm5, %v1373_v43, %v1375_v35  ;;  %v1129_v58 = vsel %vm1101_vm4, %v1127_v47, %v1128_v41  ;;  %v3844_v13 = vsel %vm1346_vm5, %v1372_v53, %v1373_v43 }
 0x1d3   : > { %5575 = vst [vmem:[#allocation22_spill] sm:$0xff] %v3826_v60  ;;  %858 = vst.msk [vmem:[#allocation2 + $0xb1] sm:$0xff] %vm788_vm2, %v769_v49  ;;  %v768_v61 = vmin.f32 %v736_v50, 6.0  ;;  %v1025_v62 = vmul.f32 %v3738_v18, %v897_v54  ;;  %v1270_v63 = vmul.f32 %v3745_v26, %v897_v54  ;;  %v3832_v1 = vmul.f32 %v3751_v34, %v897_v54 }
 0x1d4   : > { %v3834_v3 = vld [vmem:[#allocation2 + $0x90] sm:$0xff]  ;;  %v3836_v5 = vld [vmem:[#allocation2 + $0x98] sm:$0xff]  ;;  %v3175_v8 = vpop.f32.mrf.mxu0  ;;  %v1470_v9 = vadd.f32 %v1376_v57, %v1225_v56  ;;  %v3839_v10 = vmul.f32 %v3756_v40, %v897_v54  ;;  %v3841_v11 = vadd.f32 %v1129_v58, %v947_v46 }
 0x1d5   : > { %857 = vst.msk [vmem:[#allocation2 + $0xa9] sm:$0xff] %vm788_vm2, %v768_v61  ;;  %v641_v14 = vadd.f32 %v3175_v8, %v3719_v36  ;;  %v950_v15 = vmul.f32 %v3743_v25, %v3836_v5  ;;  %v1024_v16 = vmul.f32 %v3738_v18, %v3836_v5  ;;  %v1135_v17 = vrot.slane %v1025_v62, 1 }
 0x1d6   : > { %v635_v21 = vpop.f32.mrf.mxu0  ;;  %v1269_v24 = vmul.f32 %v3745_v26, %v3836_v5  ;;  %v1380_v27 = vrot.slane %v1270_v63, 2  ;;  %v949_v28 = vmul.f32 %v3743_v25, %v3834_v3  ;;  %v1023_v30 = vmul.f32 %v3738_v18, %v3834_v3 }
 0x1d7   : > { %v739_v32 = vmax.f32 %v641_v14, 0.0  ;;  %v636_v33 = vadd.f32 %v3719_v36, %v635_v21  ;;  %v1133_v35 = vrot.slane %v1024_v16, 1  ;;  %v1268_v37 = vmul.f32 %v3745_v26, %v3834_v3 }
 0x1d8   : > { %v1378_v38 = vrot.slane %v1269_v24, 2  ;;  %v1132_v39 = vrot.slane %v1023_v30, 1  ;;  %v1506_v41 = vmul.f32 %v3759_v44, %v3836_v5  ;;  %v3865_v42 = vmul.f32 %v3751_v34, %v3836_v5 }
 0x1d9   : > { %v771_v43 = vmin.f32 %v739_v32, 6.0  ;;  %v738_v46 = vmax.f32 %v636_v33, 0.0  ;;  %v1136_v47 = vsel %vm1101_vm4, %v1133_v35, %v1135_v17  ;;  %v1377_v49 = vrot.slane %v1268_v37, 2 }
 0x1da   : > { %v3868_v50 = vld [vmem:[#allocation2 + $0xb8] sm:$0x3]  ;;  %v1227_v52 = vadd.f32 %v1136_v47, %v950_v15  ;;  %v1381_v53 = vsel %vm1346_vm5, %v1378_v38, %v1380_v27  ;;  %v1134_v54 = vsel %vm1101_vm4, %v1132_v39, %v1133_v35  ;;  %v3872_v56 = vadd.f32 %v1506_v41, %v1470_v9 }
 0x1db   : > { %860 = vst.msk [vmem:[#allocation2 + $0xc9] sm:$0xff] %vm788_vm2, %v771_v43  ;;  %v770_v57 = vmin.f32 %v738_v46, 6.0  ;;  %v1028_v58 = vmul.f32 %v3738_v18, %v3868_v50  ;;  %v1273_v61 = vmul.f32 %v3745_v26, %v3868_v50  ;;  %v3881_v62 = vmul.f32 %v3751_v34, %v3868_v50 }
 0x1dc   : > { %v3883_v63 = vld [vmem:[#allocation2 + $0xa8] sm:$0xff]  ;;  %v3178_v8 = vpop.f32.mrf.mxu0  ;;  %v3885_v14 = vld [vmem:[#allocation2 + $0xb0] sm:$0xff]  ;;  %v1472_v9 = vadd.f32 %v1381_v53, %v1227_v52  ;;  %v3889_v15 = vmul.f32 %v3756_v40, %v3868_v50  ;;  %v3891_v16 = vadd.f32 %v1134_v54, %v949_v28  ;;  %v3894_v17 = vsel %vm1346_vm5, %v1377_v49, %v1378_v38 }
 0x1dd   : > { %5576 = vst [vmem:[#allocation23_spill] sm:$0xff] %v3883_v63  ;;  %859 = vst.msk [vmem:[#allocation2 + $0xc1] sm:$0xff] %vm788_vm2, %v770_v57  ;;  %v651_v21 = vadd.f32 %v3178_v8, %v3719_v36  ;;  %v952_v24 = vmul.f32 %v3743_v25, %v3885_v14  ;;  %v1027_v27 = vmul.f32 %v3738_v18, %v3885_v14  ;;  %v1140_v30 = vrot.slane %v1028_v58, 1 }
 0x1de   : > { %v645_v32 = vpop.f32.mrf.mxu0  ;;  %v1272_v33 = vmul.f32 %v3745_v26, %v3885_v14  ;;  %v1385_v28 = vrot.slane %v1273_v61, 2  ;;  %v951_v35 = vmul.f32 %v3743_v25, %v3883_v63  ;;  %v1026_v37 = vmul.f32 %v3738_v18, %v3883_v63 }
 0x1df   : > { %v741_v38 = vmax.f32 %v651_v21, 0.0  ;;  %v646_v39 = vadd.f32 %v3719_v36, %v645_v32  ;;  %v1138_v41 = vrot.slane %v1027_v27, 1  ;;  %v1271_v43 = vmul.f32 %v3745_v26, %v3883_v63 }
 0x1e0   : > { %v1383_v46 = vrot.slane %v1272_v33, 2  ;;  %v1137_v47 = vrot.slane %v1026_v37, 1  ;;  %v1508_v49 = vmul.f32 %v3759_v44, %v3885_v14  ;;  %v3915_v52 = vmul.f32 %v3751_v34, %v3885_v14 }
 0x1e1   : > { %v773_v53 = vmin.f32 %v741_v38, 6.0  ;;  %v740_v54 = vmax.f32 %v646_v39, 0.0  ;;  %v1141_v57 = vsel %vm1101_vm4, %v1138_v41, %v1140_v30  ;;  %v1382_v58 = vrot.slane %v1271_v43, 2 }
 0x1e2   : > { %v3918_v61 = vld [vmem:[#allocation2 + $0xd0] sm:$0x3]  ;;  %v1229_v8 = vadd.f32 %v1141_v57, %v952_v24  ;;  %v1386_v21 = vsel %vm1346_vm5, %v1383_v46, %v1385_v28  ;;  %v1139_v27 = vsel %vm1101_vm4, %v1137_v47, %v1138_v41  ;;  %v1540_v32 = vadd.f32 %v1508_v49, %v1472_v9 }
 0x1e3   : > { %862 = vst.msk [vmem:[#allocation2 + $0xe1] sm:$0xff] %vm788_vm2, %v773_v53  ;;  %v772_v33 = vmin.f32 %v740_v54, 6.0  ;;  %v1586_v37 = vmul.f32 %v3751_v34, %v3918_v61  ;;  %v1830_v38 = vmul.f32 %v3756_v40, %v3918_v61  ;;  %v1228_v39 = vadd.f32 %v1139_v27, %v951_v35 }
 0x1e4   : > { %v3181_v30 = vpop.f32.mrf.mxu0  ;;  %v3927_v43 = vld [vmem:[#allocation2 + $0xc8] sm:$0xff]  ;;  %v1474_v0 = vadd.f32 %v1386_v21, %v1229_v8  ;;  %v3929_v24 = vld [vmem:[#allocation2 + $0xc0] sm:$0xff]  ;;  %v1384_v28 = vsel %vm1346_vm5, %v1382_v58, %v1383_v46  ;;  %v1692_v41 = vrot.slane %v3881_v62, 1 }
 0x1e5   : > { %861 = vst.msk [vmem:[#allocation2 + $0xd9] sm:$0xff] %vm788_vm2, %v772_v33  ;;  %v661_v47 = vadd.f32 %v3181_v30, %v3719_v36  ;;  %v1510_v49 = vmul.f32 %v3759_v44, %v3927_v43  ;;  %v1585_v35 = vmul.f32 %v3751_v34, %v3927_v43  ;;  %v1697_v53 = vrot.slane %v1586_v37, 1 }
 0x1e6   : > { %v655_v54 = vpop.f32.mrf.mxu0  ;;  %v1829_v57 = vmul.f32 %v3756_v40, %v3927_v43  ;;  %v1941_v46 = vrot.slane %v1830_v38, 2  ;;  %v1473_v58 = vadd.f32 %v1384_v28, %v1228_v39  ;;  %v1509_v62 = vmul.f32 %v3759_v44, %v3929_v24 }
 0x1e7   : > { %v743_v8 = vmax.f32 %v661_v47, 0.0  ;;  %v656_v21 = vadd.f32 %v3719_v36, %v655_v54  ;;  %v1542_v27 = vadd.f32 %v1510_v49, %v1474_v0  ;;  %v1695_v33 = vrot.slane %v1585_v35, 1 }
 0x1e8   : > { %v1939_v30 = vrot.slane %v1829_v57, 2  ;;  %v1541_v59 = vadd.f32 %v1509_v62, %v1473_v58  ;;  %v1584_v9 = vmul.f32 %v3751_v34, %v3929_v24  ;;  %v1828_v37 = vmul.f32 %v3756_v40, %v3929_v24 }
 0x1e9   : > { %v775_v2 = vmin.f32 %v743_v8, 6.0  ;;  %v742_v55 = vmax.f32 %v656_v21, 0.0  ;;  %v1698_v38 = vsel %vm1101_vm4, %v1695_v33, %v1697_v53  ;;  %v5577_v39 = vrot.slane %v3915_v52, 1 }
 0x1ea   : > { %v906_v47 = vld [vmem:[#allocation2 + $0xe8] sm:$0x3]  ;;  %v1786_v54 = vadd.f32 %v1698_v38, %v1542_v27  ;;  %v1942_v0 = vsel %vm1346_vm5, %v1939_v30, %v1941_v46  ;;  %v1694_v49 = vrot.slane %v1584_v9, 1  ;;  %v1938_v35 = vrot.slane %v1828_v37, 2 }
 0x1eb   : > { %v1693_v28 = vsel %vm1101_vm4, %v5577_v39, %v1692_v41  ;;  %864 = vst.msk [vmem:[#allocation2 + $0xf9] sm:$0xff] %vm788_vm2, %v775_v2  ;;  %v774_v57 = vmin.f32 %v742_v55, 6.0  ;;  %v2142_v58 = vmul.f32 %v3741_v23, %v906_v47  ;;  %v2386_v62 = vmul.f32 %v3747_v31, %v906_v47 }
 0x1ec   : > { %v1784_v8 = vadd.f32 %v1693_v28, %v1540_v32  ;;  %v3184_v21 = vpop.f32.mrf.mxu0  ;;  %v905_v53 = vld [vmem:[#allocation2 + $0xe0] sm:$0xff]  ;;  %v2030_v51 = vadd.f32 %v1942_v0, %v1786_v54  ;;  %v904_v22 = vld [vmem:[#allocation2 + $0xd8] sm:$0xff]  ;;  %v1696_v41 = vsel %vm1101_vm4, %v1694_v49, %v1695_v33  ;;  %v1940_v27 = vsel %vm1346_vm5, %v1938_v35, %v1939_v30 }
 0x1ed   : > { %v3961_v9 = vmul.f32 %v3756_v40, %v3885_v14  ;;  %863 = vst.msk [vmem:[#allocation2 + $0xf1] sm:$0xff] %vm788_vm2, %v774_v57  ;;  %v671_v2 = vadd.f32 %v3184_v21, %v3719_v36  ;;  %v2066_v55 = vmul.f32 %v3761_v45, %v905_v53  ;;  %v2141_v32 = vmul.f32 %v3741_v23, %v905_v53 }
 0x1ee   : > { %v2253_v46 = vrot.slane %v2142_v58, 1  ;;  %v665_v37 = vpop.f32.mrf.mxu0  ;;  %v2385_v38 = vmul.f32 %v3747_v31, %v905_v53  ;;  %v2497_v39 = vrot.slane %v2386_v62, 2  ;;  %v1785_v33 = vadd.f32 %v1696_v41, %v1541_v59 }
 0x1ef   : > { %v2065_v30 = vmul.f32 %v3761_v45, %v904_v22  ;;  %v745_v28 = vmax.f32 %v671_v2, 0.0  ;;  %v666_v47 = vadd.f32 %v3719_v36, %v665_v37  ;;  %v2098_v54 = vadd.f32 %v2066_v55, %v2030_v51 }
 0x1f0   : > { %v2251_v0 = vrot.slane %v2141_v32, 1  ;;  %v2495_v49 = vrot.slane %v2385_v38, 2  ;;  %v2029_v35 = vadd.f32 %v1940_v27, %v1785_v33  ;;  %v2140_v57 = vmul.f32 %v3741_v23, %v904_v22 }
 0x1f1   : > { %v2384_v21 = vmul.f32 %v3747_v31, %v904_v22  ;;  %v777_v60 = vmin.f32 %v745_v28, 6.0  ;;  %v744_v58 = vmax.f32 %v666_v47, 0.0  ;;  %v1934_v62 = vrot.slane %v3961_v9, 2 }
 0x1f2   : > { %v2254_v48 = vsel %vm1101_vm4, %v2251_v0, %v2253_v46  ;;  %v2498_v53 = vsel %vm1346_vm5, %v2495_v49, %v2497_v39  ;;  %v2097_v41 = vadd.f32 %v2065_v30, %v2029_v35  ;;  %v2250_v2 = vrot.slane %v2140_v57, 1 }
 0x1f3   : > { %v2342_v59 = vadd.f32 %v2254_v48, %v2098_v54  ;;  %866 = vst.msk [vmem:[#allocation2 + $0x111] sm:$0xff] %vm788_vm2, %v777_v60  ;;  %v776_v51 = vmin.f32 %v744_v58, 6.0  ;;  %v2494_v55 = vrot.slane %v2384_v21, 2  ;;  %v1936_v27 = vrot.slane %v3889_v15, 2  ;;  %v3989_v15 = vld [vmem:[%s5502_s4] ss:$0 sm:$0xff] }
 0x1f4   : > { %v2064_v22 = vmul.f32 %v3761_v45, %v3927_v43  ;;  %v3187_v32 = vpop.f32.mrf.mxu0  ;;  %v2252_v46 = vsel %vm1101_vm4, %v2250_v2, %v2251_v0  ;;  %v2138_v48 = vmul.f32 %v3741_v23, %v3927_v43  ;;  %v2139_v38 = vmul.f32 %v3741_v23, %v3918_v61 }
 0x1f5   : > { %v2586_v37 = vadd.f32 %v2498_v53, %v2342_v59  ;;  %865 = vst.msk [vmem:[#allocation2 + $0x109] sm:$0xff] %vm788_vm2, %v776_v51  ;;  %v681_v60 = vadd.f32 %v3187_v32, %v3719_v36  ;;  %v2341_v39 = vadd.f32 %v2252_v46, %v2097_v41  ;;  %v2496_v33 = vsel %vm1346_vm5, %v2494_v55, %v2495_v49 }
 0x1f6   : > { %v1937_v30 = vsel %vm1346_vm5, %v1934_v62, %v1936_v27  ;;  %v675_v28 = vpop.f32.mrf.mxu0  ;;  %v2246_v0 = vrot.slane %v2138_v48, 1  ;;  %v2248_v35 = vrot.slane %v2139_v38, 1  ;;  %v2382_v59 = vmul.f32 %v3747_v31, %v3927_v43 }
 0x1f7   : > { %v2625_v47 = vadd.f32 %v3989_v15, %v2586_v37  ;;  %v2028_v54 = vadd.f32 %v1937_v30, %v1784_v8  ;;  %v747_v57 = vmax.f32 %v681_v60, 0.0  ;;  %v676_v21 = vadd.f32 %v3719_v36, %v675_v28 }
 0x1f8   : > { %v2585_v58 = vadd.f32 %v2496_v33, %v2341_v39  ;;  %v2249_v49 = vsel %vm1101_vm4, %v2246_v0, %v2248_v35  ;;  %v2383_v2 = vmul.f32 %v3747_v31, %v3918_v61  ;;  %v2490_v27 = vrot.slane %v2382_v59, 2 }
 0x1f9   : > { %v2657_v53 = vmax.f32 %v2625_v47, 0.0  ;;  %v2096_v41 = vadd.f32 %v2064_v22, %v2028_v54  ;;  %v779_v51 = vmin.f32 %v747_v57, 6.0  ;;  %v746_v55 = vmax.f32 %v676_v21, 0.0 }
 0x1fa   : > { %v2624_v8 = vadd.f32 %v3989_v15, %v2585_v58  ;;  %v2492_v46 = vrot.slane %v2383_v2, 2  ;;  %v1471_v48 = vadd.f32 %v3894_v17, %v3891_v16  ;;  %v1507_v38 = vmul.f32 %v3759_v44, %v3883_v63 }
 0x1fb   : > { %v4003_v32 = vmin.f32 %v2657_v53, 6.0  ;;  %v2340_v37 = vadd.f32 %v2249_v49, %v2096_v41  ;;  %868 = vst.msk [vmem:[#allocation2 + $0x129] sm:$0xff] %vm788_vm2, %v779_v51  ;;  %v778_v43 = vmin.f32 %v746_v55, 6.0  ;;  %v1581_v61 = vmul.f32 %v3751_v34, %v3883_v63 }
 0x1fc   : > { %v2656_v22 = vmax.f32 %v2624_v8, 0.0  ;;  %v3190_v60 = vpop.f32.mrf.mxu0  ;;  %v2493_v39 = vsel %vm1346_vm5, %v2490_v27, %v2492_v46  ;;  %v1825_v33 = vmul.f32 %v3756_v40, %v3883_v63  ;;  %v2063_v30 = vmul.f32 %v3761_v45, %v3929_v24 }
 0x1fd   : > { %v2137_v16 = vmul.f32 %v3741_v23, %v3929_v24  ;;  %867 = vst.msk [vmem:[#allocation2 + $0x121] sm:$0xff] %vm788_vm2, %v778_v43  ;;  %v691_v17 = vadd.f32 %v3190_v60, %v3719_v36  ;;  %v2584_v47 = vadd.f32 %v2493_v39, %v2340_v37  ;;  %v1539_v54 = vadd.f32 %v1507_v38, %v1471_v48 }
 0x1fe   : > { %v4021_v28 = vmin.f32 %v2656_v22, 6.0  ;;  %v685_v35 = vpop.f32.mrf.mxu0  ;;  %v1689_v57 = vrot.slane %v1581_v61, 1  ;;  %v1933_v21 = vrot.slane %v1825_v33, 2  ;;  %v2381_v59 = vmul.f32 %v3747_v31, %v3929_v24 }
 0x1ff   : > { %v2245_v58 = vrot.slane %v2137_v16, 1  ;;  %v749_v53 = vmax.f32 %v691_v17, 0.0  ;;  %v686_v41 = vadd.f32 %v3719_v36, %v685_v35  ;;  %v2623_v49 = vadd.f32 %v3989_v15, %v2584_v47 }
 0x200   : > { %v5519_v2 = vrot.slane %v3865_v42, 1  ;;  %v5578_v51 = vrot.slane %v3915_v52, 1  ;;  %v1935_v8 = vsel %vm1346_vm5, %v1933_v21, %v1934_v62  ;;  %v2489_v46 = vrot.slane %v2381_v59, 2 }
 0x201   : > { %v2247_v37 = vsel %vm1101_vm4, %v2245_v58, %v2246_v0  ;;  %v781_v48 = vmin.f32 %v749_v53, 6.0  ;;  %v748_v24 = vmax.f32 %v686_v41, 0.0  ;;  %v2655_v43 = vmax.f32 %v2623_v49, 0.0 }
 0x202   : > { %v1691_v55 = vsel %vm1101_vm4, %v1689_v57, %v5578_v51  ;;  %v2491_v38 = vsel %vm1346_vm5, %v2489_v46, %v2490_v27  ;;  %v1687_v61 = vrot.slane %v3832_v1, 1  ;;  %v4039_v52 = vmul.f32 %v3756_v40, %v3836_v5 }
 0x203   : > { %v1783_v22 = vadd.f32 %v1691_v55, %v1539_v54  ;;  %v1931_v60 = vrot.slane %v3839_v10, 2  ;;  %870 = vst.msk [vmem:[#allocation2 + $0x141] sm:$0xff] %vm788_vm2, %v781_v48  ;;  %v780_v9 = vmin.f32 %v748_v24, 6.0  ;;  %v4043_v62 = vmin.f32 %v2655_v43, 6.0 }
 0x204   : > { %5579 = vst [vmem:[#allocation24_spill] sm:$0xff] %v4039_v52  ;;  %v2062_v39 = vmul.f32 %v3761_v45, %v3885_v14  ;;  %v3193_v33 = vpop.f32.mrf.mxu0  ;;  %v1688_v1 = vsel %vm1101_vm4, %v5519_v2, %v1687_v61  ;;  %v5518_v27 = vrot.slane %v4039_v52, 2  ;;  %v4053_v5 = vmul.f32 %v3741_v23, %v3885_v14 }
 0x205   : > { %5580 = vst [vmem:[#allocation25_spill] sm:$0xff] %v4043_v62  ;;  %v2027_v0 = vadd.f32 %v1935_v8, %v1783_v22  ;;  %v2136_v10 = vmul.f32 %v3741_v23, %v3868_v50  ;;  %869 = vst.msk [vmem:[#allocation2 + $0x139] sm:$0xff] %vm788_vm2, %v780_v9  ;;  %v701_v16 = vadd.f32 %v3193_v33, %v3719_v36 }
 0x206   : > { %5581 = vst [vmem:[#allocation26_spill] sm:$0xff] %v4053_v5  ;;  %v1782_v47 = vadd.f32 %v1688_v1, %v3872_v56  ;;  %v4062_v54 = vmul.f32 %v3747_v31, %v3885_v14  ;;  %v695_v35 = vpop.f32.mrf.mxu0  ;;  %v1932_v57 = vsel %vm1346_vm5, %v5518_v27, %v1931_v60  ;;  %v5517_v21 = vrot.slane %v4053_v5, 1 }
 0x207   : > { %v2095_v17 = vadd.f32 %v2063_v30, %v2027_v0  ;;  %v2243_v58 = vrot.slane %v2136_v10, 1  ;;  %v2380_v59 = vmul.f32 %v3747_v31, %v3868_v50  ;;  %v751_v53 = vmax.f32 %v701_v16, 0.0 }
 0x208   : > { %5582 = vst [vmem:[#allocation27_spill] sm:$0xff] %v4062_v54  ;;  %v696_v30 = vadd.f32 %v3719_v36, %v695_v35  ;;  %v2026_v56 = vadd.f32 %v1932_v57, %v1782_v47  ;;  %v5516_v49 = vrot.slane %v4062_v54, 2  ;;  %v1469_v55 = vadd.f32 %v3844_v13, %v3841_v11 }
 0x209   : > { %v2339_v41 = vadd.f32 %v2247_v37, %v2095_v17  ;;  %v2244_v14 = vsel %vm1101_vm4, %v5517_v21, %v2243_v58  ;;  %v2487_v51 = vrot.slane %v2380_v59, 2  ;;  %v783_v8 = vmin.f32 %v751_v53, 6.0 }
 0x20a   : > { %v750_v46 = vmax.f32 %v696_v30, 0.0  ;;  %v2094_v24 = vadd.f32 %v2062_v39, %v2026_v56  ;;  %v4077_v50 = vld [vmem:[#allocation2 + $0x148] sm:$0x3]  ;;  %v1505_v43 = vmul.f32 %v3759_v44, %v3834_v3  ;;  %v4086_v22 = vmul.f32 %v3751_v34, %v3834_v3 }
 0x20b   : > { %v2583_v48 = vadd.f32 %v2491_v38, %v2339_v41  ;;  %5583 = vst [vmem:[#allocation28_spill] sm:$0xff] %v4077_v50  ;;  %v2488_v37 = vsel %vm1346_vm5, %v5516_v49, %v2487_v51  ;;  %v4090_v11 = vmul.f32 %v3756_v40, %v3834_v3  ;;  %872 = vst.msk [vmem:[#allocation2 + $0x159] sm:$0xff] %vm788_vm2, %v783_v8 }
 0x20c   : > { %v782_v13 = vmin.f32 %v750_v46, 6.0  ;;  %v1046_v61 = vmul.f32 %v3738_v18, %v4077_v50  ;;  %v1291_v60 = vmul.f32 %v3745_v26, %v4077_v50  ;;  %v4098_v9 = vld [vmem:[#allocation2 + $0x140] sm:$0xff]  ;;  %v3196_v0 = vpop.f32.mrf.mxu0  ;;  %v2338_v39 = vadd.f32 %v2244_v14, %v2094_v24  ;;  %v4104_v10 = vld [vmem:[#allocation2 + $0x138] sm:$0xff] }
 0x20d   : > { %5584 = vst [vmem:[#allocation29_spill] sm:$0xff] %v4090_v11  ;;  %v2622_v38 = vadd.f32 %v3989_v15, %v2583_v48  ;;  %5585 = vst [vmem:[#allocation30_spill] sm:$0xff] %v4098_v9  ;;  %v4100_v33 = vadd.f32 %v1505_v43, %v1469_v55  ;;  %v711_v16 = vadd.f32 %v3196_v0, %v3719_v36 }
 0x20e   : > { %5586 = vst [vmem:[#allocation31_spill] sm:$0xff] %v4104_v10  ;;  %871 = vst.msk [vmem:[#allocation2 + $0x151] sm:$0xff] %vm788_vm2, %v782_v13  ;;  %v964_v47 = vmul.f32 %v3743_v25, %v4098_v9  ;;  %v1045_v35 = vmul.f32 %v3738_v18, %v4098_v9  ;;  %v705_v57 = vpop.f32.mrf.mxu0  ;;  %v1170_v58 = vrot.slane %v1046_v61, 1  ;;  %v4114_v59 = vmul.f32 %v3745_v26, %v4098_v9 }
 0x20f   : > { %v2654_v17 = vmax.f32 %v2622_v38, 0.0  ;;  %v1415_v53 = vrot.slane %v1291_v60, 2  ;;  %v2582_v30 = vadd.f32 %v2488_v37, %v2338_v39  ;;  %v753_v41 = vmax.f32 %v711_v16, 0.0 }
 0x210   : > { %v706_v56 = vadd.f32 %v3719_v36, %v705_v57  ;;  %v1168_v51 = vrot.slane %v1045_v35, 1  ;;  %v5520_v55 = vrot.slane %v4114_v59, 2  ;;  %v4123_v46 = vmul.f32 %v3743_v25, %v4104_v10 }
 0x211   : > { %v4117_v14 = vmin.f32 %v2654_v17, 6.0  ;;  %v2621_v8 = vadd.f32 %v3989_v15, %v2582_v30  ;;  %v1044_v48 = vmul.f32 %v3738_v18, %v4104_v10  ;;  %v785_v24 = vmin.f32 %v753_v41, 6.0 }
 0x212   : > { %v752_v43 = vmax.f32 %v706_v56, 0.0  ;;  %v1171_v37 = vsel %vm1101_vm4, %v1168_v51, %v1170_v58  ;;  %v4130_v13 = vmul.f32 %v3745_v26, %v4104_v10  ;;  %v4132_v38 = vld [vmem:[#allocation2 + $0x160] sm:$0x3]  ;;  %v1416_v60 = vsel %vm1346_vm5, %v5520_v55, %v1415_v53 }
 0x213   : > { %5587 = vst [vmem:[#allocation32_spill] sm:$0xff] %v4117_v14  ;;  %5588 = vst [vmem:[#allocation33_spill] sm:$0xff] %v4132_v38  ;;  %v1241_v61 = vadd.f32 %v1171_v37, %v964_v47  ;;  %v2653_v0 = vmax.f32 %v2621_v8, 0.0  ;;  %v1167_v39 = vrot.slane %v1044_v48, 1  ;;  %v1049_v17 = vmul.f32 %v3738_v18, %v4132_v38 }
 0x214   : > { %874 = vst.msk [vmem:[#allocation2 + $0x171] sm:$0xff] %vm788_vm2, %v785_v24  ;;  %v784_v16 = vmin.f32 %v752_v43, 6.0  ;;  %v1294_v35 = vmul.f32 %v3745_v26, %v4132_v38  ;;  %v4144_v57 = vmul.f32 %v3751_v34, %v4132_v38  ;;  %v3199_v53 = vpop.f32.mrf.mxu0  ;;  %v4152_v41 = vmul.f32 %v3756_v40, %v4132_v38 }
 0x215   : > { %v4146_v47 = vld [vmem:[#allocation2 + $0x150] sm:$0xff]  ;;  %v4148_v58 = vld [vmem:[#allocation2 + $0x158] sm:$0xff]  ;;  %v1486_v30 = vadd.f32 %v1416_v60, %v1241_v61  ;;  %v4154_v56 = vmin.f32 %v2653_v0, 6.0  ;;  %v4157_v8 = vsel %vm1101_vm4, %v1167_v39, %v1168_v51  ;;  %v721_v48 = vadd.f32 %v3199_v53, %v3719_v36 }
 0x216   : > { %873 = vst.msk [vmem:[#allocation2 + $0x169] sm:$0xff] %vm788_vm2, %v784_v16  ;;  %v966_v24 = vmul.f32 %v3743_v25, %v4148_v58  ;;  %v1048_v43 = vmul.f32 %v3738_v18, %v4148_v58  ;;  %v1175_v37 = vrot.slane %v1049_v17, 1  ;;  %v715_v61 = vpop.f32.mrf.mxu0  ;;  %v1293_v60 = vmul.f32 %v3745_v26, %v4148_v58 }
 0x217   : > { %5589 = vst [vmem:[#allocation34_spill] sm:$0xff] %v4154_v56  ;;  %v1420_v0 = vrot.slane %v1294_v35, 2  ;;  %v965_v51 = vmul.f32 %v3743_v25, %v4146_v47  ;;  %v1047_v39 = vmul.f32 %v3738_v18, %v4146_v47  ;;  %v755_v16 = vmax.f32 %v721_v48, 0.0 }
 0x218   : > { %v716_v53 = vadd.f32 %v3719_v36, %v715_v61  ;;  %v1173_v49 = vrot.slane %v1048_v43, 1  ;;  %v1292_v21 = vmul.f32 %v3745_v26, %v4146_v47  ;;  %v1418_v1 = vrot.slane %v1293_v60, 2 }
 0x219   : > { %v1172_v17 = vrot.slane %v1047_v39, 1  ;;  %v1522_v27 = vmul.f32 %v3759_v44, %v4148_v58  ;;  %v4178_v35 = vmul.f32 %v3751_v34, %v4148_v58  ;;  %v787_v3 = vmin.f32 %v755_v16, 6.0 }
 0x21a   : > { %v754_v2 = vmax.f32 %v716_v53, 0.0  ;;  %v1176_v55 = vsel %vm1101_vm4, %v1173_v49, %v1175_v37  ;;  %v1417_v48 = vrot.slane %v1292_v21, 2  ;;  %v1421_v43 = vsel %vm1346_vm5, %v1418_v1, %v1420_v0 }
 0x21b   : > { %v4181_v10 = vld [vmem:[#allocation2 + $0x178] sm:$0x3]  ;;  %v1243_v36 = vadd.f32 %v1176_v55, %v966_v24  ;;  %v1174_v61 = vsel %vm1101_vm4, %v1172_v17, %v1173_v49  ;;  %v4185_v60 = vadd.f32 %v1522_v27, %v1486_v30  ;;  %876 = vst.msk [vmem:[#allocation2 + $0x189] sm:$0xff] %vm788_vm2, %v787_v3 }
 0x21c   : > { %v786_v39 = vmin.f32 %v754_v2, 6.0  ;;  %v1052_v38 = vmul.f32 %v3738_v18, %v4181_v10  ;;  %v1297_v16 = vmul.f32 %v3745_v26, %v4181_v10  ;;  %v1607_v21 = vmul.f32 %v3751_v34, %v4181_v10 }
 0x21d   : > { %v4194_v37 = vld [vmem:[#allocation2 + $0x168] sm:$0xff]  ;;  %v4196_v55 = vld [vmem:[#allocation2 + $0x170] sm:$0xff]  ;;  %v1488_v24 = vadd.f32 %v1421_v43, %v1243_v36  ;;  %v1851_v27 = vmul.f32 %v3756_v40, %v4181_v10  ;;  %v4200_v49 = vadd.f32 %v1174_v61, %v965_v51  ;;  %v4203_v2 = vsel %vm1346_vm5, %v1417_v48, %v1418_v1 }
 0x21e   : > { %875 = vst.msk [vmem:[#allocation2 + $0x181] sm:$0xff] %vm788_vm2, %v786_v39  ;;  %v968_v3 = vmul.f32 %v3743_v25, %v4196_v55  ;;  %v1051_v30 = vmul.f32 %v3738_v18, %v4196_v55  ;;  %v1180_v0 = vrot.slane %v1052_v38, 1  ;;  %v1296_v53 = vmul.f32 %v3745_v26, %v4196_v55 }
 0x21f   : > { %v1425_v17 = vrot.slane %v1297_v16, 2  ;;  %v967_v51 = vmul.f32 %v3743_v25, %v4194_v37  ;;  %v1050_v1 = vmul.f32 %v3738_v18, %v4194_v37  ;;  %v1295_v48 = vmul.f32 %v3745_v26, %v4194_v37 }
 0x220   : > { %v1178_v36 = vrot.slane %v1051_v30, 1  ;;  %v1423_v43 = vrot.slane %v1296_v53, 2  ;;  %v1524_v61 = vmul.f32 %v3759_v44, %v4196_v55  ;;  %v4222_v38 = vmul.f32 %v3751_v34, %v4196_v55 }
 0x221   : > { %v1177_v39 = vrot.slane %v1050_v1, 1  ;;  %v1422_v16 = vrot.slane %v1295_v48, 2  ;;  %v1732_v29 = vrot.slane %v1607_v21, 1  ;;  %v4226_v56 = vmul.f32 %v3756_v40, %v4196_v55 }
 0x222   : > { %v1181_v50 = vsel %vm1101_vm4, %v1178_v36, %v1180_v0  ;;  %v1426_v9 = vsel %vm1346_vm5, %v1423_v43, %v1425_v17  ;;  %v1556_v30 = vadd.f32 %v1524_v61, %v1488_v24  ;;  %v5537_v53 = vrot.slane %v4222_v38, 1  ;;  %v927_v54 = vld [vmem:[#allocation2 + $0x190] sm:$0x3] }
 0x223   : > { %v1245_v26 = vadd.f32 %v1181_v50, %v968_v3  ;;  %v1179_v5 = vsel %vm1101_vm4, %v1177_v39, %v1178_v36  ;;  %v1424_v14 = vsel %vm1346_vm5, %v1422_v16, %v1423_v43  ;;  %v1610_v21 = vmul.f32 %v3751_v34, %v927_v54 }
 0x224   : > { %v1854_v48 = vmul.f32 %v3756_v40, %v927_v54  ;;  %v1244_v18 = vadd.f32 %v1179_v5, %v967_v51  ;;  %v1733_v0 = vsel %vm1101_vm4, %v5537_v53, %v1732_v29  ;;  %v1976_v50 = vrot.slane %v1851_v27, 2 }
 0x225   : > { %v926_v24 = vld [vmem:[#allocation2 + $0x188] sm:$0xff]  ;;  %v1490_v17 = vadd.f32 %v1426_v9, %v1245_v26  ;;  %v925_v61 = vld [vmem:[#allocation2 + $0x180] sm:$0xff]  ;;  %v1800_v25 = vadd.f32 %v1733_v0, %v1556_v30  ;;  %v2163_v3 = vmul.f32 %v3741_v23, %v927_v54  ;;  %v1737_v39 = vrot.slane %v1610_v21, 1 }
 0x226   : > { %v1526_v36 = vmul.f32 %v3759_v44, %v926_v24  ;;  %v1609_v43 = vmul.f32 %v3751_v34, %v926_v24  ;;  %v1853_v16 = vmul.f32 %v3756_v40, %v926_v24  ;;  %v1981_v1 = vrot.slane %v1854_v48, 2 }
 0x227   : > { %v1489_v5 = vadd.f32 %v1424_v14, %v1244_v18  ;;  %v1525_v51 = vmul.f32 %v3759_v44, %v925_v61  ;;  %v1608_v29 = vmul.f32 %v3751_v34, %v925_v61  ;;  %v1852_v27 = vmul.f32 %v3756_v40, %v925_v61 }
 0x228   : > { %v1558_v53 = vadd.f32 %v1526_v36, %v1490_v17  ;;  %v1735_v26 = vrot.slane %v1609_v43, 1  ;;  %v1979_v9 = vrot.slane %v1853_v16, 2  ;;  %v5590_v63 = vrot.slane %v4226_v56, 2 }
 0x229   : > { %v1557_v30 = vadd.f32 %v1525_v51, %v1489_v5  ;;  %v1734_v0 = vrot.slane %v1608_v29, 1  ;;  %v2080_v21 = vmul.f32 %v3761_v45, %v926_v24  ;;  %v1978_v14 = vrot.slane %v1852_v27, 2 }
 0x22a   : > { %v1977_v62 = vsel %vm1346_vm5, %v5590_v63, %v1976_v50  ;;  %v1738_v48 = vsel %vm1101_vm4, %v1735_v26, %v1737_v39  ;;  %v1982_v18 = vsel %vm1346_vm5, %v1979_v9, %v1981_v1  ;;  %v2162_v36 = vmul.f32 %v3741_v23, %v926_v24 }
 0x22b   : > { %v2044_v11 = vadd.f32 %v1977_v62, %v1800_v25  ;;  %v1802_v52 = vadd.f32 %v1738_v48, %v1558_v53  ;;  %v1736_v17 = vsel %vm1101_vm4, %v1734_v0, %v1735_v26  ;;  %v2288_v43 = vrot.slane %v2163_v3, 1 }
 0x22c   : > { %v1801_v16 = vadd.f32 %v1736_v17, %v1557_v30  ;;  %v1980_v5 = vsel %vm1346_vm5, %v1978_v14, %v1979_v9  ;;  %v2406_v63 = vmul.f32 %v3747_v31, %v926_v24  ;;  %v2286_v29 = vrot.slane %v2162_v36, 1 }
 0x22d   : > { %v2112_v51 = vadd.f32 %v2080_v21, %v2044_v11  ;;  %v2046_v50 = vadd.f32 %v1982_v18, %v1802_v52  ;;  %v2407_v39 = vmul.f32 %v3747_v31, %v927_v54  ;;  %v1487_v1 = vadd.f32 %v4203_v2, %v4200_v49 }
 0x22e   : > { %v2045_v25 = vadd.f32 %v1980_v5, %v1801_v16  ;;  %v2530_v62 = vrot.slane %v2406_v63, 2  ;;  %v1523_v53 = vmul.f32 %v3759_v44, %v4194_v37  ;;  %v1605_v3 = vmul.f32 %v3751_v34, %v4194_v37 }
 0x22f   : > { %v2114_v26 = vadd.f32 %v3779_v4, %v2046_v50  ;;  %v2289_v11 = vsel %vm1101_vm4, %v2286_v29, %v2288_v43  ;;  %v2532_v24 = vrot.slane %v2407_v39, 2  ;;  %v1849_v52 = vmul.f32 %v3756_v40, %v4194_v37  ;;  %v4280_v43 = vld [vmem:[#allocation8 + $0x8] ss:$0 sm:$0xff] }
 0x230   : > { %v2113_v31 = vadd.f32 %v3788_v7, %v2045_v25  ;;  %v2356_v54 = vadd.f32 %v2289_v11, %v2112_v51  ;;  %v1555_v49 = vadd.f32 %v1523_v53, %v1487_v1  ;;  %v1729_v2 = vrot.slane %v1605_v3, 1 }
 0x231   : > { %v2358_v9 = vadd.f32 %v3785_v6, %v2114_v26  ;;  %v2533_v27 = vsel %vm1346_vm5, %v2530_v62, %v2532_v24  ;;  %v1973_v30 = vrot.slane %v1849_v52, 2  ;;  %v2079_v0 = vmul.f32 %v3761_v45, %v925_v61 }
 0x232   : > { %v2357_v4 = vadd.f32 %v3792_v12, %v2113_v31  ;;  %v2600_v21 = vadd.f32 %v2533_v27, %v2356_v54  ;;  %v5591_v48 = vrot.slane %v4222_v38, 1  ;;  %v2161_v14 = vmul.f32 %v3741_v23, %v925_v61 }
 0x233   : > { %v2602_v7 = vadd.f32 %v3797_v19, %v2358_v9  ;;  %v5592_v36 = vrot.slane %v4226_v56, 2  ;;  %v2405_v16 = vmul.f32 %v4280_v43, %v925_v61  ;;  %v1725_v51 = vrot.slane %v4178_v35, 1 }
 0x234   : > { %v1731_v18 = vsel %vm1101_vm4, %v1729_v2, %v5591_v48  ;;  %v2601_v12 = vadd.f32 %v3800_v20, %v2357_v4  ;;  %v2639_v5 = vadd.f32 %v3989_v15, %v2600_v21  ;;  %v2285_v38 = vrot.slane %v2161_v14, 1 }
 0x235   : > { %v1799_v17 = vadd.f32 %v1731_v18, %v1555_v49  ;;  %v1975_v6 = vsel %vm1346_vm5, %v1973_v30, %v5592_v36  ;;  %v2641_v63 = vadd.f32 %v3989_v15, %v2602_v7  ;;  %v2529_v19 = vrot.slane %v2405_v16, 2 }
 0x236   : > { %v1727_v39 = vrot.slane %v4144_v57, 1  ;;  %v2640_v56 = vadd.f32 %v3989_v15, %v2601_v12  ;;  %v2671_v1 = vmax.f32 %v2639_v5, 0.0  ;;  %v2287_v25 = vsel %vm1101_vm4, %v2285_v38, %v2286_v29 }
 0x237   : > { %v2043_v50 = vadd.f32 %v1975_v6, %v1799_v17  ;;  %v1847_v61 = vmul.f32 %v3756_v40, %v4148_v58  ;;  %v2673_v20 = vmax.f32 %v2641_v63, 0.0  ;;  %v2531_v3 = vsel %vm1346_vm5, %v2529_v19, %v2530_v62 }
 0x238   : > { %v1728_v35 = vsel %vm1101_vm4, %v1725_v51, %v1727_v39  ;;  %v2672_v26 = vmax.f32 %v2640_v56, 0.0  ;;  %v2703_v11 = vmin.f32 %v2671_v1, 6.0  ;;  %v1971_v54 = vrot.slane %v4152_v41, 2 }
 0x239   : > { %v2111_v53 = vadd.f32 %v2079_v0, %v2043_v50  ;;  %v1798_v24 = vadd.f32 %v1728_v35, %v4185_v60  ;;  %v1969_v52 = vrot.slane %v1847_v61, 2  ;;  %v2705_v57 = vmin.f32 %v2673_v20, 6.0 }
 0x23a   : > { %v2078_v29 = vmul.f32 %v3761_v45, %v4196_v55  ;;  %v2704_v49 = vmin.f32 %v2672_v26, 6.0  ;;  %v2159_v2 = vmul.f32 %v3741_v23, %v4196_v55  ;;  %v2160_v62 = vmul.f32 %v3741_v23, %v4181_v10 }
 0x23b   : > { %v2355_v31 = vadd.f32 %v2287_v25, %v2111_v53  ;;  %v2403_v9 = vmul.f32 %v4280_v43, %v4196_v55  ;;  %3116 = vmatprep.subr.msk.mxu1 %vm788_vm2, %v2705_v57  ;;  %v1972_v27 = vsel %vm1346_vm5, %v1969_v52, %v1971_v54  ;;  %v2404_v41 = vmul.f32 %v4280_v43, %v4181_v10  ;;  %v4342_v53 = vld [vmem:[#allocation2 + $0x128] sm:$0xff]  ;;  %v5601_v54 = vld [vmem:[#allocation23_spill] sm:$0xff] }
 0x23c   : > { %v1240_v30 = vadd.f32 %v4157_v8, %v4123_v46  ;;  %3117 = vmatpush3.xpose.msk.msra.mxu1 %vm788_vm2, %v4003_v32  ;;  %v2042_v0 = vadd.f32 %v1972_v27, %v1798_v24  ;;  %v2281_v4 = vrot.slane %v2159_v2, 1  ;;  %v2283_v21 = vrot.slane %v2160_v62, 1  ;;  %v5598_v24 = vld [vmem:[#allocation29_spill] sm:$0xff] }
 0x23d   : > { %v2599_v60 = vadd.f32 %v2531_v3, %v2355_v31  ;;  %v2525_v48 = vrot.slane %v2403_v9, 2  ;;  %3118 = vmatprep.subr.msk.mxu1 %vm788_vm2, %v2704_v49  ;;  %v2527_v18 = vrot.slane %v2404_v41, 2  ;;  %v1412_v14 = vrot.slane %v4130_v13, 2  ;;  %v5600_v57 = vld [vmem:[#allocation25_spill] sm:$0xff]  ;;  %v4357_v49 = vld [vmem:[#allocation2 + $0x130] sm:$0x3] }
 0x23e   : > { %v1521_v10 = vmul.f32 %v3759_v44, %v4146_v47  ;;  %v2110_v7 = vadd.f32 %v2078_v29, %v2042_v0  ;;  %v2284_v46 = vsel %vm1101_vm4, %v2281_v4, %v2283_v21  ;;  %v1602_v32 = vmul.f32 %v3751_v34, %v4146_v47 }
 0x23f   : > { %v2638_v55 = vadd.f32 %v3989_v15, %v2599_v60  ;;  %v1846_v8 = vmul.f32 %v3756_v40, %v4146_v47  ;;  %v2528_v36 = vsel %vm1346_vm5, %v2525_v48, %v2527_v18  ;;  %v5593_v6 = vrot.slane %v4114_v59, 2  ;;  %v5603_v18 = vld [vmem:[#allocation14_spill] sm:$0xff] }
 0x240   : > { %v2077_v13 = vmul.f32 %v3761_v45, %v4194_v37  ;;  %3119 = vmatpush3.xpose.msk.msra.mxu1 %vm788_vm2, %v4021_v28  ;;  %v2354_v12 = vadd.f32 %v2284_v46, %v2110_v7  ;;  %v1724_v38 = vrot.slane %v1602_v32, 1  ;;  %v2158_v19 = vmul.f32 %v3741_v23, %v4194_v37  ;;  %v5605_v46 = vld [vmem:[#allocation26_spill] sm:$0xff] }
 0x241   : > { %v2670_v17 = vmax.f32 %v2638_v55, 0.0  ;;  %v1414_v16 = vsel %vm1346_vm5, %v1412_v14, %v5593_v6  ;;  %v1968_v63 = vrot.slane %v1846_v8, 2  ;;  %3120 = vmatprep.subr.msk.mxu1 %vm788_vm2, %v2703_v11  ;;  %v2402_v59 = vmul.f32 %v4280_v43, %v4194_v37  ;;  %v5596_v11 = vld [vmem:[#allocation24_spill] sm:$0xff] }
 0x242   : > { %v1485_v5 = vadd.f32 %v1414_v16, %v1240_v30  ;;  %v5594_v39 = vrot.slane %v3865_v42, 1  ;;  %v5595_v56 = vrot.slane %v4086_v22, 1  ;;  %v2598_v28 = vadd.f32 %v2528_v36, %v2354_v12  ;;  %v5602_v30 = vld [vmem:[#allocation15_spill] sm:$0xff] }
 0x243   : > { %v2702_v50 = vmin.f32 %v2670_v17, 6.0  ;;  %v1726_v61 = vsel %vm1101_vm4, %v1724_v38, %v1725_v51  ;;  %v1970_v20 = vsel %vm1346_vm5, %v1968_v63, %v1969_v52  ;;  %v2280_v3 = vrot.slane %v2158_v19, 1  ;;  %v5607_v17 = vld [vmem:[#allocation16_spill] sm:$0xff]  ;;  %v5608_v16 = vld [vmem:[#allocation27_spill] sm:$0xff] }
 0x244   : > { %v1686_v1 = vsel %vm1101_vm4, %v5595_v56, %v5594_v39  ;;  %v1553_v25 = vadd.f32 %v1521_v10, %v1485_v5  ;;  %v2524_v35 = vrot.slane %v2402_v59, 2  ;;  %v5597_v37 = vrot.slane %v5596_v11, 2  ;;  %3121 = vmatpush3.xpose.msk.msra.mxu1 %vm788_vm2, %v5600_v57  ;;  %v5610_v59 = vld [vmem:[#allocation30_spill] sm:$0xff] }
 0x245   : > { %v1781_v26 = vadd.f32 %v1686_v1, %v4100_v33  ;;  %v5599_v42 = vrot.slane %v5598_v24, 2  ;;  %v2637_v31 = vadd.f32 %v3989_v15, %v2598_v28  ;;  %v2061_v52 = vmul.f32 %v3761_v45, %v5601_v54  ;;  %3122 = vmatprep.subr.msk.mxu1 %vm788_vm2, %v2702_v50 }
 0x246   : > { %v1797_v51 = vadd.f32 %v1726_v61, %v1553_v25  ;;  %v2134_v29 = vmul.f32 %v3741_v23, %v5601_v54  ;;  %v2282_v33 = vsel %vm1101_vm4, %v2280_v3, %v2281_v4  ;;  %v2526_v2 = vsel %vm1346_vm5, %v2524_v35, %v2525_v48  ;;  %v5604_v48 = vld [vmem:[#allocation32_spill] sm:$0xff] }
 0x247   : > { %v1930_v22 = vsel %vm1346_vm5, %v5599_v42, %v5597_v37  ;;  %v2378_v9 = vmul.f32 %v4280_v43, %v5601_v54  ;;  %v2669_v60 = vmax.f32 %v2637_v31, 0.0  ;;  %v962_v0 = vmul.f32 %v5602_v30, %v4342_v53  ;;  %v5611_v25 = vld [vmem:[#allocation28_spill] sm:$0xff] }
 0x248   : > { %v2025_v62 = vadd.f32 %v1930_v22, %v1781_v26  ;;  %v2041_v27 = vadd.f32 %v1970_v20, %v1797_v51  ;;  %v2240_v41 = vrot.slane %v2134_v29, 1  ;;  %v4368_v14 = vmul.f32 %v5603_v18, %v4342_v53  ;;  %3123 = vmatpush3.xpose.msk.msra.mxu1 %vm788_vm2, %v5604_v48  ;;  %v5612_v20 = vld [vmem:[#allocation34_spill] sm:$0xff]  ;;  %v5613_v54 = vld [vmem:[#allocation20_spill] sm:$0xff] }
 0x249   : > { %v2484_v55 = vrot.slane %v2378_v9, 2  ;;  %v1043_v4 = vmul.f32 %v5603_v18, %v4357_v49  ;;  %v2701_v10 = vmin.f32 %v2669_v60, 6.0  ;;  %v5606_v32 = vrot.slane %v5605_v46, 1 }
 0x24a   : > { %v2093_v21 = vadd.f32 %v2061_v52, %v2025_v62  ;;  %v2109_v7 = vadd.f32 %v2077_v13, %v2041_v27  ;;  %v4379_v36 = vmul.f32 %v5607_v17, %v4342_v53  ;;  %v5609_v12 = vrot.slane %v5608_v16, 2  ;;  %v5614_v52 = vld [vmem:[#allocation21_spill] sm:$0xff] }
 0x24b   : > { %v2242_v8 = vsel %vm1101_vm4, %v2240_v41, %v5606_v32  ;;  %v1163_v38 = vrot.slane %v4368_v14, 1  ;;  %v1165_v63 = vrot.slane %v1043_v4, 1  ;;  %3124 = vmatprep.subr.msk.mxu1 %vm788_vm2, %v2701_v10  ;;  %v1288_v13 = vmul.f32 %v5607_v17, %v4357_v49  ;;  %v5615_v41 = vld [vmem:[#allocation33_spill] sm:$0xff] }
 0x24c   : > { %v2337_v6 = vadd.f32 %v2242_v8, %v2093_v21  ;;  %v2486_v5 = vsel %vm1346_vm5, %v2484_v55, %v5609_v12  ;;  %v2353_v50 = vadd.f32 %v2282_v33, %v2109_v7  ;;  %v1408_v19 = vrot.slane %v4379_v36, 2  ;;  %3125 = vmatpush3.xpose.msk.msra.mxu1 %vm788_vm2, %v5612_v20  ;;  %v5616_v12 = vld [vmem:[#allocation22_spill] sm:$0xff]  ;;  %v4455_v20 = vld [vmem:[#allocation2 + $0x120] sm:$0xff] }
 0x24d   : > { %v1520_v39 = vmul.f32 %v3759_v44, %v5610_v59  ;;  %v1166_v1 = vsel %vm1101_vm4, %v1163_v38, %v1165_v63  ;;  %v4396_v28 = vmul.f32 %v3751_v34, %v5610_v59  ;;  %v1601_v61 = vmul.f32 %v3751_v34, %v5611_v25  ;;  %v5617_v63 = vld [vmem:[#allocation19_spill] sm:$0xff] }
 0x24e   : > { %v2581_v56 = vadd.f32 %v2486_v5, %v2337_v6  ;;  %v2597_v3 = vadd.f32 %v2526_v2, %v2353_v50  ;;  %v1239_v35 = vadd.f32 %v1166_v1, %v962_v0  ;;  %v1410_v26 = vrot.slane %v1288_v13, 2  ;;  %v4451_v1 = vld [vmem:[#allocation2 + $0x88] sm:$0x3] }
 0x24f   : > { %v4404_v11 = vmul.f32 %v3756_v40, %v5610_v59  ;;  %v1720_v24 = vrot.slane %v4396_v28, 1  ;;  %v1722_v42 = vrot.slane %v1601_v61, 1  ;;  %v1845_v22 = vmul.f32 %v3756_v40, %v5611_v25 }
 0x250   : > { %v2620_v37 = vadd.f32 %v3989_v15, %v2581_v56  ;;  %v2636_v57 = vadd.f32 %v3989_v15, %v2597_v3  ;;  %v1411_v31 = vsel %vm1346_vm5, %v1408_v19, %v1410_v26  ;;  %v1536_v29 = vadd.f32 %v5614_v52, %v5613_v54  ;;  %v3277_v26 = vld [vmem:[#allocation2 + $0x98] sm:$0xff]  ;;  %v3278_v54 = vld [vmem:[#allocation2 + $0xa0] sm:$0x3] }
 0x251   : > { %v1964_v51 = vrot.slane %v4404_v11, 2  ;;  %v1484_v2 = vadd.f32 %v1411_v31, %v1239_v35  ;;  %v1723_v62 = vsel %vm1101_vm4, %v1720_v24, %v1722_v42  ;;  %v1966_v9 = vrot.slane %v1845_v22, 2 }
 0x252   : > { %v2652_v33 = vmax.f32 %v2620_v37, 0.0  ;;  %v2668_v60 = vmax.f32 %v2636_v57, 0.0  ;;  %v4422_v27 = vmul.f32 %v3741_v23, %v4148_v58  ;;  %v2157_v0 = vmul.f32 %v3741_v23, %v5615_v41 }
 0x253   : > { %v4428_v21 = vmul.f32 %v4280_v43, %v4148_v58  ;;  %v1552_v4 = vadd.f32 %v1520_v39, %v1484_v2  ;;  %v2076_v48 = vmul.f32 %v3761_v45, %v4148_v58  ;;  %v2401_v10 = vmul.f32 %v4280_v43, %v5615_v41  ;;  %v4445_v39 = vld [vmem:[#allocation2 + $0x80] sm:$0xff] }
 0x254   : > { %v2684_v55 = vmin.f32 %v2652_v33, 6.0  ;;  %v2700_v7 = vmin.f32 %v2668_v60, 6.0  ;;  %v1967_v46 = vsel %vm1346_vm5, %v1964_v51, %v1966_v9  ;;  %v2276_v32 = vrot.slane %v4422_v27, 1 }
 0x255   : > { %v2278_v8 = vrot.slane %v2157_v0, 1  ;;  %v1796_v6 = vadd.f32 %v1723_v62, %v1552_v4  ;;  %v2520_v16 = vrot.slane %v4428_v21, 2  ;;  %v1680_v5 = vrot.slane %v5616_v12, 1 }
 0x256   : > { %v1682_v50 = vrot.slane %v5617_v63, 1  ;;  %3126 = vmatprep.subr.msk.mxu1 %vm788_vm2, %v2700_v7  ;;  %v2522_v13 = vrot.slane %v2401_v10, 2  ;;  %v4449_v56 = vmul.f32 %v4445_v39, %v3756_v40  ;;  %v1821_v61 = vmul.f32 %v4451_v1, %v3756_v40 }
 0x257   : > { %v2279_v58 = vsel %vm1101_vm4, %v2276_v32, %v2278_v8  ;;  %3127 = vmatpush3.xpose.msk.msra.mxu1 %vm788_vm2, %v2684_v55  ;;  %v2040_v3 = vadd.f32 %v1967_v46, %v1796_v6  ;;  %v2060_v37 = vmul.f32 %v3277_v26, %v3761_v45  ;;  %v4463_v42 = vmul.f32 %v3277_v26, %v3741_v23 }
 0x258   : > { %v1683_v35 = vsel %vm1101_vm4, %v1680_v5, %v1682_v50  ;;  %v1924_v57 = vrot.slane %v4449_v56, 2  ;;  %v1926_v31 = vrot.slane %v1821_v61, 2  ;;  %v2133_v52 = vmul.f32 %v3278_v54, %v3741_v23 }
 0x259   : > { %v1780_v22 = vadd.f32 %v1683_v35, %v1536_v29  ;;  %v2108_v33 = vadd.f32 %v2076_v48, %v2040_v3  ;;  %v2236_v2 = vrot.slane %v4463_v42, 1  ;;  %v4469_v62 = vmul.f32 %v3277_v26, %v4280_v43 }
 0x25a   : > { %v2377_v9 = vmul.f32 %v3278_v54, %v4280_v43  ;;  %v2523_v60 = vsel %vm1346_vm5, %v2520_v16, %v2522_v13  ;;  %v1927_v29 = vsel %vm1346_vm5, %v1924_v57, %v1926_v31  ;;  %v2238_v41 = vrot.slane %v2133_v52, 1  ;;  %v5618_v13 = vld [vmem:[#allocation31_spill] sm:$0xff] }
 0x25b   : > { %v1041_v0 = vmul.f32 %v5603_v18, %v4455_v20  ;;  %v2352_v55 = vadd.f32 %v2279_v58, %v2108_v33  ;;  %v2024_v4 = vadd.f32 %v1927_v29, %v1780_v22  ;;  %v2480_v48 = vrot.slane %v4469_v62, 2  ;;  %v4501_v33 = vld [vmem:[#allocation2 + $0x60] sm:$0xff] }
 0x25c   : > { %v961_v10 = vmul.f32 %v5602_v30, %v4455_v20  ;;  %v2239_v7 = vsel %vm1101_vm4, %v2236_v2, %v2238_v41  ;;  %v2482_v46 = vrot.slane %v2377_v9, 2  ;;  %v1286_v6 = vmul.f32 %v5607_v17, %v4455_v20 }
 0x25d   : > { %v1162_v8 = vrot.slane %v1041_v0, 1  ;;  %v2596_v63 = vadd.f32 %v2523_v60, %v2352_v55  ;;  %v2092_v50 = vadd.f32 %v2060_v37, %v2024_v4  ;;  %v1519_v58 = vmul.f32 %v3759_v44, %v5618_v13 }
 0x25e   : > { %v1599_v61 = vmul.f32 %v3751_v34, %v5618_v13  ;;  %v2483_v3 = vsel %vm1346_vm5, %v2480_v48, %v2482_v46  ;;  %v1407_v26 = vrot.slane %v1286_v6, 2  ;;  %v1843_v22 = vmul.f32 %v3756_v40, %v5618_v13  ;;  %v3280_v13 = vld [vmem:[#allocation2 + $0x90] sm:$0xff] }
 0x25f   : > { %v1164_v35 = vsel %vm1101_vm4, %v1162_v8, %v1163_v38  ;;  %v2635_v37 = vadd.f32 %v3989_v15, %v2596_v63  ;;  %v2336_v31 = vadd.f32 %v2239_v7, %v2092_v50  ;;  %v2155_v14 = vmul.f32 %v3741_v23, %v4146_v47  ;;  %v4532_v50 = vld [vmem:[#allocation2 + $0x78] sm:$0xff] }
 0x260   : > { %v1238_v54 = vadd.f32 %v1164_v35, %v961_v10  ;;  %v1719_v52 = vrot.slane %v1599_v61, 1  ;;  %v1409_v9 = vsel %vm1346_vm5, %v1407_v26, %v1408_v19  ;;  %v1963_v60 = vrot.slane %v1843_v22, 2  ;;  %v4541_v61 = vld [vmem:[#allocation2 + $0x110] sm:$0xff]  ;;  %v5619_v26 = vld [vmem:[#allocation17_spill] sm:$0xff] }
 0x261   : > { %v2399_v38 = vmul.f32 %v4280_v43, %v4146_v47  ;;  %v2667_v29 = vmax.f32 %v2635_v37, 0.0  ;;  %v2580_v41 = vadd.f32 %v2483_v3, %v2336_v31  ;;  %v2075_v55 = vmul.f32 %v3761_v45, %v4146_v47 }
 0x262   : > { %v1483_v0 = vadd.f32 %v1409_v9, %v1238_v54  ;;  %v1721_v4 = vsel %vm1101_vm4, %v1719_v52, %v1720_v24  ;;  %v1965_v36 = vsel %vm1346_vm5, %v1963_v60, %v1964_v51  ;;  %v2275_v19 = vrot.slane %v2155_v14, 1  ;;  %v4547_v14 = vld [vmem:[#allocation2 + $0x118] sm:$0x3] }
 0x263   : > { %v2519_v10 = vrot.slane %v2399_v38, 2  ;;  %v2699_v7 = vmin.f32 %v2667_v29, 6.0  ;;  %v2619_v46 = vadd.f32 %v3989_v15, %v2580_v41  ;;  %v1017_v6 = vmul.f32 %v5603_v18, %v4501_v33  ;;  %v5621_v29 = vld [vmem:[#allocation18_spill] sm:$0xff] }
 0x264   : > { %v1551_v8 = vadd.f32 %v1519_v58, %v1483_v0  ;;  %v2277_v47 = vsel %vm1101_vm4, %v2275_v19, %v2276_v32  ;;  %v945_v11 = vmul.f32 %v5602_v30, %v4501_v33  ;;  %v1262_v24 = vmul.f32 %v5607_v17, %v4501_v33 }
 0x265   : > { %v2521_v28 = vsel %vm1346_vm5, %v2519_v10, %v2520_v16  ;;  %3128 = vmatprep.subr.msk.mxu1 %vm788_vm2, %v2699_v7  ;;  %v2651_v15 = vmax.f32 %v2619_v46, 0.0  ;;  %v1122_v63 = vrot.slane %v1017_v6, 1  ;;  %v1575_v27 = vmul.f32 %v4532_v50, %v3751_v34 }
 0x266   : > { %v1795_v51 = vadd.f32 %v1721_v4, %v1551_v8  ;;  %v1367_v32 = vrot.slane %v1262_v24, 2  ;;  %v1503_v21 = vmul.f32 %v4532_v50, %v3759_v44  ;;  %v1819_v16 = vmul.f32 %v4532_v50, %v3756_v40 }
 0x267   : > { %v2131_v58 = vmul.f32 %v3280_v13, %v3741_v23  ;;  %v2683_v3 = vmin.f32 %v2651_v15, 6.0  ;;  %v5620_v22 = vrot.slane %v5619_v26, 1  ;;  %v1679_v31 = vrot.slane %v1575_v27, 1 }
 0x268   : > { %v2039_v35 = vadd.f32 %v1965_v36, %v1795_v51  ;;  %v1923_v52 = vrot.slane %v1819_v16, 2  ;;  %v2059_v9 = vmul.f32 %v3280_v13, %v3761_v45  ;;  %v5622_v41 = vrot.slane %v5621_v29, 2 }
 0x269   : > { %v1124_v37 = vsel %vm1101_vm4, %v1122_v63, %v5620_v22  ;;  %v2235_v60 = vrot.slane %v2131_v58, 1  ;;  %3129 = vmatpush3.xpose.msk.msra.mxu1 %vm788_vm2, %v2683_v3  ;;  %v1681_v4 = vsel %vm1101_vm4, %v1679_v31, %v1680_v5  ;;  %v2375_v36 = vmul.f32 %v3280_v13, %v4280_v43 }
 0x26a   : > { %v1222_v54 = vadd.f32 %v1124_v37, %v945_v11  ;;  %v2107_v38 = vadd.f32 %v2075_v55, %v2039_v35  ;;  %v1369_v0 = vsel %vm1346_vm5, %v1367_v32, %v5622_v41  ;;  %v1925_v10 = vsel %vm1346_vm5, %v1923_v52, %v1924_v57  ;;  %v4590_v32 = vld [vmem:[%s5502_s4] ss:$0 sm:$0xff]  ;;  %v4610_v52 = vld [vmem:[#allocation2 + $0x50] sm:$0xff] }
 0x26b   : > { %v960_v7 = vmul.f32 %v5602_v30, %v4541_v61  ;;  %v4564_v55 = vmul.f32 %v5603_v18, %v4541_v61  ;;  %v2237_v12 = vsel %vm1101_vm4, %v2235_v60, %v2236_v2  ;;  %v1040_v5 = vmul.f32 %v5603_v18, %v4547_v14 }
 0x26c   : > { %v1467_v19 = vadd.f32 %v1369_v0, %v1222_v54  ;;  %v2351_v46 = vadd.f32 %v2277_v47, %v2107_v38  ;;  %v4573_v56 = vmul.f32 %v5607_v17, %v4541_v61  ;;  %v2479_v8 = vrot.slane %v2375_v36, 2  ;;  %v4623_v36 = vld [vmem:[#allocation2 + $0x58] sm:$0x3] }
 0x26d   : > { %v1158_v6 = vrot.slane %v4564_v55, 1  ;;  %v1285_v11 = vmul.f32 %v5607_v17, %v4547_v14  ;;  %v1160_v47 = vrot.slane %v1040_v5, 1  ;;  %v1518_v2 = vmul.f32 %v3759_v44, %v4342_v53 }
 0x26e   : > { %v1535_v57 = vadd.f32 %v1503_v21, %v1467_v19  ;;  %v2595_v24 = vadd.f32 %v2521_v28, %v2351_v46  ;;  %v1403_v42 = vrot.slane %v4573_v56, 2  ;;  %v4583_v63 = vmul.f32 %v3751_v34, %v4342_v53 }
 0x26f   : > { %v1405_v51 = vrot.slane %v1285_v11, 2  ;;  %v1598_v27 = vmul.f32 %v3751_v34, %v4357_v49  ;;  %v1161_v21 = vsel %vm1101_vm4, %v1158_v6, %v1160_v47  ;;  %v4598_v16 = vmul.f32 %v3756_v40, %v4342_v53 }
 0x270   : > { %v1779_v15 = vadd.f32 %v1681_v4, %v1535_v57  ;;  %v2634_v28 = vadd.f32 %v4590_v32, %v2595_v24  ;;  %v1842_v13 = vmul.f32 %v3756_v40, %v4357_v49  ;;  %v2481_v3 = vsel %vm1346_vm5, %v2479_v8, %v2480_v48 }
 0x271   : > { %v1237_v35 = vadd.f32 %v1161_v21, %v960_v7  ;;  %v1715_v26 = vrot.slane %v4583_v63, 1  ;;  %v1406_v37 = vsel %vm1346_vm5, %v1403_v42, %v1405_v51  ;;  %v1717_v31 = vrot.slane %v1598_v27, 1 }
 0x272   : > { %v2023_v58 = vadd.f32 %v1925_v10, %v1779_v15  ;;  %v2666_v22 = vmax.f32 %v2634_v28, 0.0  ;;  %v1959_v54 = vrot.slane %v4598_v16, 2  ;;  %v1961_v29 = vrot.slane %v1842_v13, 2 }
 0x273   : > { %v1482_v38 = vadd.f32 %v1406_v37, %v1237_v35  ;;  %v4614_v62 = vmul.f32 %v3741_v23, %v5610_v59  ;;  %v1718_v41 = vsel %vm1101_vm4, %v1715_v26, %v1717_v31  ;;  %v2074_v0 = vmul.f32 %v3761_v45, %v5610_v59 }
 0x274   : > { %v2091_v60 = vadd.f32 %v2059_v9, %v2023_v58  ;;  %v2698_v48 = vmin.f32 %v2666_v22, 6.0  ;;  %v2154_v4 = vmul.f32 %v3741_v23, %v5611_v25  ;;  %v4628_v7 = vmul.f32 %v4280_v43, %v5610_v59 }
 0x275   : > { %v1550_v19 = vadd.f32 %v1518_v2, %v1482_v38  ;;  %v2271_v10 = vrot.slane %v4614_v62, 1  ;;  %v1962_v46 = vsel %vm1346_vm5, %v1959_v54, %v1961_v29  ;;  %v2398_v57 = vmul.f32 %v4280_v43, %v5611_v25 }
 0x276   : > { %v2335_v9 = vadd.f32 %v2237_v12, %v2091_v60  ;;  %3130 = vmatprep.subr.msk.mxu1 %vm788_vm2, %v2698_v48  ;;  %v2273_v5 = vrot.slane %v2154_v4, 1  ;;  %v4638_v12 = vmul.f32 %v5603_v18, %v4610_v52  ;;  %v944_v59 = vmul.f32 %v5602_v30, %v4610_v52  ;;  %v4668_v48 = vld [vmem:[#allocation2 + $0x70] sm:$0x3] }
 0x277   : > { %v1794_v11 = vadd.f32 %v1718_v41, %v1550_v19  ;;  %v1016_v24 = vmul.f32 %v5603_v18, %v4623_v36  ;;  %v2515_v2 = vrot.slane %v4628_v7, 2  ;;  %v4651_v15 = vmul.f32 %v5607_v17, %v4610_v52 }
 0x278   : > { %v2579_v8 = vadd.f32 %v2481_v3, %v2335_v9  ;;  %v2274_v47 = vsel %vm1101_vm4, %v2271_v10, %v2273_v5  ;;  %v1118_v25 = vrot.slane %v4638_v12, 1  ;;  %v1261_v21 = vmul.f32 %v5607_v17, %v4623_v36  ;;  %v4657_v3 = vld [vmem:[#allocation2 + $0x68] sm:$0xff] }
 0x279   : > { %v2038_v27 = vadd.f32 %v1962_v46, %v1794_v11  ;;  %v1120_v28 = vrot.slane %v1016_v24, 1  ;;  %v2517_v13 = vrot.slane %v2398_v57, 2  ;;  %v1363_v58 = vrot.slane %v4651_v15, 2 }
 0x27a   : > { %v2618_v51 = vadd.f32 %v4590_v32, %v2579_v8  ;;  %v1502_v35 = vmul.f32 %v4657_v3, %v3759_v44  ;;  %v4663_v22 = vmul.f32 %v4657_v3, %v3751_v34  ;;  %v1365_v38 = vrot.slane %v1261_v21, 2 }
 0x27b   : > { %v2106_v31 = vadd.f32 %v2074_v0, %v2038_v27  ;;  %v1121_v60 = vsel %vm1101_vm4, %v1118_v25, %v1120_v28  ;;  %v1574_v41 = vmul.f32 %v4668_v48, %v3751_v34  ;;  %v4675_v9 = vmul.f32 %v4657_v3, %v3756_v40  ;;  %v4693_v28 = vld [vmem:[#allocation2 + $0x108] sm:$0xff] }
 0x27c   : > { %v2650_v37 = vmax.f32 %v2618_v51, 0.0  ;;  %v1221_v29 = vadd.f32 %v1121_v60, %v944_v59  ;;  %v1675_v4 = vrot.slane %v4663_v22, 1  ;;  %v1366_v0 = vsel %vm1346_vm5, %v1363_v58, %v1365_v38 }
 0x27d   : > { %v2350_v46 = vadd.f32 %v2274_v47, %v2106_v31  ;;  %v1818_v5 = vmul.f32 %v4668_v48, %v3756_v40  ;;  %v2518_v57 = vsel %vm1346_vm5, %v2515_v2, %v2517_v13  ;;  %v1677_v11 = vrot.slane %v1574_v41, 1 }
 0x27e   : > { %v2682_v19 = vmin.f32 %v2650_v37, 6.0  ;;  %v1466_v8 = vadd.f32 %v1366_v0, %v1221_v29  ;;  %v5543_v59 = vrot.slane %v4675_v9, 2  ;;  %v4689_v47 = vmul.f32 %v4445_v39, %v3741_v23 }
 0x27f   : > { %v2594_v24 = vadd.f32 %v2518_v57, %v2350_v46  ;;  %v1921_v51 = vrot.slane %v1818_v5, 2  ;;  %v2130_v27 = vmul.f32 %v4451_v1, %v3741_v23  ;;  %v1678_v13 = vsel %vm1101_vm4, %v1675_v4, %v1677_v11 }
 0x280   : > { %3131 = vmatpush3.xpose.msk.msra.mxu1 %vm788_vm2, %v2682_v19  ;;  %v1534_v21 = vadd.f32 %v1502_v35, %v1466_v8  ;;  %v4700_v37 = vmul.f32 %v4445_v39, %v4280_v43  ;;  %v2374_v31 = vmul.f32 %v4451_v1, %v4280_v43  ;;  %v2058_v35 = vmul.f32 %v4445_v39, %v3761_v45 }
 0x281   : > { %v2633_v60 = vadd.f32 %v4590_v32, %v2594_v24  ;;  %v1922_v38 = vsel %vm1346_vm5, %v5543_v59, %v1921_v51  ;;  %v5542_v29 = vrot.slane %v4689_v47, 1  ;;  %v2233_v19 = vrot.slane %v2130_v27, 1 }
 0x282   : > { %v1778_v41 = vadd.f32 %v1678_v13, %v1534_v21  ;;  %v5544_v46 = vrot.slane %v4700_v37, 2  ;;  %v2477_v0 = vrot.slane %v2374_v31, 2  ;;  %v959_v1 = vmul.f32 %v5602_v30, %v4693_v28 }
 0x283   : > { %v2665_v5 = vmax.f32 %v2633_v60, 0.0  ;;  %v1038_v57 = vmul.f32 %v5603_v18, %v4693_v28  ;;  %v1283_v8 = vmul.f32 %v5607_v17, %v4693_v28  ;;  %v2234_v39 = vsel %vm1101_vm4, %v5542_v29, %v2233_v19  ;;  %v4728_v60 = vld [vmem:[#allocation2 + $0x48] sm:$0xff]  ;;  %v3284_v29 = vld [vmem:[#allocation2 + $0x138] sm:$0xff] }
 0x284   : > { %v2022_v11 = vadd.f32 %v1922_v38, %v1778_v41  ;;  %v2478_v24 = vsel %vm1346_vm5, %v5544_v46, %v2477_v0  ;;  %v1596_v51 = vmul.f32 %v3751_v34, %v4455_v20  ;;  %v1840_v31 = vmul.f32 %v3756_v40, %v4455_v20 }
 0x285   : > { %v2697_v27 = vmin.f32 %v2665_v5, 6.0  ;;  %v1157_v21 = vrot.slane %v1038_v57, 1  ;;  %v1402_v13 = vrot.slane %v1283_v8, 2  ;;  %v1517_v41 = vmul.f32 %v3759_v44, %v4455_v20 }
 0x286   : > { %v2090_v38 = vadd.f32 %v2058_v35, %v2022_v11  ;;  %v1714_v19 = vrot.slane %v1596_v51, 1  ;;  %v2152_v59 = vmul.f32 %v3284_v29, %v3741_v23  ;;  %v1958_v5 = vrot.slane %v1840_v31, 2 }
 0x287   : > { %3132 = vmatprep.subr.msk.mxu1 %vm788_vm2, %v2697_v27  ;;  %v1159_v0 = vsel %vm1101_vm4, %v1157_v21, %v1158_v6  ;;  %v2073_v57 = vmul.f32 %v3284_v29, %v3761_v45  ;;  %v2396_v8 = vmul.f32 %v3284_v29, %v4280_v43  ;;  %v1404_v11 = vsel %vm1346_vm5, %v1402_v13, %v1403_v42  ;;  %v4772_v13 = vld [vmem:[#allocation2 + $0xf8] sm:$0xff] }
 0x288   : > { %v2334_v46 = vadd.f32 %v2234_v39, %v2090_v38  ;;  %v1236_v35 = vadd.f32 %v1159_v0, %v959_v1  ;;  %v2270_v51 = vrot.slane %v2152_v59, 1  ;;  %v1716_v27 = vsel %vm1101_vm4, %v1714_v19, %v1715_v26 }
 0x289   : > { %v1960_v55 = vsel %vm1346_vm5, %v1958_v5, %v1959_v54  ;;  %v2514_v6 = vrot.slane %v2396_v8, 2  ;;  %v1014_v21 = vmul.f32 %v5603_v18, %v4728_v60  ;;  %v943_v56 = vmul.f32 %v5602_v30, %v4728_v60  ;;  %v4781_v8 = vld [vmem:[#allocation2 + $0x100] sm:$0x3] }
 0x28a   : > { %v2578_v29 = vadd.f32 %v2478_v24, %v2334_v46  ;;  %v1481_v39 = vadd.f32 %v1404_v11, %v1236_v35  ;;  %v1259_v42 = vmul.f32 %v5607_v17, %v4728_v60  ;;  %v2272_v63 = vsel %vm1101_vm4, %v2270_v51, %v2271_v10 }
 0x28b   : > { %v2516_v16 = vsel %vm1346_vm5, %v2514_v6, %v2515_v2  ;;  %v1117_v26 = vrot.slane %v1014_v21, 1  ;;  %v1572_v54 = vmul.f32 %v3751_v34, %v4501_v33  ;;  %v1816_v24 = vmul.f32 %v3756_v40, %v4501_v33 }
 0x28c   : > { %v2617_v59 = vadd.f32 %v4590_v32, %v2578_v29  ;;  %v1549_v46 = vadd.f32 %v1517_v41, %v1481_v39  ;;  %v1362_v1 = vrot.slane %v1259_v42, 2  ;;  %v1501_v10 = vmul.f32 %v3759_v44, %v4501_v33 }
 0x28d   : > { %v1119_v62 = vsel %vm1101_vm4, %v1117_v26, %v1118_v25  ;;  %v1674_v7 = vrot.slane %v1572_v54, 1  ;;  %v2128_v2 = vmul.f32 %v4532_v50, %v3741_v23  ;;  %v2057_v19 = vmul.f32 %v4532_v50, %v3761_v45 }
 0x28e   : > { %v2649_v31 = vmax.f32 %v2617_v59, 0.0  ;;  %v1793_v38 = vadd.f32 %v1716_v27, %v1549_v46  ;;  %v1220_v41 = vadd.f32 %v1119_v62, %v943_v56  ;;  %v1364_v12 = vsel %vm1346_vm5, %v1362_v1, %v1363_v58 }
 0x28f   : > { %v1918_v25 = vrot.slane %v1816_v24, 2  ;;  %v2230_v0 = vrot.slane %v2128_v2, 1  ;;  %v2372_v5 = vmul.f32 %v4532_v50, %v4280_v43  ;;  %v1676_v27 = vsel %vm1101_vm4, %v1674_v7, %v1675_v4 }
 0x290   : > { %v2681_v35 = vmin.f32 %v2649_v31, 6.0  ;;  %v2037_v11 = vadd.f32 %v1960_v55, %v1793_v38  ;;  %v1465_v51 = vadd.f32 %v1364_v12, %v1220_v41  ;;  %v5623_v6 = vrot.slane %v4675_v9, 2  ;;  %v4830_v31 = vld [vmem:[%s5503_s5] sm:$0xf] }
 0x291   : > { %v2474_v21 = vrot.slane %v2372_v5, 2  ;;  %v958_v58 = vmul.f32 %v5602_v30, %v4772_v13  ;;  %v4793_v50 = vmul.f32 %v5603_v18, %v4772_v13  ;;  %v1037_v22 = vmul.f32 %v5603_v18, %v4781_v8  ;;  %3148 = vmatprep.mubr.msk.f32.mxu1 %vm788_vm2, %v4830_v31 }
 0x292   : > { %v1920_v15 = vsel %vm1346_vm5, %v1918_v25, %v5623_v6  ;;  %3133 = vmatpush3.xpose.msk.msra.mxu1 %vm788_vm2, %v2681_v35  ;;  %v2105_v55 = vadd.f32 %v2073_v57, %v2037_v11  ;;  %v1533_v29 = vadd.f32 %v1501_v10, %v1465_v51  ;;  %v4800_v4 = vmul.f32 %v5607_v17, %v4772_v13 }
 0x293   : > { %v5624_v9 = vrot.slane %v4689_v47, 1  ;;  %v5625_v56 = vrot.slane %v4700_v37, 2  ;;  %v1153_v26 = vrot.slane %v4793_v50, 1  ;;  %v1282_v57 = vmul.f32 %v5607_v17, %v4781_v8 }
 0x294   : > { %v2349_v54 = vadd.f32 %v2272_v63, %v2105_v55  ;;  %v1777_v59 = vadd.f32 %v1676_v27, %v1533_v29  ;;  %v1155_v46 = vrot.slane %v1037_v22, 1  ;;  %v1398_v1 = vrot.slane %v4800_v4, 2 }
 0x295   : > { %v2232_v39 = vsel %vm1101_vm4, %v2230_v0, %v5624_v9  ;;  %v2476_v42 = vsel %vm1346_vm5, %v2474_v21, %v5625_v56  ;;  %v1400_v24 = vrot.slane %v1282_v57, 2  ;;  %v4814_v47 = vmul.f32 %v3751_v34, %v4541_v61  ;;  %v4862_v57 = vld [vmem:[#allocation2 + $0x40] sm:$0x3] }
 0x296   : > { %v1595_v37 = vmul.f32 %v3751_v34, %v4547_v14  ;;  %v4820_v62 = vmul.f32 %v3756_v40, %v4541_v61  ;;  %v2593_v10 = vadd.f32 %v2516_v16, %v2349_v54  ;;  %v2021_v7 = vadd.f32 %v1920_v15, %v1777_v59  ;;  %v4849_v15 = vld [vmem:[#allocation2 + $0x38] sm:$0xff] }
 0x297   : > { %v1156_v63 = vsel %vm1101_vm4, %v1153_v26, %v1155_v46  ;;  %v1839_v2 = vmul.f32 %v3756_v40, %v4547_v14  ;;  %v1516_v41 = vmul.f32 %v3759_v44, %v4541_v61  ;;  %v1710_v12 = vrot.slane %v4814_v47, 1 }
 0x298   : > { %v1235_v38 = vadd.f32 %v1156_v63, %v958_v58  ;;  %v1712_v16 = vrot.slane %v1595_v37, 1  ;;  %v2632_v25 = vadd.f32 %v4590_v32, %v2593_v10  ;;  %v2089_v0 = vadd.f32 %v2057_v19, %v2021_v7 }
 0x299   : > { %v1401_v5 = vsel %vm1346_vm5, %v1398_v1, %v1400_v24  ;;  %v1954_v35 = vrot.slane %v4820_v62, 2  ;;  %v1956_v27 = vrot.slane %v1839_v2, 2  ;;  %v4847_v6 = vmul.f32 %v3741_v23, %v4342_v53 }
 0x29a   : > { %v1480_v11 = vadd.f32 %v1401_v5, %v1235_v38  ;;  %v1713_v51 = vsel %vm1101_vm4, %v1710_v12, %v1712_v16  ;;  %v2664_v21 = vmax.f32 %v2632_v25, 0.0  ;;  %v2333_v19 = vadd.f32 %v2232_v39, %v2089_v0 }
 0x29b   : > { %v2072_v58 = vmul.f32 %v3761_v45, %v4342_v53  ;;  %v2151_v55 = vmul.f32 %v3741_v23, %v4357_v49  ;;  %v2266_v22 = vrot.slane %v4847_v6, 1  ;;  %v4858_v9 = vmul.f32 %v4280_v43, %v4342_v53 }
 0x29c   : > { %v1548_v29 = vadd.f32 %v1516_v41, %v1480_v11  ;;  %v2395_v56 = vmul.f32 %v4280_v43, %v4357_v49  ;;  %v2696_v54 = vmin.f32 %v2664_v21, 6.0  ;;  %v2577_v39 = vadd.f32 %v2476_v42, %v2333_v19 }
 0x29d   : > { %v1957_v59 = vsel %vm1346_vm5, %v1954_v35, %v1956_v27  ;;  %v2268_v46 = vrot.slane %v2151_v55, 1  ;;  %v2510_v37 = vrot.slane %v4858_v9, 2  ;;  %v942_v10 = vmul.f32 %v5602_v30, %v4849_v15 }
 0x29e   : > { %v1792_v24 = vadd.f32 %v1713_v51, %v1548_v29  ;;  %v4872_v53 = vmul.f32 %v5603_v18, %v4849_v15  ;;  %3134 = vmatprep.subr.msk.mxu1 %vm788_vm2, %v2696_v54  ;;  %v2616_v49 = vadd.f32 %v4590_v32, %v2577_v39  ;;  %v2512_v42 = vrot.slane %v2395_v56, 2 }
 0x29f   : > { %v1013_v7 = vmul.f32 %v5603_v18, %v4862_v57  ;;  %v4880_v63 = vmul.f32 %v5607_v17, %v4849_v15  ;;  %v2269_v38 = vsel %vm1101_vm4, %v2266_v22, %v2268_v46  ;;  %v1258_v16 = vmul.f32 %v5607_v17, %v4862_v57 }
 0x2a0   : > { %v2036_v2 = vadd.f32 %v1957_v59, %v1792_v24  ;;  %v1113_v41 = vrot.slane %v4872_v53, 1  ;;  %v2648_v25 = vmax.f32 %v2616_v49, 0.0  ;;  %v2513_v0 = vsel %vm1346_vm5, %v2510_v37, %v2512_v42 }
 0x2a1   : > { %v1115_v5 = vrot.slane %v1013_v7, 1  ;;  %v1358_v11 = vrot.slane %v4880_v63, 2  ;;  %v1360_v27 = vrot.slane %v1258_v16, 2  ;;  %v4894_v21 = vmul.f32 %v3751_v34, %v4610_v52 }
 0x2a2   : > { %v2104_v51 = vadd.f32 %v2072_v58, %v2036_v2  ;;  %v1571_v19 = vmul.f32 %v3751_v34, %v4623_v36  ;;  %v2680_v55 = vmin.f32 %v2648_v25, 6.0  ;;  %v4903_v56 = vmul.f32 %v3756_v40, %v4610_v52  ;;  %v4915_v2 = vld [vmem:[#allocation2 + $0xf0] sm:$0xff] }
 0x2a3   : > { %v1116_v29 = vsel %vm1101_vm4, %v1113_v41, %v1115_v5  ;;  %v1815_v58 = vmul.f32 %v3756_v40, %v4623_v36  ;;  %v1500_v59 = vmul.f32 %v3759_v44, %v4610_v52  ;;  %v5545_v46 = vrot.slane %v4894_v21, 1 }
 0x2a4   : > { %v2348_v54 = vadd.f32 %v2269_v38, %v2104_v51  ;;  %v1219_v39 = vadd.f32 %v1116_v29, %v942_v10  ;;  %3135 = vmatpush3.xpose.msk.msra.mxu1 %vm788_vm2, %v2680_v55  ;;  %v1361_v24 = vsel %vm1346_vm5, %v1358_v11, %v1360_v27  ;;  %v1672_v49 = vrot.slane %v1571_v19, 1 }
 0x2a5   : > { %v1914_v42 = vrot.slane %v4903_v56, 2  ;;  %v1916_v7 = vrot.slane %v1815_v58, 2  ;;  %v4919_v10 = vmul.f32 %v4657_v3, %v3741_v23  ;;  %v2127_v25 = vmul.f32 %v4668_v48, %v3741_v23 }
 0x2a6   : > { %v2592_v16 = vadd.f32 %v2513_v0, %v2348_v54  ;;  %v1464_v38 = vadd.f32 %v1361_v24, %v1219_v39  ;;  %v1673_v5 = vsel %vm1101_vm4, %v5545_v46, %v1672_v49  ;;  %v2056_v51 = vmul.f32 %v4657_v3, %v3761_v45 }
 0x2a7   : > { %v4930_v27 = vmul.f32 %v4657_v3, %v4280_v43  ;;  %v2371_v0 = vmul.f32 %v4668_v48, %v4280_v43  ;;  %v1917_v29 = vsel %vm1346_vm5, %v1914_v42, %v1916_v7  ;;  %v5546_v58 = vrot.slane %v4919_v10, 1 }
 0x2a8   : > { %v2631_v19 = vadd.f32 %v4590_v32, %v2592_v16  ;;  %v1532_v55 = vadd.f32 %v1500_v59, %v1464_v38  ;;  %v2228_v54 = vrot.slane %v2127_v25, 1  ;;  %v1035_v3 = vmul.f32 %v5603_v18, %v4915_v2 }
 0x2a9   : > { %v2470_v39 = vrot.slane %v4930_v27, 2  ;;  %v2472_v24 = vrot.slane %v2371_v0, 2  ;;  %v957_v43 = vmul.f32 %v5602_v30, %v4915_v2  ;;  %v1280_v48 = vmul.f32 %v5607_v17, %v4915_v2 }
 0x2aa   : > { %v2663_v49 = vmax.f32 %v2631_v19, 0.0  ;;  %v1776_v46 = vadd.f32 %v1673_v5, %v1532_v55  ;;  %v2229_v59 = vsel %vm1101_vm4, %v5546_v58, %v2228_v54  ;;  %v1152_v16 = vrot.slane %v1035_v3, 1  ;;  %v4956_v55 = vld [vmem:[#allocation2 + $0x30] sm:$0xff] }
 0x2ab   : > { %v2473_v7 = vsel %vm1346_vm5, %v2470_v39, %v2472_v24  ;;  %v1593_v38 = vmul.f32 %v3751_v34, %v4693_v28  ;;  %v1397_v0 = vrot.slane %v1280_v48, 2  ;;  %v1837_v19 = vmul.f32 %v3756_v40, %v4693_v28 }
 0x2ac   : > { %v2695_v25 = vmin.f32 %v2663_v49, 6.0  ;;  %v2020_v5 = vadd.f32 %v1917_v29, %v1776_v46  ;;  %v1154_v54 = vsel %vm1101_vm4, %v1152_v16, %v1153_v26  ;;  %v1515_v58 = vmul.f32 %v3759_v44, %v4693_v28 }
 0x2ad   : > { %v1709_v24 = vrot.slane %v1593_v38, 1  ;;  %v2149_v3 = vmul.f32 %v3741_v23, %v4455_v20  ;;  %v1234_v29 = vadd.f32 %v1154_v54, %v957_v43  ;;  %v1953_v49 = vrot.slane %v1837_v19, 2  ;;  %v4974_v38 = vld [vmem:[#allocation8 + $0x8] ss:$0 sm:$0xff] }
 0x2ae   : > { %3136 = vmatprep.subr.msk.mxu1 %vm788_vm2, %v2695_v25  ;;  %v2088_v46 = vadd.f32 %v2056_v51, %v2020_v5  ;;  %v2071_v48 = vmul.f32 %v3761_v45, %v4455_v20  ;;  %v1399_v50 = vsel %vm1346_vm5, %v1397_v0, %v1398_v1  ;;  %v2393_v25 = vmul.f32 %v4974_v38, %v4455_v20 }
 0x2af   : > { %v1711_v26 = vsel %vm1101_vm4, %v1709_v24, %v1710_v12  ;;  %v2265_v16 = vrot.slane %v2149_v3, 1  ;;  %v1479_v43 = vadd.f32 %v1399_v50, %v1234_v29  ;;  %v941_v5 = vmul.f32 %v5602_v30, %v4956_v55 }
 0x2b0   : > { %v2332_v51 = vadd.f32 %v2229_v59, %v2088_v46  ;;  %v1011_v4 = vmul.f32 %v5603_v18, %v4956_v55  ;;  %v1955_v1 = vsel %vm1346_vm5, %v1953_v49, %v1954_v35  ;;  %v2509_v12 = vrot.slane %v2393_v25, 2 }
 0x2b1   : > { %v2267_v47 = vsel %vm1101_vm4, %v2265_v16, %v2266_v22  ;;  %v1256_v20 = vmul.f32 %v5607_v17, %v4956_v55  ;;  %v1547_v0 = vadd.f32 %v1515_v58, %v1479_v43  ;;  %v1569_v54 = vmul.f32 %v3751_v34, %v4728_v60 }
 0x2b2   : > { %v2576_v59 = vadd.f32 %v2473_v7, %v2332_v51  ;;  %v1112_v19 = vrot.slane %v1011_v4, 1  ;;  %v2511_v62 = vsel %vm1346_vm5, %v2509_v12, %v2510_v37  ;;  %v1499_v35 = vmul.f32 %v3759_v44, %v4728_v60  ;;  %v5018_v12 = vld [vmem:[#allocation2 + $0xe0] sm:$0xff] }
 0x2b3   : > { %v1357_v24 = vrot.slane %v1256_v20, 2  ;;  %v1813_v6 = vmul.f32 %v3756_v40, %v4728_v60  ;;  %v1791_v3 = vadd.f32 %v1711_v26, %v1547_v0  ;;  %v1669_v7 = vrot.slane %v1569_v54, 1 }
 0x2b4   : > { %v2615_v22 = vadd.f32 %v4590_v32, %v2576_v59  ;;  %v1114_v58 = vsel %vm1101_vm4, %v1112_v19, %v1113_v41  ;;  %v2055_v9 = vmul.f32 %v3761_v45, %v4501_v33  ;;  %v2125_v37 = vmul.f32 %v3741_v23, %v4501_v33 }
 0x2b5   : > { %v1218_v46 = vadd.f32 %v1114_v58, %v941_v5  ;;  %v1913_v29 = vrot.slane %v1813_v6, 2  ;;  %v2035_v50 = vadd.f32 %v1955_v1, %v1791_v3  ;;  %v1359_v16 = vsel %vm1346_vm5, %v1357_v24, %v1358_v11 }
 0x2b6   : > { %v2647_v49 = vmax.f32 %v2615_v22, 0.0  ;;  %v2369_v53 = vmul.f32 %v4974_v38, %v4501_v33  ;;  %v5626_v41 = vrot.slane %v4894_v21, 1  ;;  %v2225_v43 = vrot.slane %v2125_v37, 1  ;;  %v5026_v21 = vld [vmem:[#allocation2 + $0xe8] sm:$0x3] }
 0x2b7   : > { %v1463_v26 = vadd.f32 %v1359_v16, %v1218_v46  ;;  %v1915_v51 = vsel %vm1346_vm5, %v1913_v29, %v1914_v42  ;;  %v2103_v4 = vadd.f32 %v2071_v48, %v2035_v50  ;;  %v5022_v63 = vmul.f32 %v5018_v12, %v5603_v18 }
 0x2b8   : > { %v1671_v25 = vsel %vm1101_vm4, %v1669_v7, %v5626_v41  ;;  %v2679_v5 = vmin.f32 %v2647_v49, 6.0  ;;  %v2469_v1 = vrot.slane %v2369_v53, 2  ;;  %v956_v11 = vmul.f32 %v5018_v12, %v5602_v30 }
 0x2b9   : > { %v1531_v33 = vadd.f32 %v1499_v35, %v1463_v26  ;;  %v1034_v56 = vmul.f32 %v5026_v21, %v5603_v18  ;;  %v5032_v42 = vmul.f32 %v5018_v12, %v5607_v17  ;;  %v2347_v48 = vadd.f32 %v2267_v47, %v2103_v4 }
 0x2ba   : > { %3137 = vmatpush3.xpose.msk.msra.mxu1 %vm788_vm2, %v2679_v5  ;;  %v5627_v20 = vrot.slane %v4919_v10, 1  ;;  %v1148_v0 = vrot.slane %v5022_v63, 1  ;;  %v1279_v19 = vmul.f32 %v5026_v21, %v5607_v17  ;;  %v2471_v24 = vsel %vm1346_vm5, %v2469_v1, %v2470_v39  ;;  %v5079_v1 = vld [vmem:[#allocation2 + $0x20] sm:$0xff] }
 0x2bb   : > { %v1775_v54 = vadd.f32 %v1671_v25, %v1531_v33  ;;  %v1150_v35 = vrot.slane %v1034_v56, 1  ;;  %v1393_v6 = vrot.slane %v5032_v42, 2  ;;  %v2591_v22 = vadd.f32 %v2511_v62, %v2347_v48  ;;  %v5081_v33 = vld [vmem:[#allocation2 + $0x28] sm:$0x3] }
 0x2bc   : > { %v2227_v59 = vsel %vm1101_vm4, %v2225_v43, %v5627_v20  ;;  %v1395_v3 = vrot.slane %v1279_v19, 2  ;;  %v5047_v10 = vmul.f32 %v3751_v34, %v4772_v13  ;;  %v1592_v47 = vmul.f32 %v3751_v34, %v4781_v8 }
 0x2bd   : > { %v2019_v58 = vadd.f32 %v1915_v51, %v1775_v54  ;;  %v1151_v7 = vsel %vm1101_vm4, %v1148_v0, %v1150_v35  ;;  %v5056_v27 = vmul.f32 %v3756_v40, %v4772_v13  ;;  %v1836_v39 = vmul.f32 %v3756_v40, %v4781_v8 }
 0x2be   : > { %v2630_v62 = vadd.f32 %v4590_v32, %v2591_v22  ;;  %v1233_v46 = vadd.f32 %v1151_v7, %v956_v11  ;;  %v1514_v29 = vmul.f32 %v3759_v44, %v4772_v13  ;;  %v1705_v37 = vrot.slane %v5047_v10, 1 }
 0x2bf   : > { %v2087_v49 = vadd.f32 %v2055_v9, %v2019_v58  ;;  %v1396_v50 = vsel %vm1346_vm5, %v1393_v6, %v1395_v3  ;;  %v1707_v16 = vrot.slane %v1592_v47, 1  ;;  %v1949_v53 = vrot.slane %v5056_v27, 2 }
 0x2c0   : > { %v2662_v26 = vmax.f32 %v2630_v62, 0.0  ;;  %v1478_v41 = vadd.f32 %v1396_v50, %v1233_v46  ;;  %v1951_v25 = vrot.slane %v1836_v39, 2  ;;  %v5070_v51 = vmul.f32 %v3741_v23, %v4541_v61 }
 0x2c1   : > { %v2331_v43 = vadd.f32 %v2227_v59, %v2087_v49  ;;  %v1708_v5 = vsel %vm1101_vm4, %v1705_v37, %v1707_v16  ;;  %v2070_v9 = vmul.f32 %v3761_v45, %v4541_v61  ;;  %v2148_v4 = vmul.f32 %v3741_v23, %v4547_v14 }
 0x2c2   : > { %v2694_v11 = vmin.f32 %v2662_v26, 6.0  ;;  %v1546_v56 = vadd.f32 %v1514_v29, %v1478_v41  ;;  %v2261_v48 = vrot.slane %v5070_v51, 1  ;;  %v5086_v20 = vmul.f32 %v4974_v38, %v4541_v61 }
 0x2c3   : > { %v2575_v59 = vadd.f32 %v2471_v24, %v2331_v43  ;;  %v1952_v19 = vsel %vm1346_vm5, %v1949_v53, %v1951_v25  ;;  %v2263_v54 = vrot.slane %v2148_v4, 1  ;;  %v2392_v35 = vmul.f32 %v4974_v38, %v4547_v14 }
 0x2c4   : > { %3138 = vmatprep.subr.msk.mxu1 %vm788_vm2, %v2694_v11  ;;  %v1790_v22 = vadd.f32 %v1708_v5, %v1546_v56  ;;  %v940_v3 = vmul.f32 %v5602_v30, %v5079_v1  ;;  %v5098_v47 = vmul.f32 %v5603_v18, %v5079_v1  ;;  %v1010_v61 = vmul.f32 %v5603_v18, %v5081_v33 }
 0x2c5   : > { %v2614_v24 = vadd.f32 %v4590_v32, %v2575_v59  ;;  %v2264_v58 = vsel %vm1101_vm4, %v2261_v48, %v2263_v54  ;;  %v2505_v14 = vrot.slane %v5086_v20, 2  ;;  %v5109_v7 = vmul.f32 %v5607_v17, %v5079_v1 }
 0x2c6   : > { %v2034_v39 = vadd.f32 %v1952_v19, %v1790_v22  ;;  %v1108_v62 = vrot.slane %v5098_v47, 1  ;;  %v1110_v46 = vrot.slane %v1010_v61, 1  ;;  %v1255_v29 = vmul.f32 %v5607_v17, %v5081_v33 }
 0x2c7   : > { %v2646_v49 = vmax.f32 %v2614_v24, 0.0  ;;  %v2507_v50 = vrot.slane %v2392_v35, 2  ;;  %v1353_v16 = vrot.slane %v5109_v7, 2  ;;  %v1498_v26 = vmul.f32 %v3759_v44, %v4849_v15  ;;  %v3289_v7 = vld [vmem:[#allocation2 + $0xc8] sm:$0xff] }
 0x2c8   : > { %v2102_v41 = vadd.f32 %v2070_v9, %v2034_v39  ;;  %v1111_v25 = vsel %vm1101_vm4, %v1108_v62, %v1110_v46  ;;  %v1355_v43 = vrot.slane %v1255_v29, 2  ;;  %v5122_v5 = vmul.f32 %v3751_v34, %v4849_v15 }
 0x2c9   : > { %v2678_v4 = vmin.f32 %v2646_v49, 6.0  ;;  %v1217_v11 = vadd.f32 %v1111_v25, %v940_v3  ;;  %v1568_v56 = vmul.f32 %v3751_v34, %v4862_v57  ;;  %v5128_v59 = vmul.f32 %v3756_v40, %v4849_v15 }
 0x2ca   : > { %v2346_v19 = vadd.f32 %v2264_v58, %v2102_v41  ;;  %v1356_v9 = vsel %vm1346_vm5, %v1353_v16, %v1355_v43  ;;  %v5548_v54 = vrot.slane %v5122_v5, 1  ;;  %v1812_v35 = vmul.f32 %v3756_v40, %v4862_v57 }
 0x2cb   : > { %3139 = vmatpush3.xpose.msk.msra.mxu1 %vm788_vm2, %v2678_v4  ;;  %v2508_v22 = vsel %vm1346_vm5, %v2505_v14, %v2507_v50  ;;  %v1462_v3 = vadd.f32 %v1356_v9, %v1217_v11  ;;  %v1667_v61 = vrot.slane %v1568_v56, 1  ;;  %v5547_v24 = vrot.slane %v5128_v59, 2 }
 0x2cc   : > { %v2590_v58 = vadd.f32 %v2508_v22, %v2346_v19  ;;  %v1911_v39 = vrot.slane %v1812_v35, 2  ;;  %v5143_v46 = vmul.f32 %v3741_v23, %v4610_v52  ;;  %v2124_v29 = vmul.f32 %v3741_v23, %v4623_v36 }
 0x2cd   : > { %v1530_v49 = vadd.f32 %v1498_v26, %v1462_v3  ;;  %v1668_v41 = vsel %vm1101_vm4, %v5548_v54, %v1667_v61  ;;  %v5152_v50 = vmul.f32 %v4974_v38, %v4610_v52  ;;  %v2368_v25 = vmul.f32 %v4974_v38, %v4623_v36  ;;  %v5164_v3 = vld [vmem:[#allocation2 + $0xd8] sm:$0xff] }
 0x2ce   : > { %v2629_v43 = vadd.f32 %v4590_v32, %v2590_v58  ;;  %v1912_v4 = vsel %vm1346_vm5, %v5547_v24, %v1911_v39  ;;  %v2054_v26 = vmul.f32 %v3761_v45, %v4610_v52  ;;  %v5549_v11 = vrot.slane %v5143_v46, 1 }
 0x2cf   : > { %v1774_v56 = vadd.f32 %v1668_v41, %v1530_v49  ;;  %v2223_v19 = vrot.slane %v2124_v29, 1  ;;  %v5550_v9 = vrot.slane %v5152_v50, 2  ;;  %v2467_v35 = vrot.slane %v2368_v25, 2 }
 0x2d0   : > { %v2661_v22 = vmax.f32 %v2629_v43, 0.0  ;;  %v955_v36 = vmul.f32 %v5164_v3, %v5602_v30  ;;  %v1032_v61 = vmul.f32 %v5164_v3, %v5603_v18  ;;  %v1277_v58 = vmul.f32 %v5164_v3, %v5607_v17 }
 0x2d1   : > { %v2018_v52 = vadd.f32 %v1912_v4, %v1774_v56  ;;  %v2224_v39 = vsel %vm1101_vm4, %v5549_v11, %v2223_v19  ;;  %v2468_v29 = vsel %vm1346_vm5, %v5550_v9, %v2467_v35  ;;  %v1590_v49 = vmul.f32 %v3751_v34, %v4915_v2  ;;  %v5186_v11 = vld [vmem:[#allocation2 + $0x18] sm:$0xff] }
 0x2d2   : > { %v2693_v41 = vmin.f32 %v2661_v22, 6.0  ;;  %v1147_v25 = vrot.slane %v1032_v61, 1  ;;  %v1392_v43 = vrot.slane %v1277_v58, 2  ;;  %v1834_v24 = vmul.f32 %v3756_v40, %v4915_v2 }
 0x2d3   : > { %v2086_v54 = vadd.f32 %v2054_v26, %v2018_v52  ;;  %v1513_v4 = vmul.f32 %v3759_v44, %v4915_v2  ;;  %v1704_v56 = vrot.slane %v1590_v49, 1  ;;  %v2146_v19 = vmul.f32 %v3741_v23, %v4693_v28 }
 0x2d4   : > { %3140 = vmatprep.subr.msk.mxu1 %vm788_vm2, %v2693_v41  ;;  %v1149_v35 = vsel %vm1101_vm4, %v1147_v25, %v1148_v0  ;;  %v1948_v22 = vrot.slane %v1834_v24, 2  ;;  %v2069_v61 = vmul.f32 %v3761_v45, %v4693_v28  ;;  %v2390_v26 = vmul.f32 %v4974_v38, %v4693_v28 }
 0x2d5   : > { %v2330_v58 = vadd.f32 %v2224_v39, %v2086_v54  ;;  %v1232_v52 = vadd.f32 %v1149_v35, %v955_v36  ;;  %v1394_v49 = vsel %vm1346_vm5, %v1392_v43, %v1393_v6  ;;  %v2260_v9 = vrot.slane %v2146_v19, 1 }
 0x2d6   : > { %v1706_v63 = vsel %vm1101_vm4, %v1704_v56, %v1705_v37  ;;  %v1950_v0 = vsel %vm1346_vm5, %v1948_v22, %v1949_v53  ;;  %v2504_v24 = vrot.slane %v2390_v26, 2  ;;  %v1008_v41 = vmul.f32 %v5603_v18, %v5186_v11 }
 0x2d7   : > { %v2574_v28 = vadd.f32 %v2468_v29, %v2330_v58  ;;  %v1477_v54 = vadd.f32 %v1394_v49, %v1232_v52  ;;  %v939_v42 = vmul.f32 %v5602_v30, %v5186_v11  ;;  %v1253_v6 = vmul.f32 %v5607_v17, %v5186_v11 }
 0x2d8   : > { %v2262_v10 = vsel %vm1101_vm4, %v2260_v9, %v2261_v48  ;;  %v2506_v27 = vsel %vm1346_vm5, %v2504_v24, %v2505_v14  ;;  %v1107_v37 = vrot.slane %v1008_v41, 1  ;;  %v1566_v53 = vmul.f32 %v3751_v34, %v4956_v55 }
 0x2d9   : > { %v2613_v36 = vadd.f32 %v4590_v32, %v2574_v28  ;;  %v1545_v39 = vadd.f32 %v1513_v4, %v1477_v54  ;;  %v1352_v29 = vrot.slane %v1253_v6, 2  ;;  %v1810_v25 = vmul.f32 %v3756_v40, %v4956_v55  ;;  %v3290_v54 = vld [vmem:[#allocation2 + $0xd0] sm:$0x3] }
 0x2da   : > { %v1109_v51 = vsel %vm1101_vm4, %v1107_v37, %v1108_v62  ;;  %v1497_v48 = vmul.f32 %v3759_v44, %v4956_v55  ;;  %v1664_v20 = vrot.slane %v1566_v53, 1  ;;  %v2122_v14 = vmul.f32 %v3741_v23, %v4728_v60 }
 0x2db   : > { %v2645_v9 = vmax.f32 %v2613_v36, 0.0  ;;  %v1789_v43 = vadd.f32 %v1706_v63, %v1545_v39  ;;  %v1216_v56 = vadd.f32 %v1109_v51, %v939_v42  ;;  %v2053_v4 = vmul.f32 %v3761_v45, %v4728_v60 }
 0x2dc   : > { %v1354_v19 = vsel %vm1346_vm5, %v1352_v29, %v1353_v16  ;;  %v1908_v47 = vrot.slane %v1810_v25, 2  ;;  %v2220_v35 = vrot.slane %v2122_v14, 1  ;;  %v2366_v62 = vmul.f32 %v4974_v38, %v4728_v60 }
 0x2dd   : > { %v2677_v22 = vmin.f32 %v2645_v9, 6.0  ;;  %v2033_v26 = vadd.f32 %v1950_v0, %v1789_v43  ;;  %v1461_v58 = vadd.f32 %v1354_v19, %v1216_v56  ;;  %v5628_v52 = vrot.slane %v5122_v5, 1 }
 0x2de   : > { %v5629_v63 = vrot.slane %v5128_v59, 2  ;;  %v2464_v41 = vrot.slane %v2366_v62, 2  ;;  %v954_v16 = vmul.f32 %v3289_v7, %v5602_v30  ;;  %v5244_v28 = vmul.f32 %v3289_v7, %v5603_v18 }
 0x2df   : > { %v1666_v49 = vsel %vm1101_vm4, %v1664_v20, %v5628_v52  ;;  %3141 = vmatpush3.xpose.msk.msra.mxu1 %vm788_vm2, %v2677_v22  ;;  %v2101_v60 = vadd.f32 %v2069_v61, %v2033_v26  ;;  %v1529_v0 = vadd.f32 %v1497_v48, %v1461_v58  ;;  %v1031_v5 = vmul.f32 %v3290_v54, %v5603_v18 }
 0x2e0   : > { %v1910_v24 = vsel %vm1346_vm5, %v1908_v47, %v5629_v63  ;;  %v5249_v42 = vmul.f32 %v3289_v7, %v5607_v17  ;;  %v5630_v59 = vrot.slane %v5143_v46, 1  ;;  %v5631_v37 = vrot.slane %v5152_v50, 2 }
 0x2e1   : > { %v1143_v36 = vrot.slane %v5244_v28, 1  ;;  %v1276_v39 = vmul.f32 %v3290_v54, %v5607_v17  ;;  %v2345_v61 = vadd.f32 %v2262_v10, %v2101_v60  ;;  %v1773_v29 = vadd.f32 %v1666_v49, %v1529_v0  ;;  %v879_v0 = vld [vmem:[#allocation2 + $0x10] sm:$0x3] }
 0x2e2   : > { %v2222_v6 = vsel %vm1101_vm4, %v2220_v35, %v5630_v59  ;;  %v2466_v53 = vsel %vm1346_vm5, %v2464_v41, %v5631_v37  ;;  %v1145_v25 = vrot.slane %v1031_v5, 1  ;;  %v1388_v51 = vrot.slane %v5249_v42, 2 }
 0x2e3   : > { %v1390_v48 = vrot.slane %v1276_v39, 2  ;;  %v5262_v20 = vmul.f32 %v5018_v12, %v3751_v34  ;;  %v1589_v46 = vmul.f32 %v5026_v21, %v3751_v34  ;;  %v5268_v50 = vmul.f32 %v5018_v12, %v3756_v40 }
 0x2e4   : > { %v2589_v14 = vadd.f32 %v2506_v27, %v2345_v61  ;;  %v2017_v9 = vadd.f32 %v1910_v24, %v1773_v29  ;;  %v1146_v10 = vsel %vm1101_vm4, %v1143_v36, %v1145_v25  ;;  %v1833_v43 = vmul.f32 %v5026_v21, %v3756_v40  ;;  %v878_v24 = vld [vmem:[#allocation2 + $0x8] sm:$0xff] }
 0x2e5   : > { %v1231_v56 = vadd.f32 %v1146_v10, %v954_v16  ;;  %v1512_v19 = vmul.f32 %v5018_v12, %v3759_v44  ;;  %v1700_v47 = vrot.slane %v5262_v20, 1  ;;  %v1702_v35 = vrot.slane %v1589_v46, 1 }
 0x2e6   : > { %v2628_v62 = vadd.f32 %v4590_v32, %v2589_v14  ;;  %v2085_v22 = vadd.f32 %v2053_v4, %v2017_v9  ;;  %v1391_v27 = vsel %vm1346_vm5, %v1388_v51, %v1390_v48  ;;  %v1944_v26 = vrot.slane %v5268_v50, 2 }
 0x2e7   : > { %v1476_v58 = vadd.f32 %v1391_v27, %v1231_v56  ;;  %v1703_v21 = vsel %vm1101_vm4, %v1700_v47, %v1702_v35  ;;  %v1946_v52 = vrot.slane %v1833_v43, 2  ;;  %v5288_v12 = vmul.f32 %v3741_v23, %v4772_v13 }
 0x2e8   : > { %v2660_v49 = vmax.f32 %v2628_v62, 0.0  ;;  %v2329_v63 = vadd.f32 %v2222_v6, %v2085_v22  ;;  %v2068_v32 = vmul.f32 %v3761_v45, %v4772_v13  ;;  %v2145_v4 = vmul.f32 %v3741_v23, %v4781_v8 }
 0x2e9   : > { %v1544_v41 = vadd.f32 %v1512_v19, %v1476_v58  ;;  %v2256_v7 = vrot.slane %v5288_v12, 1  ;;  %v5297_v16 = vmul.f32 %v4974_v38, %v4772_v13  ;;  %v2389_v60 = vmul.f32 %v4974_v38, %v4781_v8  ;;  %v5313_v13 = vld [vmem:[%s5502_s4] ss:$0 sm:$0xff] }
 0x2ea   : > { %v2692_v54 = vmin.f32 %v2660_v49, 6.0  ;;  %v2573_v5 = vadd.f32 %v2466_v53, %v2329_v63  ;;  %v1947_v59 = vsel %vm1346_vm5, %v1944_v26, %v1946_v52  ;;  %v2258_v6 = vrot.slane %v2145_v4, 1 }
 0x2eb   : > { %v1788_v37 = vadd.f32 %v1703_v21, %v1544_v41  ;;  %v2500_v39 = vrot.slane %v5297_v16, 2  ;;  %v938_v61 = vmul.f32 %v5602_v30, %v878_v24  ;;  %v5307_v29 = vmul.f32 %v5603_v18, %v878_v24 }
 0x2ec   : > { %3142 = vmatprep.subr.msk.mxu1 %vm788_vm2, %v2692_v54  ;;  %v2612_v8 = vadd.f32 %v5313_v13, %v2573_v5  ;;  %v2502_v53 = vrot.slane %v2389_v60, 2  ;;  %v1007_v25 = vmul.f32 %v5603_v18, %v879_v0  ;;  %v5318_v48 = vmul.f32 %v5607_v17, %v878_v24 }
 0x2ed   : > { %v2032_v46 = vadd.f32 %v1947_v59, %v1788_v37  ;;  %v2259_v14 = vsel %vm1101_vm4, %v2256_v7, %v2258_v6  ;;  %v1103_v9 = vrot.slane %v5307_v29, 1  ;;  %v1252_v10 = vmul.f32 %v5607_v17, %v879_v0 }
 0x2ee   : > { %v2644_v43 = vmax.f32 %v2612_v8, 0.0  ;;  %v1105_v56 = vrot.slane %v1007_v25, 1  ;;  %v1348_v19 = vrot.slane %v5318_v48, 2  ;;  %v1496_v35 = vmul.f32 %v3759_v44, %v5079_v1 }
 0x2ef   : > { %v2100_v62 = vadd.f32 %v2068_v32, %v2032_v46  ;;  %v1350_v22 = vrot.slane %v1252_v10, 2  ;;  %v5330_v27 = vmul.f32 %v3751_v34, %v5079_v1  ;;  %v1565_v58 = vmul.f32 %v3751_v34, %v5081_v33 }
 0x2f0   : > { %v2676_v21 = vmin.f32 %v2644_v43, 6.0  ;;  %v1106_v52 = vsel %vm1101_vm4, %v1103_v9, %v1105_v56  ;;  %v5339_v49 = vmul.f32 %v3756_v40, %v5079_v1  ;;  %v1809_v63 = vmul.f32 %v3756_v40, %v5081_v33  ;;  %v3292_v43 = vld [vmem:[#allocation2 + $0xc0] sm:$0xff] }
 0x2f1   : > { %v2344_v32 = vadd.f32 %v2259_v14, %v2100_v62  ;;  %v1215_v4 = vadd.f32 %v1106_v52, %v938_v61  ;;  %v1351_v24 = vsel %vm1346_vm5, %v1348_v19, %v1350_v22  ;;  %v1660_v41 = vrot.slane %v5330_v27, 1 }
 0x2f2   : > { %3143 = vmatpush3.xpose.msk.msra.mxu1 %vm788_vm2, %v2676_v21  ;;  %v2503_v60 = vsel %vm1346_vm5, %v2500_v39, %v2502_v53  ;;  %v1662_v0 = vrot.slane %v1565_v58, 1  ;;  %v1904_v1 = vrot.slane %v5339_v49, 2  ;;  %v5354_v33 = vmul.f32 %v3741_v23, %v4849_v15 }
 0x2f3   : > { %v2588_v54 = vadd.f32 %v2503_v60, %v2344_v32  ;;  %v1460_v5 = vadd.f32 %v1351_v24, %v1215_v4  ;;  %v2121_v59 = vmul.f32 %v3741_v23, %v4862_v57  ;;  %v1906_v37 = vrot.slane %v1809_v63, 2 }
 0x2f4   : > { %v1663_v6 = vsel %vm1101_vm4, %v1660_v41, %v1662_v0  ;;  %v5363_v61 = vmul.f32 %v4974_v38, %v4849_v15  ;;  %v2365_v8 = vmul.f32 %v4974_v38, %v4862_v57  ;;  %v2052_v14 = vmul.f32 %v3761_v45, %v4849_v15 }
 0x2f5   : > { %v2627_v53 = vadd.f32 %v5313_v13, %v2588_v54  ;;  %v1528_v25 = vadd.f32 %v1496_v35, %v1460_v5  ;;  %v1907_v46 = vsel %vm1346_vm5, %v1904_v1, %v1906_v37  ;;  %v2216_v10 = vrot.slane %v5354_v33, 1 }
 0x2f6   : > { %v1029_v56 = vmul.f32 %v3292_v43, %v5603_v18  ;;  %v2218_v58 = vrot.slane %v2121_v59, 1  ;;  %v1274_v57 = vmul.f32 %v3292_v43, %v5607_v17  ;;  %v2460_v21 = vrot.slane %v5363_v61, 2  ;;  %v877_v59 = vld [vmem:[#allocation2] sm:$0xff] }
 0x2f7   : > { %v2659_v62 = vmax.f32 %v2627_v53, 0.0  ;;  %v1772_v22 = vadd.f32 %v1663_v6, %v1528_v25  ;;  %v2462_v35 = vrot.slane %v2365_v8, 2  ;;  %v1587_v63 = vmul.f32 %v5164_v3, %v3751_v34 }
 0x2f8   : > { %v1142_v52 = vrot.slane %v1029_v56, 1  ;;  %v953_v15 = vmul.f32 %v3292_v43, %v5602_v30  ;;  %v1387_v24 = vrot.slane %v1274_v57, 2  ;;  %v2219_v60 = vsel %vm1101_vm4, %v2216_v10, %v2218_v58 }
 0x2f9   : > { %v2691_v32 = vmin.f32 %v2659_v62, 6.0  ;;  %v2016_v4 = vadd.f32 %v1907_v46, %v1772_v22  ;;  %v1699_v54 = vrot.slane %v1587_v63, 1  ;;  %v1831_v5 = vmul.f32 %v5164_v3, %v3756_v40 }
 0x2fa   : > { %v1144_v0 = vsel %vm1101_vm4, %v1142_v52, %v1143_v36  ;;  %v1511_v8 = vmul.f32 %v5164_v3, %v3759_v44  ;;  %v2463_v53 = vsel %vm1346_vm5, %v2460_v21, %v2462_v35  ;;  %v1389_v28 = vsel %vm1346_vm5, %v1387_v24, %v1388_v51 }
 0x2fb   : > { %3144 = vmatprep.subr.msk.mxu1 %vm788_vm2, %v2691_v32  ;;  %v2084_v6 = vadd.f32 %v2052_v14, %v2016_v4  ;;  %v1230_v37 = vadd.f32 %v1144_v0, %v953_v15  ;;  %v2143_v36 = vmul.f32 %v3741_v23, %v4915_v2  ;;  %v2067_v14 = vmul.f32 %v3761_v45, %v4915_v2 }
 0x2fc   : > { %v1005_v43 = vmul.f32 %v5603_v18, %v877_v59  ;;  %v1701_v3 = vsel %vm1101_vm4, %v1699_v54, %v1700_v47  ;;  %v1943_v56 = vrot.slane %v1831_v5, 2  ;;  %v937_v62 = vmul.f32 %v5602_v30, %v877_v59 }
 0x2fd   : > { %v2328_v25 = vadd.f32 %v2219_v60, %v2084_v6  ;;  %v1475_v46 = vadd.f32 %v1389_v28, %v1230_v37  ;;  %v1250_v42 = vmul.f32 %v5607_v17, %v877_v59  ;;  %v1563_v57 = vmul.f32 %v3751_v34, %v5186_v11 }
 0x2fe   : > { %v1102_v58 = vrot.slane %v1005_v43, 1  ;;  %v2255_v35 = vrot.slane %v2143_v36, 1  ;;  %v2387_v52 = vmul.f32 %v4974_v38, %v4915_v2  ;;  %v1807_v20 = vmul.f32 %v3756_v40, %v5186_v11 }
 0x2ff   : > { %v2572_v51 = vadd.f32 %v2463_v53, %v2328_v25  ;;  %v1543_v22 = vadd.f32 %v1511_v8, %v1475_v46  ;;  %v1347_v18 = vrot.slane %v1250_v42, 2  ;;  %v1659_v17 = vrot.slane %v1563_v57, 1  ;;  %v3293_v46 = vld [vmem:[%s3616_s3] sm:$0xff]  ;;  %s3380_s3 = scalar_lea.vmem %s3379_s11, 256 }
 0x300   : > { %v1104_v30 = vsel %vm1101_vm4, %v1102_v58, %v1103_v9  ;;  %v1945_v34 = vsel %vm1346_vm5, %v1943_v56, %v1944_v26  ;;  %v1495_v40 = vmul.f32 %v3759_v44, %v5186_v11  ;;  %v2119_v29 = vmul.f32 %v3741_v23, %v4956_v55  ;;  %v2707_v9 = vld [vmem:[%s5504_s6] sm:$0xf]  ;;  %p3382_p6 = scmp.lt.s32.totalorder %s3380_s3, %s3374_s13 }
 0x301   : > { %v2611_v47 = vadd.f32 %v5313_v13, %v2572_v51  ;;  %v1787_v63 = vadd.f32 %v1701_v3, %v1543_v22  ;;  %v1214_v32 = vadd.f32 %v1104_v30, %v937_v62  ;;  %v1349_v2 = vsel %vm1346_vm5, %v1347_v18, %v1348_v19 }
 0x302   : > { %v2257_v50 = vsel %vm1101_vm4, %v2255_v35, %v2256_v7  ;;  %v2499_v26 = vrot.slane %v2387_v52, 2  ;;  %v1661_v44 = vsel %vm1101_vm4, %v1659_v17, %v1660_v41  ;;  %v1903_v11 = vrot.slane %v1807_v20, 2  ;;  %p3383_p9 = por %p3382_p6, %p3381_p4 }
 0x303   : > { %v2643_v4 = vmax.f32 %v2611_v47, 0.0  ;;  %v2031_v15 = vadd.f32 %v1945_v34, %v1787_v63  ;;  %v1459_v48 = vadd.f32 %v1349_v2, %v1214_v32  ;;  %v3450_v60 = vmov 0  }
 0x304   : > { %3271 = vset.pattern.permute.xlu1 %v3450_v60  ;;  %3272 = vset.pattern.permute.xlu0 %v3450_v60  ;;  %v2215_v12 = vrot.slane %v2119_v29, 1  ;;  %v2363_v7 = vmul.f32 %v4974_v38, %v4956_v55  ;;  %v2501_v54 = vsel %vm1346_vm5, %v2499_v26, %v2500_v39  ;;  %v2051_v41 = vmul.f32 %v3761_v45, %v4956_v55  ;;  %p3384_p12 = pnand %p3383_p9, %p3377_p2 }
 0x305   : > { %v2675_v24 = vmin.f32 %v2643_v4, 6.0  ;;  %v2099_v19 = vadd.f32 %v2067_v14, %v2031_v15  ;;  %v1527_v23 = vadd.f32 %v1495_v40, %v1459_v48  ;;  %2710 = vperm.xlu1 %3271, %v2707_v9   ;;  %v1905_v59 = vsel %vm1346_vm5, %v1903_v11, %v1904_v1  ;;  %v5632_v14 = vld [vmem:[#allocation13_spill] sm:$0xff] }
 0x306   : > { %v2217_v38 = vsel %vm1101_vm4, %v2215_v12, %v2216_v10  ;;  %v2459_v8 = vrot.slane %v2363_v7, 2 }
 0x307   : > { %3145 = vmatpush3.xpose.msk.msra.mxu1 %vm788_vm2, %v2675_v24  ;;  %v2343_v0 = vadd.f32 %v2257_v50, %v2099_v19  ;;  %v1771_v27 = vadd.f32 %v1661_v44, %v1527_v23 }
 0x308   : > { %v2461_v45 = vsel %vm1346_vm5, %v2459_v8, %v2460_v21 }
 0x309   : > { %v2587_v5 = vadd.f32 %v2501_v54, %v2343_v0  ;;  %v2015_v6 = vadd.f32 %v1905_v59, %v1771_v27 }
 0x30b   : > { %v2626_v37 = vadd.f32 %v5313_v13, %v2587_v5  ;;  %v2083_v16 = vadd.f32 %v2051_v41, %v2015_v6 }
 0x30d   : > { %v2658_v53 = vmax.f32 %v2626_v37, 0.0  ;;  %v2327_v39 = vadd.f32 %v2217_v38, %v2083_v16 }
 0x30f   : > { %v2690_v28 = vmin.f32 %v2658_v53, 6.0  ;;  %v2571_v55 = vadd.f32 %v2461_v45, %v2327_v39 }
 0x311   : > { %3146 = vmatprep.subr.msk.mxu1 %vm788_vm2, %v2690_v28  ;;  %v2610_v49 = vadd.f32 %v5313_v13, %v2571_v55 }
 0x313   : > { %v2642_v1 = vmax.f32 %v2610_v49, 0.0 }
 0x315   : > { %v2674_v33 = vmin.f32 %v2642_v1, 6.0 }
 0x317   : > { %3147 = vmatpush3.xpose.msk.msra.mxu1 %vm788_vm2, %v2674_v33 }
 0x31a   : > { %3149 = vmatmul.mubr.msk.f32.vlgmr.msra.gmra.mxu1 %vm788_vm2, %v4830_v31 }
 0x380   : > { %v2711_v10 = vpop.permute.xlu1 %2710 }
 0x3da   : > { %v2878_v36 = vpop.f32.mrf.mxu1 }
 0x3db   : > { %v2879_v25 = vadd.f32 %v2878_v36, %v2711_v10 }
 0x3dc   : > { %v2880_v61 = vpop.f32.mrf.mxu1 }
 0x3dd   : > { %v2881_v21 = vadd.f32 %v2880_v61, %v2711_v10  ;;  %v2883_v13 = vadd.f32 %v3293_v46, %v2879_v25 }
 0x3df   : > { %v2884_v43 = vadd.f32 %v2881_v21, %v5632_v14 }
 0x3e1   : > { %v2887_v3 = vcombine.low %v2883_v13, %v2884_v43 }
 0x3e3   : > { %2889 = vst [vmem:[%s321_s9] sm:$0xff] %v2887_v3 }
 0x3e4   : > { %3387 = shalt.err (!%p3384_p12)
}
 0x3e5   : > { %s3388_s17 = scalar_lea.hbm %s2903_s22, 128  ;;  %s3392_s16 = scalar_lea.hbm %s5505_s7, 256 }
 0x3e6   : > { %p3389_p3 = scmp.ne.s32.totalorder %s2903_s22, %s3388_s17  ;;  %p3393_p8 = scmp.lt.s32.totalorder %s2903_s22, %s5505_s7 }
 0x3e7   : > { %p3394_p11 = scmp.lt.s32.totalorder %s3392_s16, %s3388_s17 }
 0x3e8   : > { %p3390_p7 = pnand %p3389_p3, %p5633_p0 }
 0x3e9   : > { %p3395_p5 = por %p3394_p11, %p3393_p8 }
 0x3ea   : > { %p3391_p10 = pneg %p3390_p7 }
 0x3ec   : > { %p3396_p13 = pnand %p3395_p5, %p3391_p10 }
 0x3ee   : > { %3399 = shalt.err (!%p3396_p13)
}
 0x3ef   : > { %3210 = dma.vmem_to_hbm [thread:$0]  (%p5633_p0), %s2906_s19, 128, %s2903_s22, %s2891_s23  }
 0x3f0 PF: > { %s2917_s2 = sand.u32 1, %s3430_s24   ;;  %p5634_p1 = scmp.ne.s32.totalorder %s5554_s8, 0 }
 0x3f1   : > { %p5635_p2 = scmp.ge.s32.totalorder %s3442_s27, 2  ;;  %s2918_s9 = scalar_lea.sflag [#allocation5], %s2917_s2 }
 0x3f3   : > { %p3224_p4 = pnand %p5635_p2, %p5634_p1 }
 0x3f5   : > { %p3225_p6 = pneg %p3224_p4 }
 0x3f7   : > { %3425 = dma.done.wait (%p3225_p6), %s2918_s9, 128  }
 0x3f8   : > { %3427 = vsyncadd (%p3225_p6), %s2918_s9, 4294967168  ;;  %p21_p9 = scmp.ge.s32.totalorder %s3564_s29, 4   ;;  %s5636_s24 = smov %s3434_s25 }
 0x3f9   : > { %s5637_s25 = smov %s3438_s26  ;;  %s5638_s26 = smov %s3580_s15 }
 0x3fa   : > { %s5639_s27 = smov %s3564_s29  ;;  %23 = sbr.rel (!%p21_p9) target bundleno = 9 (0x9), region = 102 }
 0x3ff   :  { %2923 = vsyncpa [#allocation4], 1 }
 0x400   :  { %2925 = vsyncpa [#allocation4 + $0x1], 1 }
 0x401   :  { %2926 = vsyncpa [#allocation7], 1 }
 0x402   :  { %2927 = vsyncpa [#allocation5], 1 }
 0x403   :  { %2929 = vsyncpa [#allocation5 + $0x1], 1 }

</bundles_post_ra>
